<compile_context>
chip_gen: v7x
topology: tpu7x:2x2x1
jax: 0.10.0
libtpu: 0.0.40
codegen_flags: <defaults>
</compile_context>

<pallas_src>
import numpy as np
import jax
import jax.numpy as jnp
from jax.experimental import pallas as pl
from jax.experimental.pallas import tpu as pltpu


# ----------------------------------------------------------------------------
# Kernel
# ----------------------------------------------------------------------------
def _make_encoder_kernel(H, W, n_img):
    """Kernel over one slab: activations laid out as (C, n_img*H*W)."""
    HW = H * W
    SLAB = n_img * HW

    # Static tap shifts (dy-major then dx), matching the weight packing.
    # tap_t[p] = a[p + oy*W + ox] (within the image; halo zeroed by mask).
    shifts = []
    for dy in range(3):
        for dx in range(3):
            off = (dy - 1) * W + (dx - 1)
            shifts.append((-off) % SLAB)

    def kernel(x_ref, m_ref, w1_ref, b1_ref, w2_ref, b2_ref, w3_ref, b3_ref,
               o_ref):
        def conv_bn_relu(a, w_ref, b_ref):
            # a: (Cin, SLAB) f32 ; w_ref: (9, Cout, Cin) bf16 ; b_ref: (Cout,1)
            acc = None
            for t in range(9):
                if shifts[t] == 0:
                    tap = a                                    # center tap
                else:
                    tap = (pltpu.roll(a, shifts[t], axis=1)    # XLU lane roll
                           * m_ref[pl.ds(t, 1), :])            # zero the halo
                d = jnp.dot(w_ref[t], tap.astype(jnp.bfloat16),
                            preferred_element_type=jnp.float32)
                acc = d if acc is None else acc + d
            return jnp.maximum(acc + b_ref[...], 0.0)          # bias + ReLU

        a = x_ref[0]                                           # (C, SLAB) f32
        a = conv_bn_relu(a, w1_ref, b1_ref)                    # (24, SLAB)
        a = conv_bn_relu(a, w2_ref, b2_ref)                    # (24, SLAB)
        a = conv_bn_relu(a, w3_ref, b3_ref)                    # (32, SLAB)
        o_ref[0] = a                                           # lane-dense

    return kernel


def _build_masks(H, W, n_img):
    """(9, n_img*H*W) f32 border masks (1 inside the image, 0 across edges)."""
    HW = H * W
    q = np.arange(HW)
    hh, ww = q // W, q % W
    m = np.zeros((9, HW), np.float32)
    i = 0
    for dy in range(3):
        for dx in range(3):
            oy, ox = dy - 1, dx - 1
            valid = ((hh + oy >= 0) & (hh + oy < H) &
                     (ww + ox >= 0) & (ww + ox < W))
            m[i] = valid.astype(np.float32)
            i += 1
    return jnp.asarray(np.tile(m, (1, n_img)))


def _default_num_slabs(N):
    """2-way batch split only on v7x (2 TCs/chip); single step elsewhere."""
    try:
        kind = jax.devices()[0].device_kind.lower()
    except Exception:
        return 1
    if ("v7" in kind or "7x" in kind) and N % 2 == 0:
        return 2
    return 1


def encoder_forward(x_nchw, packed_params, *, num_slabs=None):
    """x_nchw: (N, C, H, W) float32 -> (N, 32, H, W) float32 (NCHW)."""
    (w1, b1), (w2, b2), (w3, b3) = packed_params
    N, C, H, W = x_nchw.shape
    HW = H * W
    c_out = w3.shape[1]

    if num_slabs is None:
        num_slabs = _default_num_slabs(N)
    assert N % num_slabs == 0
    n_per = N // num_slabs
    SLAB = n_per * HW

    # (N, C, H, W) -> (num_slabs, C, n_per*HW): channels on sublanes, fused
    # batch*pixels on lanes (lane-dense; pixels of one image stay contiguous).
    x = (x_nchw.astype(jnp.float32)
         .reshape(num_slabs, n_per, C, HW)
         .transpose(0, 2, 1, 3)
         .reshape(num_slabs, C, SLAB))

    masks = _build_masks(H, W, n_per)
    kernel = _make_encoder_kernel(H, W, n_per)

    out = pl.pallas_call(
        kernel,
        out_shape=jax.ShapeDtypeStruct((num_slabs, c_out, SLAB), jnp.float32),
        grid=(num_slabs,),
        in_specs=[
            pl.BlockSpec((1, C, SLAB), lambda s: (s, 0, 0)),
            pl.BlockSpec(masks.shape, lambda s: (0, 0)),
            pl.BlockSpec(w1.shape, lambda s: (0, 0, 0)),
            pl.BlockSpec(b1.shape, lambda s: (0, 0)),
            pl.BlockSpec(w2.shape, lambda s: (0, 0, 0)),
            pl.BlockSpec(b2.shape, lambda s: (0, 0)),
            pl.BlockSpec(w3.shape, lambda s: (0, 0, 0)),
            pl.BlockSpec(b3.shape, lambda s: (0, 0)),
        ],
        out_specs=pl.BlockSpec((1, c_out, SLAB), lambda s: (s, 0, 0)),
        compiler_params=pltpu.CompilerParams(
            dimension_semantics=("parallel",),
            vmem_limit_bytes=32 * 1024 * 1024),
    )(x, masks, w1, b1, w2, b2, w3, b3)

    # (num_slabs, 32, n_per*HW) -> (N, 32, H, W)
    return (out.reshape(num_slabs, c_out, n_per, HW)
            .transpose(0, 2, 1, 3)
            .reshape(N, c_out, H, W))


# ----------------------------------------------------------------------------
# Parameter construction (PyTorch-style init + folded eval-mode BN)
# ----------------------------------------------------------------------------
def init_conv_params(key, cin, cout):
    """Deterministic PyTorch-style (Kaiming-uniform-ish) conv init, HWIO."""
    k_w, k_b = jax.random.split(key)
    fan_in = cin * 3 * 3
    bound = 1.0 / np.sqrt(fan_in)
    w = jax.random.uniform(k_w, (3, 3, cin, cout), jnp.float32, -bound, bound)
    b = jax.random.uniform(k_b, (cout,), jnp.float32, -bound, bound)
    return w, b


def fold_bn_into_conv(w_hwio, conv_bias, gamma=None, beta=None,
                      running_mean=None, running_var=None, eps=1e-5):
    """Fold eval-mode BatchNorm2d and the conv bias into conv weights/bias.
    Defaults correspond to a freshly-initialized BatchNorm2d (gamma=1, beta=0,
    running_mean=0, running_var=1), matching the PyTorch module at init."""
    cout = w_hwio.shape[-1]
    gamma = jnp.ones((cout,), jnp.float32) if gamma is None else gamma
    beta = jnp.zeros((cout,), jnp.float32) if beta is None else beta
    mean = jnp.zeros((cout,), jnp.float32) if running_mean is None else running_mean
    var = jnp.ones((cout,), jnp.float32) if running_var is None else running_var
    scale = gamma * jax.lax.rsqrt(var + eps)
    w_f = (w_hwio * scale).astype(jnp.float32)
    b_f = ((conv_bias - mean) * scale + beta).astype(jnp.float32)
    return w_f, b_f


def pack_for_kernel(w_hwio, bias):
    """HWIO (3,3,Cin,Cout) -> (9, Cout, Cin) bf16 (tap-major, MXU-friendly);
    bias -> (Cout, 1) f32."""
    kh, kw, cin, cout = w_hwio.shape
    w_k = jnp.transpose(w_hwio.reshape(kh * kw, cin, cout),
                        (0, 2, 1)).astype(jnp.bfloat16)
    b_k = bias.reshape(cout, 1).astype(jnp.float32)
    return w_k, b_k


def make_encoder_params(key, channels):
    dims = [(channels, 24), (24, 24), (24, 32)]
    keys = jax.random.split(key, len(dims))
    packed, folded = [], []
    for k, (cin, cout) in zip(keys, dims):
        w, b = init_conv_params(k, cin, cout)
        w_f, b_f = fold_bn_into_conv(w, b)
        folded.append((w_f, b_f))
        packed.append(pack_for_kernel(w_f, b_f))
    return packed, folded


# ----------------------------------------------------------------------------
# Reference (same folded BN; bf16 matmul operands with f32 accumulation,
# matching the kernel's MXU numerics so the tolerance stays meaningful).
# ----------------------------------------------------------------------------
def reference_forward(x_nchw, folded_params):
    y = x_nchw.astype(jnp.float32)
    for (w, b) in folded_params:
        y = jax.lax.conv_general_dilated(
            y.astype(jnp.bfloat16), w.astype(jnp.bfloat16),
            window_strides=(1, 1), padding="SAME",
            dimension_numbers=("NCHW", "HWIO", "NCHW"),
            preferred_element_type=jnp.float32)
        y = jnp.maximum(y + b.reshape(1, -1, 1, 1), 0.0)
    return y


if __name__ == "__main__":
    key = jax.random.PRNGKey(0)
    k_x, k_p = jax.random.split(key)

    N, C, H, W = 2, 4, 16, 16
    x = jax.random.normal(k_x, (N, C, H, W), dtype=jnp.float32)

    packed_params, folded_params = make_encoder_params(k_p, C)

    fwd = jax.jit(encoder_forward)
    out = jax.block_until_ready(fwd(x, packed_params))
    assert out.shape == (N, 32, H, W), out.shape

    ref = jax.block_until_ready(reference_forward(x, folded_params))
    np.testing.assert_allclose(np.asarray(out), np.asarray(ref),
                               rtol=1e-3, atol=1e-3)

    print("KERNEL_OK")
</pallas_src>

<mosaic_0001>
module attributes {stable_mosaic.version = 11 : i64} {
  func.func @kernel(%arg0: i32, %arg1: memref<1x4x512xf32, #tpu.memory_space<vmem>>, %arg2: memref<9x512xf32, #tpu.memory_space<vmem>>, %arg3: memref<9x24x4xbf16, #tpu.memory_space<vmem>>, %arg4: memref<24x1xf32, #tpu.memory_space<vmem>>, %arg5: memref<9x24x24xbf16, #tpu.memory_space<vmem>>, %arg6: memref<24x1xf32, #tpu.memory_space<vmem>>, %arg7: memref<9x32x24xbf16, #tpu.memory_space<vmem>>, %arg8: memref<32x1xf32, #tpu.memory_space<vmem>>, %arg9: memref<1x32x512xf32, #tpu.memory_space<vmem>>) attributes {dimension_semantics = [#tpu.dimension_semantics<parallel>], iteration_bounds = array<i64: 1>, scalar_prefetch = 0 : i64, scratch_operands = 0 : i64, tpu.core_type = #tpu.core_type<tc>, window_params = [{transform_indices = @transform_0, window_bounds = array<i64: 1, 4, 512>}, {pipeline_mode = #tpu.pipeline_mode<synchronous>, transform_indices = @transform_1, window_bounds = array<i64: 9, 512>}, {pipeline_mode = #tpu.pipeline_mode<synchronous>, transform_indices = @transform_2, window_bounds = array<i64: 9, 24, 4>}, {pipeline_mode = #tpu.pipeline_mode<synchronous>, transform_indices = @transform_3, window_bounds = array<i64: 24, 1>}, {pipeline_mode = #tpu.pipeline_mode<synchronous>, transform_indices = @transform_4, window_bounds = array<i64: 9, 24, 24>}, {pipeline_mode = #tpu.pipeline_mode<synchronous>, transform_indices = @transform_5, window_bounds = array<i64: 24, 1>}, {pipeline_mode = #tpu.pipeline_mode<synchronous>, transform_indices = @transform_6, window_bounds = array<i64: 9, 32, 24>}, {pipeline_mode = #tpu.pipeline_mode<synchronous>, transform_indices = @transform_7, window_bounds = array<i64: 32, 1>}, {transform_indices = @transform_8, window_bounds = array<i64: 1, 32, 512>}]} {
    %c0 = arith.constant 0 : index
    %c0_0 = arith.constant 0 : index
    %c0_1 = arith.constant 0 : index
    %0 = vector.load %arg1[%c0, %c0_0, %c0_1] : memref<1x4x512xf32, #tpu.memory_space<vmem>>, vector<1x4x512xf32>
    %1 = vector.shape_cast %0 : vector<1x4x512xf32> to vector<4x512xf32>
    %c17_i32 = arith.constant 17 : i32
    %2 = tpu.dynamic_rotate %1 by %c17_i32 dim 1 : vector<4x512xf32>, i32 -> vector<4x512xf32>
    %c0_2 = arith.constant 0 : index
    %c0_3 = arith.constant 0 : index
    %3 = vector.load %arg2[%c0_2, %c0_3] : memref<9x512xf32, #tpu.memory_space<vmem>>, vector<1x512xf32>
    %4 = vector.broadcast %3 : vector<1x512xf32> to vector<4x512xf32>
    %5 = arith.mulf %2, %4 : vector<4x512xf32>
    %c0_4 = arith.constant 0 : index
    %c0_5 = arith.constant 0 : index
    %c0_6 = arith.constant 0 : index
    %6 = vector.load %arg3[%c0_4, %c0_5, %c0_6] : memref<9x24x4xbf16, #tpu.memory_space<vmem>>, vector<1x24x4xbf16>
    %7 = vector.shape_cast %6 : vector<1x24x4xbf16> to vector<24x4xbf16>
    %8 = arith.truncf %5 : vector<4x512xf32> to vector<4x512xbf16>
    %cst = arith.constant dense<0.000000e+00> : vector<24x512xf32>
    %9 = tpu.matmul %7, %8, %cst {dimension_numbers = #tpu.dot_dimension_numbers<[1], [0], [0], [1], [0, 0, 1, 1], [], []>} : vector<24x4xbf16>, vector<4x512xbf16>, vector<24x512xf32> -> vector<24x512xf32>
    %c16_i32 = arith.constant 16 : i32
    %10 = tpu.dynamic_rotate %1 by %c16_i32 dim 1 : vector<4x512xf32>, i32 -> vector<4x512xf32>
    %c1 = arith.constant 1 : index
    %c0_7 = arith.constant 0 : index
    %11 = vector.load %arg2[%c1, %c0_7] : memref<9x512xf32, #tpu.memory_space<vmem>>, vector<1x512xf32>
    %12 = vector.broadcast %11 : vector<1x512xf32> to vector<4x512xf32>
    %13 = arith.mulf %10, %12 : vector<4x512xf32>
    %c1_8 = arith.constant 1 : index
    %c0_9 = arith.constant 0 : index
    %c0_10 = arith.constant 0 : index
    %14 = vector.load %arg3[%c1_8, %c0_9, %c0_10] : memref<9x24x4xbf16, #tpu.memory_space<vmem>>, vector<1x24x4xbf16>
    %15 = vector.shape_cast %14 : vector<1x24x4xbf16> to vector<24x4xbf16>
    %16 = arith.truncf %13 : vector<4x512xf32> to vector<4x512xbf16>
    %cst_11 = arith.constant dense<0.000000e+00> : vector<24x512xf32>
    %17 = tpu.matmul %15, %16, %cst_11 {dimension_numbers = #tpu.dot_dimension_numbers<[1], [0], [0], [1], [0, 0, 1, 1], [], []>} : vector<24x4xbf16>, vector<4x512xbf16>, vector<24x512xf32> -> vector<24x512xf32>
    %18 = arith.addf %9, %17 : vector<24x512xf32>
    %c15_i32 = arith.constant 15 : i32
    %19 = tpu.dynamic_rotate %1 by %c15_i32 dim 1 : vector<4x512xf32>, i32 -> vector<4x512xf32>
    %c2 = arith.constant 2 : index
    %c0_12 = arith.constant 0 : index
    %20 = vector.load %arg2[%c2, %c0_12] : memref<9x512xf32, #tpu.memory_space<vmem>>, vector<1x512xf32>
    %21 = vector.broadcast %20 : vector<1x512xf32> to vector<4x512xf32>
    %22 = arith.mulf %19, %21 : vector<4x512xf32>
    %c2_13 = arith.constant 2 : index
    %c0_14 = arith.constant 0 : index
    %c0_15 = arith.constant 0 : index
    %23 = vector.load %arg3[%c2_13, %c0_14, %c0_15] : memref<9x24x4xbf16, #tpu.memory_space<vmem>>, vector<1x24x4xbf16>
    %24 = vector.shape_cast %23 : vector<1x24x4xbf16> to vector<24x4xbf16>
    %25 = arith.truncf %22 : vector<4x512xf32> to vector<4x512xbf16>
    %cst_16 = arith.constant dense<0.000000e+00> : vector<24x512xf32>
    %26 = tpu.matmul %24, %25, %cst_16 {dimension_numbers = #tpu.dot_dimension_numbers<[1], [0], [0], [1], [0, 0, 1, 1], [], []>} : vector<24x4xbf16>, vector<4x512xbf16>, vector<24x512xf32> -> vector<24x512xf32>
    %27 = arith.addf %18, %26 : vector<24x512xf32>
    %c1_i32 = arith.constant 1 : i32
    %28 = tpu.dynamic_rotate %1 by %c1_i32 dim 1 : vector<4x512xf32>, i32 -> vector<4x512xf32>
    %c3 = arith.constant 3 : index
    %c0_17 = arith.constant 0 : index
    %29 = vector.load %arg2[%c3, %c0_17] : memref<9x512xf32, #tpu.memory_space<vmem>>, vector<1x512xf32>
    %30 = vector.broadcast %29 : vector<1x512xf32> to vector<4x512xf32>
    %31 = arith.mulf %28, %30 : vector<4x512xf32>
    %c3_18 = arith.constant 3 : index
    %c0_19 = arith.constant 0 : index
    %c0_20 = arith.constant 0 : index
    %32 = vector.load %arg3[%c3_18, %c0_19, %c0_20] : memref<9x24x4xbf16, #tpu.memory_space<vmem>>, vector<1x24x4xbf16>
    %33 = vector.shape_cast %32 : vector<1x24x4xbf16> to vector<24x4xbf16>
    %34 = arith.truncf %31 : vector<4x512xf32> to vector<4x512xbf16>
    %cst_21 = arith.constant dense<0.000000e+00> : vector<24x512xf32>
    %35 = tpu.matmul %33, %34, %cst_21 {dimension_numbers = #tpu.dot_dimension_numbers<[1], [0], [0], [1], [0, 0, 1, 1], [], []>} : vector<24x4xbf16>, vector<4x512xbf16>, vector<24x512xf32> -> vector<24x512xf32>
    %36 = arith.addf %27, %35 : vector<24x512xf32>
    %c4 = arith.constant 4 : index
    %c0_22 = arith.constant 0 : index
    %c0_23 = arith.constant 0 : index
    %37 = vector.load %arg3[%c4, %c0_22, %c0_23] : memref<9x24x4xbf16, #tpu.memory_space<vmem>>, vector<1x24x4xbf16>
    %38 = vector.shape_cast %37 : vector<1x24x4xbf16> to vector<24x4xbf16>
    %39 = arith.truncf %1 : vector<4x512xf32> to vector<4x512xbf16>
    %cst_24 = arith.constant dense<0.000000e+00> : vector<24x512xf32>
    %40 = tpu.matmul %38, %39, %cst_24 {dimension_numbers = #tpu.dot_dimension_numbers<[1], [0], [0], [1], [0, 0, 1, 1], [], []>} : vector<24x4xbf16>, vector<4x512xbf16>, vector<24x512xf32> -> vector<24x512xf32>
    %41 = arith.addf %36, %40 : vector<24x512xf32>
    %c511_i32 = arith.constant 511 : i32
    %42 = tpu.dynamic_rotate %1 by %c511_i32 dim 1 : vector<4x512xf32>, i32 -> vector<4x512xf32>
    %c5 = arith.constant 5 : index
    %c0_25 = arith.constant 0 : index
    %43 = vector.load %arg2[%c5, %c0_25] : memref<9x512xf32, #tpu.memory_space<vmem>>, vector<1x512xf32>
    %44 = vector.broadcast %43 : vector<1x512xf32> to vector<4x512xf32>
    %45 = arith.mulf %42, %44 : vector<4x512xf32>
    %c5_26 = arith.constant 5 : index
    %c0_27 = arith.constant 0 : index
    %c0_28 = arith.constant 0 : index
    %46 = vector.load %arg3[%c5_26, %c0_27, %c0_28] : memref<9x24x4xbf16, #tpu.memory_space<vmem>>, vector<1x24x4xbf16>
    %47 = vector.shape_cast %46 : vector<1x24x4xbf16> to vector<24x4xbf16>
    %48 = arith.truncf %45 : vector<4x512xf32> to vector<4x512xbf16>
    %cst_29 = arith.constant dense<0.000000e+00> : vector<24x512xf32>
    %49 = tpu.matmul %47, %48, %cst_29 {dimension_numbers = #tpu.dot_dimension_numbers<[1], [0], [0], [1], [0, 0, 1, 1], [], []>} : vector<24x4xbf16>, vector<4x512xbf16>, vector<24x512xf32> -> vector<24x512xf32>
    %50 = arith.addf %41, %49 : vector<24x512xf32>
    %c497_i32 = arith.constant 497 : i32
    %51 = tpu.dynamic_rotate %1 by %c497_i32 dim 1 : vector<4x512xf32>, i32 -> vector<4x512xf32>
    %c6 = arith.constant 6 : index
    %c0_30 = arith.constant 0 : index
    %52 = vector.load %arg2[%c6, %c0_30] : memref<9x512xf32, #tpu.memory_space<vmem>>, vector<1x512xf32>
    %53 = vector.broadcast %52 : vector<1x512xf32> to vector<4x512xf32>
    %54 = arith.mulf %51, %53 : vector<4x512xf32>
    %c6_31 = arith.constant 6 : index
    %c0_32 = arith.constant 0 : index
    %c0_33 = arith.constant 0 : index
    %55 = vector.load %arg3[%c6_31, %c0_32, %c0_33] : memref<9x24x4xbf16, #tpu.memory_space<vmem>>, vector<1x24x4xbf16>
    %56 = vector.shape_cast %55 : vector<1x24x4xbf16> to vector<24x4xbf16>
    %57 = arith.truncf %54 : vector<4x512xf32> to vector<4x512xbf16>
    %cst_34 = arith.constant dense<0.000000e+00> : vector<24x512xf32>
    %58 = tpu.matmul %56, %57, %cst_34 {dimension_numbers = #tpu.dot_dimension_numbers<[1], [0], [0], [1], [0, 0, 1, 1], [], []>} : vector<24x4xbf16>, vector<4x512xbf16>, vector<24x512xf32> -> vector<24x512xf32>
    %59 = arith.addf %50, %58 : vector<24x512xf32>
    %c496_i32 = arith.constant 496 : i32
    %60 = tpu.dynamic_rotate %1 by %c496_i32 dim 1 : vector<4x512xf32>, i32 -> vector<4x512xf32>
    %c7 = arith.constant 7 : index
    %c0_35 = arith.constant 0 : index
    %61 = vector.load %arg2[%c7, %c0_35] : memref<9x512xf32, #tpu.memory_space<vmem>>, vector<1x512xf32>
    %62 = vector.broadcast %61 : vector<1x512xf32> to vector<4x512xf32>
    %63 = arith.mulf %60, %62 : vector<4x512xf32>
    %c7_36 = arith.constant 7 : index
    %c0_37 = arith.constant 0 : index
    %c0_38 = arith.constant 0 : index
    %64 = vector.load %arg3[%c7_36, %c0_37, %c0_38] : memref<9x24x4xbf16, #tpu.memory_space<vmem>>, vector<1x24x4xbf16>
    %65 = vector.shape_cast %64 : vector<1x24x4xbf16> to vector<24x4xbf16>
    %66 = arith.truncf %63 : vector<4x512xf32> to vector<4x512xbf16>
    %cst_39 = arith.constant dense<0.000000e+00> : vector<24x512xf32>
    %67 = tpu.matmul %65, %66, %cst_39 {dimension_numbers = #tpu.dot_dimension_numbers<[1], [0], [0], [1], [0, 0, 1, 1], [], []>} : vector<24x4xbf16>, vector<4x512xbf16>, vector<24x512xf32> -> vector<24x512xf32>
    %68 = arith.addf %59, %67 : vector<24x512xf32>
    %c495_i32 = arith.constant 495 : i32
    %69 = tpu.dynamic_rotate %1 by %c495_i32 dim 1 : vector<4x512xf32>, i32 -> vector<4x512xf32>
    %c8 = arith.constant 8 : index
    %c0_40 = arith.constant 0 : index
    %70 = vector.load %arg2[%c8, %c0_40] : memref<9x512xf32, #tpu.memory_space<vmem>>, vector<1x512xf32>
    %71 = vector.broadcast %70 : vector<1x512xf32> to vector<4x512xf32>
    %72 = arith.mulf %69, %71 : vector<4x512xf32>
    %c8_41 = arith.constant 8 : index
    %c0_42 = arith.constant 0 : index
    %c0_43 = arith.constant 0 : index
    %73 = vector.load %arg3[%c8_41, %c0_42, %c0_43] : memref<9x24x4xbf16, #tpu.memory_space<vmem>>, vector<1x24x4xbf16>
    %74 = vector.shape_cast %73 : vector<1x24x4xbf16> to vector<24x4xbf16>
    %75 = arith.truncf %72 : vector<4x512xf32> to vector<4x512xbf16>
    %cst_44 = arith.constant dense<0.000000e+00> : vector<24x512xf32>
    %76 = tpu.matmul %74, %75, %cst_44 {dimension_numbers = #tpu.dot_dimension_numbers<[1], [0], [0], [1], [0, 0, 1, 1], [], []>} : vector<24x4xbf16>, vector<4x512xbf16>, vector<24x512xf32> -> vector<24x512xf32>
    %77 = arith.addf %68, %76 : vector<24x512xf32>
    %c0_45 = arith.constant 0 : index
    %c0_46 = arith.constant 0 : index
    %78 = vector.load %arg4[%c0_45, %c0_46] : memref<24x1xf32, #tpu.memory_space<vmem>>, vector<24x1xf32>
    %79 = vector.broadcast %78 : vector<24x1xf32> to vector<24x512xf32>
    %80 = arith.addf %77, %79 : vector<24x512xf32>
    %cst_47 = arith.constant 0.000000e+00 : f32
    %81 = vector.broadcast %cst_47 : f32 to vector<24x512xf32>
    %82 = arith.maximumf %80, %81 : vector<24x512xf32>
    %c17_i32_48 = arith.constant 17 : i32
    %83 = tpu.dynamic_rotate %82 by %c17_i32_48 dim 1 : vector<24x512xf32>, i32 -> vector<24x512xf32>
    %c0_49 = arith.constant 0 : index
    %c0_50 = arith.constant 0 : index
    %84 = vector.load %arg2[%c0_49, %c0_50] : memref<9x512xf32, #tpu.memory_space<vmem>>, vector<1x512xf32>
    %85 = vector.broadcast %84 : vector<1x512xf32> to vector<24x512xf32>
    %86 = arith.mulf %83, %85 : vector<24x512xf32>
    %c0_51 = arith.constant 0 : index
    %c0_52 = arith.constant 0 : index
    %c0_53 = arith.constant 0 : index
    %87 = vector.load %arg5[%c0_51, %c0_52, %c0_53] : memref<9x24x24xbf16, #tpu.memory_space<vmem>>, vector<1x24x24xbf16>
    %88 = vector.shape_cast %87 : vector<1x24x24xbf16> to vector<24x24xbf16>
    %89 = arith.truncf %86 : vector<24x512xf32> to vector<24x512xbf16>
    %cst_54 = arith.constant dense<0.000000e+00> : vector<24x512xf32>
    %90 = tpu.matmul %88, %89, %cst_54 {dimension_numbers = #tpu.dot_dimension_numbers<[1], [0], [0], [1], [0, 0, 1, 1], [], []>} : vector<24x24xbf16>, vector<24x512xbf16>, vector<24x512xf32> -> vector<24x512xf32>
    %c16_i32_55 = arith.constant 16 : i32
    %91 = tpu.dynamic_rotate %82 by %c16_i32_55 dim 1 : vector<24x512xf32>, i32 -> vector<24x512xf32>
    %c1_56 = arith.constant 1 : index
    %c0_57 = arith.constant 0 : index
    %92 = vector.load %arg2[%c1_56, %c0_57] : memref<9x512xf32, #tpu.memory_space<vmem>>, vector<1x512xf32>
    %93 = vector.broadcast %92 : vector<1x512xf32> to vector<24x512xf32>
    %94 = arith.mulf %91, %93 : vector<24x512xf32>
    %c1_58 = arith.constant 1 : index
    %c0_59 = arith.constant 0 : index
    %c0_60 = arith.constant 0 : index
    %95 = vector.load %arg5[%c1_58, %c0_59, %c0_60] : memref<9x24x24xbf16, #tpu.memory_space<vmem>>, vector<1x24x24xbf16>
    %96 = vector.shape_cast %95 : vector<1x24x24xbf16> to vector<24x24xbf16>
    %97 = arith.truncf %94 : vector<24x512xf32> to vector<24x512xbf16>
    %cst_61 = arith.constant dense<0.000000e+00> : vector<24x512xf32>
    %98 = tpu.matmul %96, %97, %cst_61 {dimension_numbers = #tpu.dot_dimension_numbers<[1], [0], [0], [1], [0, 0, 1, 1], [], []>} : vector<24x24xbf16>, vector<24x512xbf16>, vector<24x512xf32> -> vector<24x512xf32>
    %99 = arith.addf %90, %98 : vector<24x512xf32>
    %c15_i32_62 = arith.constant 15 : i32
    %100 = tpu.dynamic_rotate %82 by %c15_i32_62 dim 1 : vector<24x512xf32>, i32 -> vector<24x512xf32>
    %c2_63 = arith.constant 2 : index
    %c0_64 = arith.constant 0 : index
    %101 = vector.load %arg2[%c2_63, %c0_64] : memref<9x512xf32, #tpu.memory_space<vmem>>, vector<1x512xf32>
    %102 = vector.broadcast %101 : vector<1x512xf32> to vector<24x512xf32>
    %103 = arith.mulf %100, %102 : vector<24x512xf32>
    %c2_65 = arith.constant 2 : index
    %c0_66 = arith.constant 0 : index
    %c0_67 = arith.constant 0 : index
    %104 = vector.load %arg5[%c2_65, %c0_66, %c0_67] : memref<9x24x24xbf16, #tpu.memory_space<vmem>>, vector<1x24x24xbf16>
    %105 = vector.shape_cast %104 : vector<1x24x24xbf16> to vector<24x24xbf16>
    %106 = arith.truncf %103 : vector<24x512xf32> to vector<24x512xbf16>
    %cst_68 = arith.constant dense<0.000000e+00> : vector<24x512xf32>
    %107 = tpu.matmul %105, %106, %cst_68 {dimension_numbers = #tpu.dot_dimension_numbers<[1], [0], [0], [1], [0, 0, 1, 1], [], []>} : vector<24x24xbf16>, vector<24x512xbf16>, vector<24x512xf32> -> vector<24x512xf32>
    %108 = arith.addf %99, %107 : vector<24x512xf32>
    %c1_i32_69 = arith.constant 1 : i32
    %109 = tpu.dynamic_rotate %82 by %c1_i32_69 dim 1 : vector<24x512xf32>, i32 -> vector<24x512xf32>
    %c3_70 = arith.constant 3 : index
    %c0_71 = arith.constant 0 : index
    %110 = vector.load %arg2[%c3_70, %c0_71] : memref<9x512xf32, #tpu.memory_space<vmem>>, vector<1x512xf32>
    %111 = vector.broadcast %110 : vector<1x512xf32> to vector<24x512xf32>
    %112 = arith.mulf %109, %111 : vector<24x512xf32>
    %c3_72 = arith.constant 3 : index
    %c0_73 = arith.constant 0 : index
    %c0_74 = arith.constant 0 : index
    %113 = vector.load %arg5[%c3_72, %c0_73, %c0_74] : memref<9x24x24xbf16, #tpu.memory_space<vmem>>, vector<1x24x24xbf16>
    %114 = vector.shape_cast %113 : vector<1x24x24xbf16> to vector<24x24xbf16>
    %115 = arith.truncf %112 : vector<24x512xf32> to vector<24x512xbf16>
    %cst_75 = arith.constant dense<0.000000e+00> : vector<24x512xf32>
    %116 = tpu.matmul %114, %115, %cst_75 {dimension_numbers = #tpu.dot_dimension_numbers<[1], [0], [0], [1], [0, 0, 1, 1], [], []>} : vector<24x24xbf16>, vector<24x512xbf16>, vector<24x512xf32> -> vector<24x512xf32>
    %117 = arith.addf %108, %116 : vector<24x512xf32>
    %c4_76 = arith.constant 4 : index
    %c0_77 = arith.constant 0 : index
    %c0_78 = arith.constant 0 : index
    %118 = vector.load %arg5[%c4_76, %c0_77, %c0_78] : memref<9x24x24xbf16, #tpu.memory_space<vmem>>, vector<1x24x24xbf16>
    %119 = vector.shape_cast %118 : vector<1x24x24xbf16> to vector<24x24xbf16>
    %120 = arith.truncf %82 : vector<24x512xf32> to vector<24x512xbf16>
    %cst_79 = arith.constant dense<0.000000e+00> : vector<24x512xf32>
    %121 = tpu.matmul %119, %120, %cst_79 {dimension_numbers = #tpu.dot_dimension_numbers<[1], [0], [0], [1], [0, 0, 1, 1], [], []>} : vector<24x24xbf16>, vector<24x512xbf16>, vector<24x512xf32> -> vector<24x512xf32>
    %122 = arith.addf %117, %121 : vector<24x512xf32>
    %c511_i32_80 = arith.constant 511 : i32
    %123 = tpu.dynamic_rotate %82 by %c511_i32_80 dim 1 : vector<24x512xf32>, i32 -> vector<24x512xf32>
    %c5_81 = arith.constant 5 : index
    %c0_82 = arith.constant 0 : index
    %124 = vector.load %arg2[%c5_81, %c0_82] : memref<9x512xf32, #tpu.memory_space<vmem>>, vector<1x512xf32>
    %125 = vector.broadcast %124 : vector<1x512xf32> to vector<24x512xf32>
    %126 = arith.mulf %123, %125 : vector<24x512xf32>
    %c5_83 = arith.constant 5 : index
    %c0_84 = arith.constant 0 : index
    %c0_85 = arith.constant 0 : index
    %127 = vector.load %arg5[%c5_83, %c0_84, %c0_85] : memref<9x24x24xbf16, #tpu.memory_space<vmem>>, vector<1x24x24xbf16>
    %128 = vector.shape_cast %127 : vector<1x24x24xbf16> to vector<24x24xbf16>
    %129 = arith.truncf %126 : vector<24x512xf32> to vector<24x512xbf16>
    %cst_86 = arith.constant dense<0.000000e+00> : vector<24x512xf32>
    %130 = tpu.matmul %128, %129, %cst_86 {dimension_numbers = #tpu.dot_dimension_numbers<[1], [0], [0], [1], [0, 0, 1, 1], [], []>} : vector<24x24xbf16>, vector<24x512xbf16>, vector<24x512xf32> -> vector<24x512xf32>
    %131 = arith.addf %122, %130 : vector<24x512xf32>
    %c497_i32_87 = arith.constant 497 : i32
    %132 = tpu.dynamic_rotate %82 by %c497_i32_87 dim 1 : vector<24x512xf32>, i32 -> vector<24x512xf32>
    %c6_88 = arith.constant 6 : index
    %c0_89 = arith.constant 0 : index
    %133 = vector.load %arg2[%c6_88, %c0_89] : memref<9x512xf32, #tpu.memory_space<vmem>>, vector<1x512xf32>
    %134 = vector.broadcast %133 : vector<1x512xf32> to vector<24x512xf32>
    %135 = arith.mulf %132, %134 : vector<24x512xf32>
    %c6_90 = arith.constant 6 : index
    %c0_91 = arith.constant 0 : index
    %c0_92 = arith.constant 0 : index
    %136 = vector.load %arg5[%c6_90, %c0_91, %c0_92] : memref<9x24x24xbf16, #tpu.memory_space<vmem>>, vector<1x24x24xbf16>
    %137 = vector.shape_cast %136 : vector<1x24x24xbf16> to vector<24x24xbf16>
    %138 = arith.truncf %135 : vector<24x512xf32> to vector<24x512xbf16>
    %cst_93 = arith.constant dense<0.000000e+00> : vector<24x512xf32>
    %139 = tpu.matmul %137, %138, %cst_93 {dimension_numbers = #tpu.dot_dimension_numbers<[1], [0], [0], [1], [0, 0, 1, 1], [], []>} : vector<24x24xbf16>, vector<24x512xbf16>, vector<24x512xf32> -> vector<24x512xf32>
    %140 = arith.addf %131, %139 : vector<24x512xf32>
    %c496_i32_94 = arith.constant 496 : i32
    %141 = tpu.dynamic_rotate %82 by %c496_i32_94 dim 1 : vector<24x512xf32>, i32 -> vector<24x512xf32>
    %c7_95 = arith.constant 7 : index
    %c0_96 = arith.constant 0 : index
    %142 = vector.load %arg2[%c7_95, %c0_96] : memref<9x512xf32, #tpu.memory_space<vmem>>, vector<1x512xf32>
    %143 = vector.broadcast %142 : vector<1x512xf32> to vector<24x512xf32>
    %144 = arith.mulf %141, %143 : vector<24x512xf32>
    %c7_97 = arith.constant 7 : index
    %c0_98 = arith.constant 0 : index
    %c0_99 = arith.constant 0 : index
    %145 = vector.load %arg5[%c7_97, %c0_98, %c0_99] : memref<9x24x24xbf16, #tpu.memory_space<vmem>>, vector<1x24x24xbf16>
    %146 = vector.shape_cast %145 : vector<1x24x24xbf16> to vector<24x24xbf16>
    %147 = arith.truncf %144 : vector<24x512xf32> to vector<24x512xbf16>
    %cst_100 = arith.constant dense<0.000000e+00> : vector<24x512xf32>
    %148 = tpu.matmul %146, %147, %cst_100 {dimension_numbers = #tpu.dot_dimension_numbers<[1], [0], [0], [1], [0, 0, 1, 1], [], []>} : vector<24x24xbf16>, vector<24x512xbf16>, vector<24x512xf32> -> vector<24x512xf32>
    %149 = arith.addf %140, %148 : vector<24x512xf32>
    %c495_i32_101 = arith.constant 495 : i32
    %150 = tpu.dynamic_rotate %82 by %c495_i32_101 dim 1 : vector<24x512xf32>, i32 -> vector<24x512xf32>
    %c8_102 = arith.constant 8 : index
    %c0_103 = arith.constant 0 : index
    %151 = vector.load %arg2[%c8_102, %c0_103] : memref<9x512xf32, #tpu.memory_space<vmem>>, vector<1x512xf32>
    %152 = vector.broadcast %151 : vector<1x512xf32> to vector<24x512xf32>
    %153 = arith.mulf %150, %152 : vector<24x512xf32>
    %c8_104 = arith.constant 8 : index
    %c0_105 = arith.constant 0 : index
    %c0_106 = arith.constant 0 : index
    %154 = vector.load %arg5[%c8_104, %c0_105, %c0_106] : memref<9x24x24xbf16, #tpu.memory_space<vmem>>, vector<1x24x24xbf16>
    %155 = vector.shape_cast %154 : vector<1x24x24xbf16> to vector<24x24xbf16>
    %156 = arith.truncf %153 : vector<24x512xf32> to vector<24x512xbf16>
    %cst_107 = arith.constant dense<0.000000e+00> : vector<24x512xf32>
    %157 = tpu.matmul %155, %156, %cst_107 {dimension_numbers = #tpu.dot_dimension_numbers<[1], [0], [0], [1], [0, 0, 1, 1], [], []>} : vector<24x24xbf16>, vector<24x512xbf16>, vector<24x512xf32> -> vector<24x512xf32>
    %158 = arith.addf %149, %157 : vector<24x512xf32>
    %c0_108 = arith.constant 0 : index
    %c0_109 = arith.constant 0 : index
    %159 = vector.load %arg6[%c0_108, %c0_109] : memref<24x1xf32, #tpu.memory_space<vmem>>, vector<24x1xf32>
    %160 = vector.broadcast %159 : vector<24x1xf32> to vector<24x512xf32>
    %161 = arith.addf %158, %160 : vector<24x512xf32>
    %cst_110 = arith.constant 0.000000e+00 : f32
    %162 = vector.broadcast %cst_110 : f32 to vector<24x512xf32>
    %163 = arith.maximumf %161, %162 : vector<24x512xf32>
    %c17_i32_111 = arith.constant 17 : i32
    %164 = tpu.dynamic_rotate %163 by %c17_i32_111 dim 1 : vector<24x512xf32>, i32 -> vector<24x512xf32>
    %c0_112 = arith.constant 0 : index
    %c0_113 = arith.constant 0 : index
    %165 = vector.load %arg2[%c0_112, %c0_113] : memref<9x512xf32, #tpu.memory_space<vmem>>, vector<1x512xf32>
    %166 = vector.broadcast %165 : vector<1x512xf32> to vector<24x512xf32>
    %167 = arith.mulf %164, %166 : vector<24x512xf32>
    %c0_114 = arith.constant 0 : index
    %c0_115 = arith.constant 0 : index
    %c0_116 = arith.constant 0 : index
    %168 = vector.load %arg7[%c0_114, %c0_115, %c0_116] : memref<9x32x24xbf16, #tpu.memory_space<vmem>>, vector<1x32x24xbf16>
    %169 = vector.shape_cast %168 : vector<1x32x24xbf16> to vector<32x24xbf16>
    %170 = arith.truncf %167 : vector<24x512xf32> to vector<24x512xbf16>
    %cst_117 = arith.constant dense<0.000000e+00> : vector<32x512xf32>
    %171 = tpu.matmul %169, %170, %cst_117 {dimension_numbers = #tpu.dot_dimension_numbers<[1], [0], [0], [1], [0, 0, 1, 1], [], []>} : vector<32x24xbf16>, vector<24x512xbf16>, vector<32x512xf32> -> vector<32x512xf32>
    %c16_i32_118 = arith.constant 16 : i32
    %172 = tpu.dynamic_rotate %163 by %c16_i32_118 dim 1 : vector<24x512xf32>, i32 -> vector<24x512xf32>
    %c1_119 = arith.constant 1 : index
    %c0_120 = arith.constant 0 : index
    %173 = vector.load %arg2[%c1_119, %c0_120] : memref<9x512xf32, #tpu.memory_space<vmem>>, vector<1x512xf32>
    %174 = vector.broadcast %173 : vector<1x512xf32> to vector<24x512xf32>
    %175 = arith.mulf %172, %174 : vector<24x512xf32>
    %c1_121 = arith.constant 1 : index
    %c0_122 = arith.constant 0 : index
    %c0_123 = arith.constant 0 : index
    %176 = vector.load %arg7[%c1_121, %c0_122, %c0_123] : memref<9x32x24xbf16, #tpu.memory_space<vmem>>, vector<1x32x24xbf16>
    %177 = vector.shape_cast %176 : vector<1x32x24xbf16> to vector<32x24xbf16>
    %178 = arith.truncf %175 : vector<24x512xf32> to vector<24x512xbf16>
    %cst_124 = arith.constant dense<0.000000e+00> : vector<32x512xf32>
    %179 = tpu.matmul %177, %178, %cst_124 {dimension_numbers = #tpu.dot_dimension_numbers<[1], [0], [0], [1], [0, 0, 1, 1], [], []>} : vector<32x24xbf16>, vector<24x512xbf16>, vector<32x512xf32> -> vector<32x512xf32>
    %180 = arith.addf %171, %179 : vector<32x512xf32>
    %c15_i32_125 = arith.constant 15 : i32
    %181 = tpu.dynamic_rotate %163 by %c15_i32_125 dim 1 : vector<24x512xf32>, i32 -> vector<24x512xf32>
    %c2_126 = arith.constant 2 : index
    %c0_127 = arith.constant 0 : index
    %182 = vector.load %arg2[%c2_126, %c0_127] : memref<9x512xf32, #tpu.memory_space<vmem>>, vector<1x512xf32>
    %183 = vector.broadcast %182 : vector<1x512xf32> to vector<24x512xf32>
    %184 = arith.mulf %181, %183 : vector<24x512xf32>
    %c2_128 = arith.constant 2 : index
    %c0_129 = arith.constant 0 : index
    %c0_130 = arith.constant 0 : index
    %185 = vector.load %arg7[%c2_128, %c0_129, %c0_130] : memref<9x32x24xbf16, #tpu.memory_space<vmem>>, vector<1x32x24xbf16>
    %186 = vector.shape_cast %185 : vector<1x32x24xbf16> to vector<32x24xbf16>
    %187 = arith.truncf %184 : vector<24x512xf32> to vector<24x512xbf16>
    %cst_131 = arith.constant dense<0.000000e+00> : vector<32x512xf32>
    %188 = tpu.matmul %186, %187, %cst_131 {dimension_numbers = #tpu.dot_dimension_numbers<[1], [0], [0], [1], [0, 0, 1, 1], [], []>} : vector<32x24xbf16>, vector<24x512xbf16>, vector<32x512xf32> -> vector<32x512xf32>
    %189 = arith.addf %180, %188 : vector<32x512xf32>
    %c1_i32_132 = arith.constant 1 : i32
    %190 = tpu.dynamic_rotate %163 by %c1_i32_132 dim 1 : vector<24x512xf32>, i32 -> vector<24x512xf32>
    %c3_133 = arith.constant 3 : index
    %c0_134 = arith.constant 0 : index
    %191 = vector.load %arg2[%c3_133, %c0_134] : memref<9x512xf32, #tpu.memory_space<vmem>>, vector<1x512xf32>
    %192 = vector.broadcast %191 : vector<1x512xf32> to vector<24x512xf32>
    %193 = arith.mulf %190, %192 : vector<24x512xf32>
    %c3_135 = arith.constant 3 : index
    %c0_136 = arith.constant 0 : index
    %c0_137 = arith.constant 0 : index
    %194 = vector.load %arg7[%c3_135, %c0_136, %c0_137] : memref<9x32x24xbf16, #tpu.memory_space<vmem>>, vector<1x32x24xbf16>
    %195 = vector.shape_cast %194 : vector<1x32x24xbf16> to vector<32x24xbf16>
    %196 = arith.truncf %193 : vector<24x512xf32> to vector<24x512xbf16>
    %cst_138 = arith.constant dense<0.000000e+00> : vector<32x512xf32>
    %197 = tpu.matmul %195, %196, %cst_138 {dimension_numbers = #tpu.dot_dimension_numbers<[1], [0], [0], [1], [0, 0, 1, 1], [], []>} : vector<32x24xbf16>, vector<24x512xbf16>, vector<32x512xf32> -> vector<32x512xf32>
    %198 = arith.addf %189, %197 : vector<32x512xf32>
    %c4_139 = arith.constant 4 : index
    %c0_140 = arith.constant 0 : index
    %c0_141 = arith.constant 0 : index
    %199 = vector.load %arg7[%c4_139, %c0_140, %c0_141] : memref<9x32x24xbf16, #tpu.memory_space<vmem>>, vector<1x32x24xbf16>
    %200 = vector.shape_cast %199 : vector<1x32x24xbf16> to vector<32x24xbf16>
    %201 = arith.truncf %163 : vector<24x512xf32> to vector<24x512xbf16>
    %cst_142 = arith.constant dense<0.000000e+00> : vector<32x512xf32>
    %202 = tpu.matmul %200, %201, %cst_142 {dimension_numbers = #tpu.dot_dimension_numbers<[1], [0], [0], [1], [0, 0, 1, 1], [], []>} : vector<32x24xbf16>, vector<24x512xbf16>, vector<32x512xf32> -> vector<32x512xf32>
    %203 = arith.addf %198, %202 : vector<32x512xf32>
    %c511_i32_143 = arith.constant 511 : i32
    %204 = tpu.dynamic_rotate %163 by %c511_i32_143 dim 1 : vector<24x512xf32>, i32 -> vector<24x512xf32>
    %c5_144 = arith.constant 5 : index
    %c0_145 = arith.constant 0 : index
    %205 = vector.load %arg2[%c5_144, %c0_145] : memref<9x512xf32, #tpu.memory_space<vmem>>, vector<1x512xf32>
    %206 = vector.broadcast %205 : vector<1x512xf32> to vector<24x512xf32>
    %207 = arith.mulf %204, %206 : vector<24x512xf32>
    %c5_146 = arith.constant 5 : index
    %c0_147 = arith.constant 0 : index
    %c0_148 = arith.constant 0 : index
    %208 = vector.load %arg7[%c5_146, %c0_147, %c0_148] : memref<9x32x24xbf16, #tpu.memory_space<vmem>>, vector<1x32x24xbf16>
    %209 = vector.shape_cast %208 : vector<1x32x24xbf16> to vector<32x24xbf16>
    %210 = arith.truncf %207 : vector<24x512xf32> to vector<24x512xbf16>
    %cst_149 = arith.constant dense<0.000000e+00> : vector<32x512xf32>
    %211 = tpu.matmul %209, %210, %cst_149 {dimension_numbers = #tpu.dot_dimension_numbers<[1], [0], [0], [1], [0, 0, 1, 1], [], []>} : vector<32x24xbf16>, vector<24x512xbf16>, vector<32x512xf32> -> vector<32x512xf32>
    %212 = arith.addf %203, %211 : vector<32x512xf32>
    %c497_i32_150 = arith.constant 497 : i32
    %213 = tpu.dynamic_rotate %163 by %c497_i32_150 dim 1 : vector<24x512xf32>, i32 -> vector<24x512xf32>
    %c6_151 = arith.constant 6 : index
    %c0_152 = arith.constant 0 : index
    %214 = vector.load %arg2[%c6_151, %c0_152] : memref<9x512xf32, #tpu.memory_space<vmem>>, vector<1x512xf32>
    %215 = vector.broadcast %214 : vector<1x512xf32> to vector<24x512xf32>
    %216 = arith.mulf %213, %215 : vector<24x512xf32>
    %c6_153 = arith.constant 6 : index
    %c0_154 = arith.constant 0 : index
    %c0_155 = arith.constant 0 : index
    %217 = vector.load %arg7[%c6_153, %c0_154, %c0_155] : memref<9x32x24xbf16, #tpu.memory_space<vmem>>, vector<1x32x24xbf16>
    %218 = vector.shape_cast %217 : vector<1x32x24xbf16> to vector<32x24xbf16>
    %219 = arith.truncf %216 : vector<24x512xf32> to vector<24x512xbf16>
    %cst_156 = arith.constant dense<0.000000e+00> : vector<32x512xf32>
    %220 = tpu.matmul %218, %219, %cst_156 {dimension_numbers = #tpu.dot_dimension_numbers<[1], [0], [0], [1], [0, 0, 1, 1], [], []>} : vector<32x24xbf16>, vector<24x512xbf16>, vector<32x512xf32> -> vector<32x512xf32>
    %221 = arith.addf %212, %220 : vector<32x512xf32>
    %c496_i32_157 = arith.constant 496 : i32
    %222 = tpu.dynamic_rotate %163 by %c496_i32_157 dim 1 : vector<24x512xf32>, i32 -> vector<24x512xf32>
    %c7_158 = arith.constant 7 : index
    %c0_159 = arith.constant 0 : index
    %223 = vector.load %arg2[%c7_158, %c0_159] : memref<9x512xf32, #tpu.memory_space<vmem>>, vector<1x512xf32>
    %224 = vector.broadcast %223 : vector<1x512xf32> to vector<24x512xf32>
    %225 = arith.mulf %222, %224 : vector<24x512xf32>
    %c7_160 = arith.constant 7 : index
    %c0_161 = arith.constant 0 : index
    %c0_162 = arith.constant 0 : index
    %226 = vector.load %arg7[%c7_160, %c0_161, %c0_162] : memref<9x32x24xbf16, #tpu.memory_space<vmem>>, vector<1x32x24xbf16>
    %227 = vector.shape_cast %226 : vector<1x32x24xbf16> to vector<32x24xbf16>
    %228 = arith.truncf %225 : vector<24x512xf32> to vector<24x512xbf16>
    %cst_163 = arith.constant dense<0.000000e+00> : vector<32x512xf32>
    %229 = tpu.matmul %227, %228, %cst_163 {dimension_numbers = #tpu.dot_dimension_numbers<[1], [0], [0], [1], [0, 0, 1, 1], [], []>} : vector<32x24xbf16>, vector<24x512xbf16>, vector<32x512xf32> -> vector<32x512xf32>
    %230 = arith.addf %221, %229 : vector<32x512xf32>
    %c495_i32_164 = arith.constant 495 : i32
    %231 = tpu.dynamic_rotate %163 by %c495_i32_164 dim 1 : vector<24x512xf32>, i32 -> vector<24x512xf32>
    %c8_165 = arith.constant 8 : index
    %c0_166 = arith.constant 0 : index
    %232 = vector.load %arg2[%c8_165, %c0_166] : memref<9x512xf32, #tpu.memory_space<vmem>>, vector<1x512xf32>
    %233 = vector.broadcast %232 : vector<1x512xf32> to vector<24x512xf32>
    %234 = arith.mulf %231, %233 : vector<24x512xf32>
    %c8_167 = arith.constant 8 : index
    %c0_168 = arith.constant 0 : index
    %c0_169 = arith.constant 0 : index
    %235 = vector.load %arg7[%c8_167, %c0_168, %c0_169] : memref<9x32x24xbf16, #tpu.memory_space<vmem>>, vector<1x32x24xbf16>
    %236 = vector.shape_cast %235 : vector<1x32x24xbf16> to vector<32x24xbf16>
    %237 = arith.truncf %234 : vector<24x512xf32> to vector<24x512xbf16>
    %cst_170 = arith.constant dense<0.000000e+00> : vector<32x512xf32>
    %238 = tpu.matmul %236, %237, %cst_170 {dimension_numbers = #tpu.dot_dimension_numbers<[1], [0], [0], [1], [0, 0, 1, 1], [], []>} : vector<32x24xbf16>, vector<24x512xbf16>, vector<32x512xf32> -> vector<32x512xf32>
    %239 = arith.addf %230, %238 : vector<32x512xf32>
    %c0_171 = arith.constant 0 : index
    %c0_172 = arith.constant 0 : index
    %240 = vector.load %arg8[%c0_171, %c0_172] : memref<32x1xf32, #tpu.memory_space<vmem>>, vector<32x1xf32>
    %241 = vector.broadcast %240 : vector<32x1xf32> to vector<32x512xf32>
    %242 = arith.addf %239, %241 : vector<32x512xf32>
    %cst_173 = arith.constant 0.000000e+00 : f32
    %243 = vector.broadcast %cst_173 : f32 to vector<32x512xf32>
    %244 = arith.maximumf %242, %243 : vector<32x512xf32>
    %c0_174 = arith.constant 0 : index
    %c0_175 = arith.constant 0 : index
    %c0_176 = arith.constant 0 : index
    %245 = vector.load %arg9[%c0_174, %c0_175, %c0_176] : memref<1x32x512xf32, #tpu.memory_space<vmem>>, vector<1x32x512xf32>
    %246 = vector.shape_cast %245 : vector<1x32x512xf32> to vector<32x512xf32>
    %247 = vector.shape_cast %244 : vector<32x512xf32> to vector<1x32x512xf32>
    tpu.vector_store %arg9[%c0_174, %c0_175, %c0_176], %247 {strides = array<i32>} : memref<1x32x512xf32, #tpu.memory_space<vmem>>, vector<1x32x512xf32>,
    return
  }
  func.func @transform_0(%arg0: i32) -> (i32, i32, i32) {
    %c0_i32 = arith.constant 0 : i32
    %c0_i32_0 = arith.constant 0 : i32
    %c0_i32_1 = arith.constant 0 : i32
    return %arg0, %c0_i32, %c0_i32_0 : i32, i32, i32
  }
  func.func @transform_1(%arg0: i32) -> (i32, i32) {
    %c0_i32 = arith.constant 0 : i32
    %c0_i32_0 = arith.constant 0 : i32
    %c0_i32_1 = arith.constant 0 : i32
    return %c0_i32, %c0_i32_0 : i32, i32
  }
  func.func @transform_2(%arg0: i32) -> (i32, i32, i32) {
    %c0_i32 = arith.constant 0 : i32
    %c0_i32_0 = arith.constant 0 : i32
    %c0_i32_1 = arith.constant 0 : i32
    %c0_i32_2 = arith.constant 0 : i32
    return %c0_i32, %c0_i32_0, %c0_i32_1 : i32, i32, i32
  }
  func.func @transform_3(%arg0: i32) -> (i32, i32) {
    %c0_i32 = arith.constant 0 : i32
    %c0_i32_0 = arith.constant 0 : i32
    %c0_i32_1 = arith.constant 0 : i32
    return %c0_i32, %c0_i32_0 : i32, i32
  }
  func.func @transform_4(%arg0: i32) -> (i32, i32, i32) {
    %c0_i32 = arith.constant 0 : i32
    %c0_i32_0 = arith.constant 0 : i32
    %c0_i32_1 = arith.constant 0 : i32
    %c0_i32_2 = arith.constant 0 : i32
    return %c0_i32, %c0_i32_0, %c0_i32_1 : i32, i32, i32
  }
  func.func @transform_5(%arg0: i32) -> (i32, i32) {
    %c0_i32 = arith.constant 0 : i32
    %c0_i32_0 = arith.constant 0 : i32
    %c0_i32_1 = arith.constant 0 : i32
    return %c0_i32, %c0_i32_0 : i32, i32
  }
  func.func @transform_6(%arg0: i32) -> (i32, i32, i32) {
    %c0_i32 = arith.constant 0 : i32
    %c0_i32_0 = arith.constant 0 : i32
    %c0_i32_1 = arith.constant 0 : i32
    %c0_i32_2 = arith.constant 0 : i32
    return %c0_i32, %c0_i32_0, %c0_i32_1 : i32, i32, i32
  }
  func.func @transform_7(%arg0: i32) -> (i32, i32) {
    %c0_i32 = arith.constant 0 : i32
    %c0_i32_0 = arith.constant 0 : i32
    %c0_i32_1 = arith.constant 0 : i32
    return %c0_i32, %c0_i32_0 : i32, i32
  }
  func.func @transform_8(%arg0: i32) -> (i32, i32, i32) {
    %c0_i32 = arith.constant 0 : i32
    %c0_i32_0 = arith.constant 0 : i32
    %c0_i32_1 = arith.constant 0 : i32
    return %arg0, %c0_i32, %c0_i32_0 : i32, i32, i32
  }
}

</mosaic_0001>

<bundles_post_ra>
// kernel: encoder_forward.1
= control target key start
LH: loop header
LB: loop body
LE: loop exit
PB: predicated region body
PF: predicated region fallthrough
CT: control target
= control target key end

     0   :  { %v8356_v2 = vmov 0   ;;  %s6002_s9 = smov 16   ;;  %s6004_s10 = smov 15   ;;  %v46_v5 = vlaneseq  ;;  %vm149_vm2 = vcmask 1041408   ;;  %vm142_vm3 = vcmask 31744   ;;  %s8347_s0 = inlined_call_operand.vmem [shape: f32[1,4,512], index: 0, kind: input, shape index: {}]   ;;  %s8348_s2 = inlined_call_operand.vmem [shape: bf16[9,24,4], index: 2, kind: input, shape index: {}]   ;;  %s8349_s1 = inlined_call_operand.vmem [shape: f32[9,512], index: 1, kind: input, shape index: {}]   ;;  %s8350_s3 = inlined_call_operand.vmem [shape: f32[24,1], index: 3, kind: input, shape index: {}]   ;;  %s8351_s4 = inlined_call_operand.vmem [shape: bf16[9,24,24], index: 4, kind: input, shape index: {}]   ;;  %s8352_s5 = inlined_call_operand.vmem [shape: f32[24,1], index: 5, kind: input, shape index: {}]   ;;  %s8353_s6 = inlined_call_operand.vmem [shape: bf16[9,32,24], index: 6, kind: input, shape index: {}]   ;;  %s8354_s7 = inlined_call_operand.vmem [shape: f32[32,1], index: 7, kind: input, shape index: {}]   ;;  %s8355_s8 = inlined_call_operand.vmem [shape: f32[1,32,512], index: 8, kind: output, shape index: {}]  }
   0x1   :  { %v6058_v0 = vld [vmem:[%s8347_s0 + $0x8] sm:$0xff]  ;;  %v6063_v1 = vld [vmem:[%s8347_s0] sm:$0xff]  ;;  %194 = vmatprep.mubr.bf16.mxu0 %v8356_v2  ;;  %245 = vmatprep.mubr.bf16.mxu1 %v8356_v2  ;;  %s6003_s0 = smov 17   ;;  %s6005_s11 = smov 1   ;;  %v5948_v62 = vld [vmem:[%s8348_s2 + $0x14] ss:$0 sps:$4 sm:$0xff]  }
   0x2   :  { %90 = vrot.lane.b32.xlu1 %v6058_v0, %s6002_s9  ;;  %86 = vrot.lane.b32.xlu0 %v6063_v1, %s6002_s9  ;;  %v6073_v3 = vcombine.high %v6058_v0, %v6058_v0  ;;  %v6077_v4 = vcombine.high %v6063_v1, %v6063_v1  ;;  %s6006_s12 = smov 127   ;;  %s6007_s13 = smov 113   ;;  %v56_v6 = vshrl.u32 %v46_v5, 7  ;;  %v6141_v7 = vand.u32 127, %v46_v5  ;;  %v5947_v44 = vld [vmem:[%s8348_s2 + $0xc] sm:$0xff]  }
   0x3   :  { %5944 = vset.pattern.permute.xlu1 %v8356_v2  ;;  %5943 = vset.pattern.permute.xlu0 %v8356_v2  ;;  %s6008_s14 = smov 112   ;;  %s6009_s15 = smov 111   ;;  %v5375_v12 = vld [vmem:[%s8349_s1 + $0x1] ss:$8 sm:$0xf]  ;;  %vm1844_vm10 = vcmask 1043456  }
   0x4   :  { %v6143_v8 = vsub.s32 1, %v56_v6  ;;  %v6145_v9 = vsub.s32 3, %v56_v6  ;;  %v6147_v10 = vsub.s32 0, %v56_v6  ;;  %v6149_v11 = vsub.s32 2, %v56_v6 }
   0x5   :  { %vm94_vm0 = vcmp.lt.s32.totalorder %v6141_v7, 16  ;;  %v53_v15 = vld [vmem:[%s8349_s1] ss:$8 sm:$0xf]  ;;  %vm48_vm1 = vcmp.lt.s32.totalorder %v6141_v7, 17  ;;  %vm400_vm4 = vcmp.lt.s32.totalorder %v6141_v7, 15 }
   0x6   :  { %92 = vrot.lane.b32.xlu1 %v6073_v3, %s6002_s9  ;;  %88 = vrot.lane.b32.xlu0 %v6077_v4, %s6002_s9  ;;  %v6159_v16 = vrot.slane %v5375_v12, %v6143_v8  ;;  %v6162_v17 = vrot.slane %v5375_v12, %v6145_v9  ;;  %v6165_v18 = vrot.slane %v5375_v12, %v6147_v10  ;;  %v5395_v45 = vld [vmem:[%s8349_s1 + $0x2] ss:$8 sm:$0xf]  ;;  %vm588_vm5 = vcmp.lt.s32.totalorder %v6141_v7, 1 }
   0x7   :  { %v6168_v19 = vrot.slane %v5375_v12, %v6149_v11  ;;  %v6172_v22 = vrot.slane %v53_v15, %v6143_v8  ;;  %v6189_v38 = vrot.slane %v53_v15, %v6147_v10  ;;  %v6192_v39 = vrot.slane %v53_v15, %v6149_v11 }
   0x8   :  { %8412 = vst [vmem:[#allocation2_spill] sm:$0xff] %v6159_v16  ;;  %v6200_v43 = vrot.slane %v53_v15, %v6145_v9  ;;  %v6215_v52 = vrot.slane %v5395_v45, %v6143_v8  ;;  %v6232_v63 = vrot.slane %v5395_v45, %v6147_v10  ;;  %v6235_v5 = vrot.slane %v5395_v45, %v6149_v11  ;;  %v5407_v15 = vld [vmem:[%s8349_s1 + $0x3] ss:$8 sm:$0xf] }
   0x9   :  { %8413 = vst [vmem:[#allocation3_spill] sm:$0xff] %v6168_v19  ;;  %8414 = vst [vmem:[#allocation4_spill] sm:$0xff] %v6192_v39  ;;  %vm924_vm6 = vcmp.lt.s32.totalorder %v6141_v7, 127  ;;  %vm1112_vm7 = vcmp.lt.s32.totalorder %v6141_v7, 113  ;;  %vm1300_vm8 = vcmp.lt.s32.totalorder %v6141_v7, 112  ;;  %vm1488_vm9 = vcmp.lt.s32.totalorder %v6141_v7, 111 }
   0xa   :  { %40 = vrot.lane.b32.xlu1 %v6077_v4, %s6003_s0  ;;  %38 = vrot.lane.b32.xlu0 %v6063_v1, %s6003_s0  ;;  %vm1837_vm11 = vcmask 195584  }
   0xe   :  { %44 = vrot.lane.b32.xlu1 %v6073_v3, %s6003_s0  ;;  %42 = vrot.lane.b32.xlu0 %v6058_v0, %s6003_s0 }
  0x12   :  { %394 = vrot.lane.b32.xlu1 %v6077_v4, %s6004_s10  ;;  %392 = vrot.lane.b32.xlu0 %v6063_v1, %s6004_s10 }
  0x16   :  { %398 = vrot.lane.b32.xlu1 %v6073_v3, %s6004_s10  ;;  %396 = vrot.lane.b32.xlu0 %v6058_v0, %s6004_s10 }
  0x1a   :  { %582 = vrot.lane.b32.xlu1 %v6077_v4, %s6005_s11  ;;  %580 = vrot.lane.b32.xlu0 %v6063_v1, %s6005_s11 }
  0x1e   :  { %586 = vrot.lane.b32.xlu1 %v6073_v3, %s6005_s11  ;;  %584 = vrot.lane.b32.xlu0 %v6058_v0, %s6005_s11 }
  0x22   :  { %918 = vrot.lane.b32.xlu1 %v6077_v4, %s6006_s12  ;;  %916 = vrot.lane.b32.xlu0 %v6063_v1, %s6006_s12 }
  0x26   :  { %922 = vrot.lane.b32.xlu1 %v6073_v3, %s6006_s12  ;;  %920 = vrot.lane.b32.xlu0 %v6058_v0, %s6006_s12 }
  0x2a   :  { %1106 = vrot.lane.b32.xlu1 %v6077_v4, %s6007_s13  ;;  %1104 = vrot.lane.b32.xlu0 %v6063_v1, %s6007_s13 }
  0x2e   :  { %1110 = vrot.lane.b32.xlu1 %v6073_v3, %s6007_s13  ;;  %1108 = vrot.lane.b32.xlu0 %v6058_v0, %s6007_s13 }
  0x32   :  { %1294 = vrot.lane.b32.xlu1 %v6077_v4, %s6008_s14  ;;  %1292 = vrot.lane.b32.xlu0 %v6063_v1, %s6008_s14 }
  0x36   :  { %1298 = vrot.lane.b32.xlu1 %v6073_v3, %s6008_s14  ;;  %1296 = vrot.lane.b32.xlu0 %v6058_v0, %s6008_s14 }
  0x3a   :  { %1482 = vrot.lane.b32.xlu1 %v6077_v4, %s6009_s15  ;;  %1480 = vrot.lane.b32.xlu0 %v6063_v1, %s6009_s15 }
  0x3e   :  { %1486 = vrot.lane.b32.xlu1 %v6073_v3, %s6009_s15  ;;  %1484 = vrot.lane.b32.xlu0 %v6058_v0, %s6009_s15 }
  0x74   :  { %v91_v13 = vpop.permute.xlu1 %90  ;;  %v87_v14 = vpop.permute.xlu0 %86 }
  0x78   :  { %v93_v20 = vpop.permute.xlu1 %92  ;;  %v89_v21 = vpop.permute.xlu0 %88 }
  0x79   :  { %v98_v23 = vsel %vm94_vm0, %v93_v20, %v87_v14  ;;  %v96_v24 = vsel %vm94_vm0, %v89_v21, %v91_v13  ;;  %v97_v25 = vsel %vm94_vm0, %v87_v14, %v89_v21  ;;  %v95_v26 = vsel %vm94_vm0, %v91_v13, %v93_v20 }
  0x7a   :  { %v123_v27 = vmul.f32 %v6159_v16, %v97_v25  ;;  %v125_v28 = vmul.f32 %v6162_v17, %v95_v26  ;;  %v122_v29 = vmul.f32 %v6165_v18, %v98_v23  ;;  %v124_v30 = vmul.f32 %v6168_v19, %v96_v24 }
  0x7b   :  { %v6242_v14 = vrot.slane %v5395_v45, %v6145_v9  ;;  %v6282_v45 = vrot.slane %v5407_v15, %v6145_v9 }
  0x7c   :  { %v41_v31 = vpop.permute.xlu1 %40  ;;  %v39_v32 = vpop.permute.xlu0 %38  ;;  %v131_v33 = vpack.c.bf16 %v123_v27, %v123_v27  ;;  %v133_v34 = vpack.c.bf16 %v125_v28, %v125_v28  ;;  %v130_v35 = vpack.c.bf16 %v122_v29, %v122_v29  ;;  %v132_v36 = vpack.c.bf16 %v124_v30, %v124_v30 }
  0x7d   :  { %v51_v37 = vsel %vm48_vm1, %v39_v32, %v41_v31  ;;  %v6254_v27 = vrot.slane %v5407_v15, %v6143_v8 }
  0x7e   :  { %v76_v40 = vmul.f32 %v6172_v22, %v51_v37  ;;  %5381 = vmatprep.subr.msk.bf16.mxu0 %vm149_vm2, %v131_v33  ;;  %5384 = vmatprep.subr.msk.bf16.mxu1 %vm149_vm2, %v133_v34  ;;  %v151_v41 = vsel %vm149_vm2, %v130_v35, 0  ;;  %v157_v42 = vsel %vm149_vm2, %v132_v36, 0 }
  0x7f   :  { %163 = vmatpush1.bf16.msra.mxu0 %v151_v41  ;;  %214 = vmatpush1.bf16.msra.mxu1 %v157_v42  ;;  %v1670_v41 = vld [vmem:[%s8350_s3 + $0x10] sm:$0xff]  ;;  %v5949_v42 = vld [vmem:[%s8348_s2] sm:$0xff]  }
  0x80   :  { %v83_v46 = vpack.c.bf16 %v76_v40, %v76_v40  ;;  %v45_v47 = vpop.permute.xlu1 %44  ;;  %v43_v48 = vpop.permute.xlu0 %42 }
  0x81   :  { %v52_v49 = vsel %vm48_vm1, %v45_v47, %v39_v32  ;;  %v49_v50 = vsel %vm48_vm1, %v43_v48, %v45_v47  ;;  %v50_v51 = vsel %vm48_vm1, %v41_v31, %v43_v48  ;;  %v1669_v31 = vld [vmem:[%s8350_s3 + $0x8] sm:$0xff]  ;;  %v1668_v32 = vld [vmem:[%s8350_s3] sm:$0xff] }
  0x82   :  { %v75_v53 = vmul.f32 %v6189_v38, %v52_v49  ;;  %v77_v54 = vmul.f32 %v6192_v39, %v50_v51  ;;  %v78_v55 = vmul.f32 %v6200_v43, %v49_v50  ;;  %5382 = vmatmul.mubr.msk.bf16.vlgmr.msra.gmra.mrb[0].mxu0 %vm142_vm3, %v5947_v44  ;;  %5385 = vmatmul.mubr.msk.bf16.vlgmr.msra.gmra.mrb[0].mxu1 %vm142_vm3, %v5947_v44 }
  0x83   :  { %5389 = vmatprep.subr.msk.bf16.mxu0 %vm149_vm2, %v83_v46  ;;  %204 = vmatprep.mubr.bf16.mxu0 %v8356_v2 }
  0x84   :  { %v82_v56 = vpack.c.bf16 %v75_v53, %v75_v53  ;;  %v84_v57 = vpack.c.bf16 %v77_v54, %v77_v54  ;;  %v85_v58 = vpack.c.bf16 %v78_v55, %v78_v55  ;;  %v395_v59 = vpop.permute.xlu1 %394  ;;  %v393_v60 = vpop.permute.xlu0 %392  ;;  %255 = vmatprep.mubr.bf16.mxu1 %v8356_v2  ;;  %1678 = vperm.xlu1 %5944, %v1669_v31  }
  0x85   :  { %v403_v61 = vsel %vm400_vm4, %v393_v60, %v395_v59  ;;  %1673 = vperm.xlu0 %5943, %v1668_v32   ;;  %v6294_v54 = vrot.slane %v5407_v15, %v6147_v10  ;;  %v6297_v55 = vrot.slane %v5407_v15, %v6149_v11  ;;  %v772_v32 = vpack.c.bf16 %v6063_v1, %v6063_v1 }
  0x86   :  { %5392 = vmatprep.subr.msk.bf16.mxu1 %vm149_vm2, %v85_v58  ;;  %v279_v6 = vsel %vm149_vm2, %v82_v56, 0  ;;  %v285_v12 = vsel %vm149_vm2, %v84_v57, 0  ;;  %v429_v13 = vmul.f32 %v6215_v52, %v403_v61 }
  0x87   :  { %291 = vmatpush1.bf16.msra.mxu0 %v279_v6  ;;  %342 = vmatpush1.bf16.msra.mxu1 %v285_v12  ;;  %v5951_v12 = vld [vmem:[%s8348_s2 + $0x18] sm:$0xff]  }
  0x88   :  { %v437_v20 = vpack.c.bf16 %v429_v13, %v429_v13  ;;  %v399_v21 = vpop.permute.xlu1 %398  ;;  %v397_v23 = vpop.permute.xlu0 %396  ;;  %1683 = vperm.xlu1 %5944, %v1670_v41  }
  0x89   :  { %v404_v24 = vsel %vm400_vm4, %v399_v21, %v393_v60  ;;  %v401_v25 = vsel %vm400_vm4, %v397_v23, %v399_v21  ;;  %v402_v26 = vsel %vm400_vm4, %v395_v59, %v397_v23  ;;  %v5950_v59 = vld [vmem:[%s8348_s2 + $0x8] ss:$0 sps:$4 sm:$0xff]  }
  0x8a   :  { %5383 = vmatmul.mubr.msk.bf16.gmra.mrb[4].mxu0 %vm142_vm3, %v5948_v62  ;;  %5386 = vmatmul.mubr.msk.bf16.gmra.mrb[4].mxu1 %vm142_vm3, %v5948_v62  ;;  %v428_v28 = vmul.f32 %v6232_v63, %v404_v24  ;;  %v430_v29 = vmul.f32 %v6235_v5, %v402_v26  ;;  %v431_v30 = vmul.f32 %v6242_v14, %v401_v25 }
  0x8b   :  { %322 = vmatprep.mubr.bf16.mxu0 %v8356_v2  ;;  %373 = vmatprep.mubr.bf16.mxu1 %v8356_v2  ;;  %v775_v24 = vpack.c.bf16 %v6073_v3, %v6073_v3  ;;  %v5430_v3 = vld [vmem:[%s8349_s1 + $0x5] ss:$8 sm:$0xf] }
  0x8c   :  { %v436_v33 = vpack.c.bf16 %v428_v28, %v428_v28  ;;  %v438_v34 = vpack.c.bf16 %v430_v29, %v430_v29  ;;  %v439_v35 = vpack.c.bf16 %v431_v30, %v431_v30  ;;  %5401 = vmatprep.subr.msk.bf16.mxu0 %vm149_vm2, %v437_v20  ;;  %v583_v36 = vpop.permute.xlu1 %582  ;;  %v581_v37 = vpop.permute.xlu0 %580  ;;  %v773_v20 = vpack.c.bf16 %v6077_v4, %v6077_v4  ;;  %v5952_v4 = vld [vmem:[%s8348_s2 + $0x20] ss:$0 sps:$4 sm:$0xff]  }
  0x8d   :  { %v591_v40 = vsel %vm588_vm5, %v581_v37, %v583_v36  ;;  %v6337_v28 = vrot.slane %v5430_v3, %v6145_v9  ;;  %v6340_v29 = vrot.slane %v5430_v3, %v6143_v8  ;;  %v6369_v1 = vrot.slane %v5430_v3, %v6149_v11 }
  0x8e   :  { %5404 = vmatprep.subr.msk.bf16.mxu1 %vm149_vm2, %v439_v35  ;;  %v617_v44 = vmul.f32 %v6254_v27, %v591_v40  ;;  %v461_v46 = vsel %vm149_vm2, %v438_v34, 0  ;;  %v455_v47 = vsel %vm149_vm2, %v436_v33, 0  ;;  %v774_v33 = vpack.c.bf16 %v6058_v0, %v6058_v0 }
  0x8f   :  { %8415 = vst [vmem:[#allocation5_spill] sm:$0xff] %v6337_v28  ;;  %8416 = vst [vmem:[#allocation6_spill] sm:$0xff] %v6340_v29  ;;  %v6365_v0 = vrot.slane %v5430_v3, %v6147_v10 }
  0x90   :  { %v587_v48 = vpop.permute.xlu1 %586  ;;  %v585_v49 = vpop.permute.xlu0 %584  ;;  %v625_v50 = vpack.c.bf16 %v617_v44, %v617_v44  ;;  %v797_v40 = vsel %vm149_vm2, %v774_v33, 0  ;;  %8418 = vst [vmem:[#allocation8_spill] sm:$0xff] %v6369_v1  ;;  %v5454_v33 = vld [vmem:[%s8349_s1 + $0x7] ss:$8 sm:$0xf] }
  0x91   :  { %v589_v51 = vsel %vm588_vm5, %v585_v49, %v587_v48  ;;  %v592_v57 = vsel %vm588_vm5, %v587_v48, %v581_v37  ;;  %v590_v58 = vsel %vm588_vm5, %v583_v36, %v585_v49  ;;  %v5953_v36 = vld [vmem:[%s8348_s2 + $0x24] sm:$0xff]   ;;  %v791_v37 = vsel %vm149_vm2, %v772_v32, 0  ;;  %8417 = vst [vmem:[#allocation7_spill] sm:$0xff] %v6365_v0  ;;  %v5954_v49 = vld [vmem:[%s8348_s2 + $0x2c] ss:$0 sps:$4 sm:$0xff]  }
  0x92   :  { %5390 = vmatmul.mubr.msk.bf16.vlgmr.msra.gmra.mrb[0].mxu0 %vm142_vm3, %v5949_v42  ;;  %5393 = vmatmul.mubr.msk.bf16.vlgmr.msra.gmra.mrb[0].mxu1 %vm142_vm3, %v5949_v42  ;;  %v619_v53 = vmul.f32 %v6282_v45, %v589_v51  ;;  %v616_v60 = vmul.f32 %v6294_v54, %v592_v57  ;;  %v618_v61 = vmul.f32 %v6297_v55, %v590_v58  ;;  %v5956_v32 = vld [vmem:[%s8348_s2 + $0x38] ss:$0 sps:$4 sm:$0xff]  }
  0x93   :  { %518 = vmatpush1.bf16.msra.mxu1 %v461_v46  ;;  %467 = vmatpush1.bf16.msra.mxu0 %v455_v47 }
  0x94   :  { %332 = vmatprep.mubr.bf16.mxu0 %v8356_v2  ;;  %383 = vmatprep.mubr.bf16.mxu1 %v8356_v2  ;;  %v627_v56 = vpack.c.bf16 %v619_v53, %v619_v53  ;;  %v624_v62 = vpack.c.bf16 %v616_v60, %v616_v60  ;;  %v626_v6 = vpack.c.bf16 %v618_v61, %v618_v61  ;;  %v919_v21 = vpop.permute.xlu1 %918  ;;  %v917_v23 = vpop.permute.xlu0 %916 }
  0x95   :  { %5413 = vmatprep.subr.msk.bf16.mxu0 %vm149_vm2, %v625_v50  ;;  %v927_v47 = vsel %vm924_vm6, %v917_v23, %v919_v21  ;;  %v5442_v50 = vld [vmem:[%s8349_s1 + $0x6] ss:$8 sm:$0xf] }
  0x96   :  { %5416 = vmatprep.subr.msk.bf16.mxu1 %vm149_vm2, %v627_v56  ;;  %v649_v13 = vsel %vm149_vm2, %v626_v6, 0  ;;  %v643_v15 = vsel %vm149_vm2, %v624_v62, 0  ;;  %v952_v56 = vmul.f32 %v6365_v0, %v927_v47  ;;  %v6387_v58 = vrot.slane %v5442_v50, %v6145_v9 }
  0x98   :  { %v923_v25 = vpop.permute.xlu1 %922  ;;  %v921_v26 = vpop.permute.xlu0 %920  ;;  %8419 = vst [vmem:[#allocation9_spill] sm:$0xff] %v6387_v58  ;;  %v960_v62 = vpack.c.bf16 %v952_v56, %v952_v56 }
  0x99   :  { %v928_v30 = vsel %vm924_vm6, %v923_v25, %v917_v23  ;;  %v926_v31 = vsel %vm924_vm6, %v919_v21, %v921_v26  ;;  %v925_v48 = vsel %vm924_vm6, %v921_v26, %v923_v25  ;;  %v6410_v25 = vrot.slane %v5442_v50, %v6147_v10 }
  0x9a   :  { %5391 = vmatmul.mubr.msk.bf16.gmra.mrb[8].mxu0 %vm142_vm3, %v5950_v59  ;;  %5394 = vmatmul.mubr.msk.bf16.gmra.mrb[8].mxu1 %vm142_vm3, %v5950_v59  ;;  %v955_v34 = vmul.f32 %v6337_v28, %v928_v30  ;;  %v953_v35 = vmul.f32 %v6340_v29, %v926_v31  ;;  %v954_v57 = vmul.f32 %v6369_v1, %v925_v48 }
  0x9b   :  { %498 = vmatprep.mubr.bf16.mxu0 %v8356_v2  ;;  %549 = vmatprep.mubr.bf16.mxu1 %v8356_v2  ;;  %v6390_v59 = vrot.slane %v5442_v50, %v6143_v8  ;;  %8421 = vst [vmem:[#allocation11_spill] sm:$0xff] %v6410_v25  ;;  %v6415_v26 = vrot.slane %v5442_v50, %v6149_v11  ;;  %v5957_v50 = vld [vmem:[%s8348_s2 + $0x3c] sm:$0xff]  }
  0x9c   :  { %v963_v41 = vpack.c.bf16 %v955_v34, %v955_v34  ;;  %v961_v42 = vpack.c.bf16 %v953_v35, %v953_v35  ;;  %v1107_v44 = vpop.permute.xlu1 %1106  ;;  %v1105_v46 = vpop.permute.xlu0 %1104  ;;  %v962_v6 = vpack.c.bf16 %v954_v57, %v954_v57 }
  0x9d   :  { %8420 = vst [vmem:[#allocation10_spill] sm:$0xff] %v6390_v59  ;;  %8422 = vst [vmem:[#allocation12_spill] sm:$0xff] %v6415_v26  ;;  %v1115_v30 = vsel %vm1112_vm7, %v1105_v46, %v1107_v44 }
  0x9e   :  { %v985_v21 = vsel %vm149_vm2, %v962_v6, 0  ;;  %v6461_v6 = vrot.slane %v5454_v33, %v6149_v11 }
  0xa0   :  { %v1111_v51 = vpop.permute.xlu1 %1110  ;;  %v1109_v53 = vpop.permute.xlu0 %1108  ;;  %8426 = vst [vmem:[#allocation16_spill] sm:$0xff] %v6461_v6 }
  0xa1   :  { %v1116_v60 = vsel %vm1112_vm7, %v1111_v51, %v1105_v46  ;;  %v1114_v61 = vsel %vm1112_vm7, %v1107_v44, %v1109_v53  ;;  %v1113_v31 = vsel %vm1112_vm7, %v1109_v53, %v1111_v51 }
  0xa2   :  { %5402 = vmatmul.mubr.msk.bf16.vlgmr.msra.gmra.mrb[0].mxu0 %vm142_vm3, %v5951_v12  ;;  %5405 = vmatmul.mubr.msk.bf16.vlgmr.msra.gmra.mrb[0].mxu1 %vm142_vm3, %v5951_v12  ;;  %v1143_v12 = vmul.f32 %v6387_v58, %v1116_v60 }
  0xa3   :  { %706 = vmatpush1.bf16.msra.mxu1 %v649_v13  ;;  %655 = vmatpush1.bf16.msra.mxu0 %v643_v15  ;;  %v1141_v13 = vmul.f32 %v6390_v59, %v1114_v61  ;;  %v5955_v15 = vld [vmem:[%s8348_s2 + $0x30] sm:$0xff]  }
  0xa4   :  { %508 = vmatprep.mubr.bf16.mxu0 %v8356_v2  ;;  %559 = vmatprep.mubr.bf16.mxu1 %v8356_v2  ;;  %v1151_v23 = vpack.c.bf16 %v1143_v12, %v1143_v12  ;;  %v1293_v3 = vpop.permute.xlu0 %1292 }
  0xa5   :  { %5424 = vmatprep.subr.msk.bf16.mxu0 %vm149_vm2, %v773_v20  ;;  %5427 = vmatprep.subr.msk.bf16.mxu1 %vm149_vm2, %v775_v24  ;;  %v979_v20 = vsel %vm149_vm2, %v960_v62, 0  ;;  %v1149_v24 = vpack.c.bf16 %v1141_v13, %v1141_v13  ;;  %v6456_v62 = vrot.slane %v5454_v33, %v6147_v10 }
  0xa7   :  { %8425 = vst [vmem:[#allocation15_spill] sm:$0xff] %v6456_v62 }
  0xa8   :  { %v1297_v35 = vpop.permute.xlu0 %1296 }
  0xaa   :  { %5403 = vmatmul.mubr.msk.bf16.gmra.mrb[12].mxu0 %vm142_vm3, %v5952_v4  ;;  %5406 = vmatmul.mubr.msk.bf16.gmra.mrb[12].mxu1 %vm142_vm3, %v5952_v4  ;;  %v1295_v4 = vpop.permute.xlu1 %1294 }
  0xab   :  { %686 = vmatprep.mubr.bf16.mxu0 %v8356_v2  ;;  %737 = vmatprep.mubr.bf16.mxu1 %v8356_v2  ;;  %v1302_v44 = vsel %vm1300_vm8, %v1295_v4, %v1297_v35  ;;  %v1303_v12 = vsel %vm1300_vm8, %v1293_v3, %v1295_v4 }
  0xac   :  { %v1481_v61 = vpop.permute.xlu0 %1480 }
  0xae   :  { %v1299_v34 = vpop.permute.xlu1 %1298 }
  0xaf   :  { %v1301_v13 = vsel %vm1300_vm8, %v1297_v35, %v1299_v34  ;;  %v5959_v35 = vld [vmem:[%s8348_s2 + $0x48] sm:$0xff]  }
  0xb0   :  { %v1330_v4 = vmul.f32 %v6461_v6, %v1301_v13  ;;  %v5964_v13 = vld [vmem:[%s8348_s2 + $0x68] ss:$0 sps:$4 sm:$0xff]  }
  0xb2   :  { %5414 = vmatmul.mubr.msk.bf16.vlgmr.msra.gmra.mrb[0].mxu0 %vm142_vm3, %v5953_v36  ;;  %5417 = vmatmul.mubr.msk.bf16.vlgmr.msra.gmra.mrb[0].mxu1 %vm142_vm3, %v5953_v36  ;;  %v1140_v36 = vmul.f32 %v6410_v25, %v1115_v30  ;;  %v1483_v60 = vpop.permute.xlu1 %1482 }
  0xb3   :  { %803 = vmatpush1.bf16.msra.mxu0 %v791_v37  ;;  %696 = vmatprep.mubr.bf16.mxu0 %v8356_v2  ;;  %v1142_v37 = vmul.f32 %v6415_v26, %v1113_v31 }
  0xb4   :  { %747 = vmatprep.mubr.bf16.mxu1 %v8356_v2  ;;  %854 = vmatpush1.bf16.msra.mxu1 %v797_v40  ;;  %v6433_v40 = vrot.slane %v5454_v33, %v6145_v9  ;;  %v1148_v46 = vpack.c.bf16 %v1140_v36, %v1140_v36 }
  0xb5   :  { %5436 = vmatprep.subr.msk.bf16.mxu0 %vm149_vm2, %v961_v42  ;;  %5439 = vmatprep.subr.msk.bf16.mxu1 %vm149_vm2, %v963_v41  ;;  %v6436_v41 = vrot.slane %v5454_v33, %v6143_v8  ;;  %v1304_v42 = vsel %vm1300_vm8, %v1299_v34, %v1293_v3  ;;  %v1150_v47 = vpack.c.bf16 %v1142_v37, %v1142_v37 }
  0xb6   :  { %8423 = vst [vmem:[#allocation13_spill] sm:$0xff] %v6433_v40  ;;  %v1331_v48 = vmul.f32 %v6433_v40, %v1304_v42  ;;  %v1167_v51 = vsel %vm149_vm2, %v1148_v46, 0 }
  0xb7   :  { %8424 = vst [vmem:[#allocation14_spill] sm:$0xff] %v6436_v41  ;;  %v1173_v53 = vsel %vm149_vm2, %v1150_v47, 0 }
  0xb8   :  { %v1339_v56 = vpack.c.bf16 %v1331_v48, %v1331_v48  ;;  %v1491_v48 = vsel %vm1488_vm9, %v1481_v61, %v1483_v60 }
  0xba   :  { %5415 = vmatmul.mubr.msk.bf16.gmra.mrb[16].mxu0 %vm142_vm3, %v5954_v49  ;;  %5418 = vmatmul.mubr.msk.bf16.gmra.mrb[16].mxu1 %vm142_vm3, %v5954_v49  ;;  %v1329_v49 = vmul.f32 %v6436_v41, %v1302_v44 }
  0xbb   :  { %834 = vmatprep.mubr.bf16.mxu0 %v8356_v2  ;;  %885 = vmatprep.mubr.bf16.mxu1 %v8356_v2 }
  0xbc   :  { %v1337_v57 = vpack.c.bf16 %v1329_v49, %v1329_v49 }
  0xc2   :  { %5425 = vmatmul.mubr.msk.bf16.vlgmr.msra.gmra.mrb[0].mxu0 %vm142_vm3, %v5955_v15  ;;  %5428 = vmatmul.mubr.msk.bf16.vlgmr.msra.gmra.mrb[0].mxu1 %vm142_vm3, %v5955_v15  ;;  %v5958_v15 = vld [vmem:[%s8348_s2 + $0x44] ss:$0 sps:$4 sm:$0xff]  }
  0xc3   :  { %991 = vmatpush1.bf16.msra.mxu0 %v979_v20  ;;  %1042 = vmatpush1.bf16.msra.mxu1 %v985_v21  ;;  %v5466_v20 = vld [vmem:[%s8349_s1 + $0x20] ss:$8 sm:$0xf]  ;;  %v1487_v21 = vpop.permute.xlu1 %1486 }
  0xc4   :  { %844 = vmatprep.mubr.bf16.mxu0 %v8356_v2  ;;  %895 = vmatprep.mubr.bf16.mxu1 %v8356_v2  ;;  %v6479_v3 = vrot.slane %v5466_v20, %v6145_v9  ;;  %v6482_v30 = vrot.slane %v5466_v20, %v6143_v8  ;;  %v1492_v31 = vsel %vm1488_vm9, %v1487_v21, %v1481_v61  ;;  %v5962_v61 = vld [vmem:[%s8348_s2 + $0x5c] ss:$0 sps:$4 sm:$0xff]  }
  0xc5   :  { %5448 = vmatprep.subr.msk.bf16.mxu0 %vm149_vm2, %v1149_v24  ;;  %5451 = vmatprep.subr.msk.bf16.mxu1 %vm149_vm2, %v1151_v23  ;;  %v1485_v23 = vpop.permute.xlu0 %1484  ;;  %v1328_v24 = vmul.f32 %v6456_v62, %v1303_v12  ;;  %v1338_v9 = vpack.c.bf16 %v1330_v4, %v1330_v4  ;;  %v6502_v46 = vrot.slane %v5466_v20, %v6147_v10  ;;  %v5960_v10 = vld [vmem:[%s8348_s2 + $0x50] ss:$0 sps:$4 sm:$0xff]   ;;  %v5963_v12 = vld [vmem:[%s8348_s2 + $0x60] sm:$0xff]  }
  0xc6   :  { %8427 = vst [vmem:[#allocation17_spill] sm:$0xff] %v6479_v3  ;;  %8428 = vst [vmem:[#allocation18_spill] sm:$0xff] %v6482_v30  ;;  %v1519_v34 = vmul.f32 %v6479_v3, %v1492_v31  ;;  %v6507_v47 = vrot.slane %v5466_v20, %v6149_v11  ;;  %v1489_v49 = vsel %vm1488_vm9, %v1485_v23, %v1487_v21 }
  0xc7   :  { %v1336_v33 = vpack.c.bf16 %v1328_v24, %v1328_v24  ;;  %v1361_v37 = vsel %vm149_vm2, %v1338_v9, 0  ;;  %8429 = vst [vmem:[#allocation19_spill] sm:$0xff] %v6502_v46 }
  0xc8   :  { %v1527_v42 = vpack.c.bf16 %v1519_v34, %v1519_v34  ;;  %8430 = vst [vmem:[#allocation20_spill] sm:$0xff] %v6507_v47 }
  0xc9   :  { %v1355_v36 = vsel %vm149_vm2, %v1336_v33, 0 }
  0xca   :  { %5426 = vmatmul.mubr.msk.bf16.gmra.mrb[20].mxu0 %vm142_vm3, %v5956_v32  ;;  %5429 = vmatmul.mubr.msk.bf16.gmra.mrb[20].mxu1 %vm142_vm3, %v5956_v32  ;;  %v1490_v32 = vsel %vm1488_vm9, %v1483_v60, %v1485_v23 }
  0xcb   :  { %1022 = vmatprep.mubr.bf16.mxu0 %v8356_v2  ;;  %1073 = vmatprep.mubr.bf16.mxu1 %v8356_v2  ;;  %v1517_v8 = vmul.f32 %v6482_v30, %v1490_v32 }
  0xcd   :  { %v1525_v44 = vpack.c.bf16 %v1517_v8, %v1517_v8 }
  0xd2   :  { %5437 = vmatmul.mubr.msk.bf16.vlgmr.msra.gmra.mrb[0].mxu0 %vm142_vm3, %v5957_v50  ;;  %5440 = vmatmul.mubr.msk.bf16.vlgmr.msra.gmra.mrb[0].mxu1 %vm142_vm3, %v5957_v50  ;;  %v1516_v50 = vmul.f32 %v6502_v46, %v1491_v48 }
  0xd3   :  { %1179 = vmatpush1.bf16.msra.mxu0 %v1167_v51  ;;  %1230 = vmatpush1.bf16.msra.mxu1 %v1173_v53  ;;  %v1518_v51 = vmul.f32 %v6507_v47, %v1489_v49 }
  0xd4   :  { %1032 = vmatprep.mubr.bf16.mxu0 %v8356_v2  ;;  %1083 = vmatprep.mubr.bf16.mxu1 %v8356_v2  ;;  %v1524_v11 = vpack.c.bf16 %v1516_v50, %v1516_v50 }
  0xd5   :  { %5460 = vmatprep.subr.msk.bf16.mxu0 %vm149_vm2, %v1337_v57  ;;  %5463 = vmatprep.subr.msk.bf16.mxu1 %vm149_vm2, %v1339_v56  ;;  %v1526_v53 = vpack.c.bf16 %v1518_v51, %v1518_v51  ;;  %v5961_v56 = vld [vmem:[%s8348_s2 + $0x54] sm:$0xff]  }
  0xd6   :  { %v1543_v57 = vsel %vm149_vm2, %v1524_v11, 0 }
  0xd7   :  { %v1549_v60 = vsel %vm149_vm2, %v1526_v53, 0 }
  0xda   :  { %5438 = vmatmul.mubr.msk.bf16.gmra.mrb[24].mxu0 %vm142_vm3, %v5958_v15  ;;  %5441 = vmatmul.mubr.msk.bf16.gmra.mrb[24].mxu1 %vm142_vm3, %v5958_v15 }
  0xdb   :  { %1210 = vmatprep.mubr.bf16.mxu0 %v8356_v2  ;;  %1261 = vmatprep.mubr.bf16.mxu1 %v8356_v2 }
  0xe2   :  { %5449 = vmatmul.mubr.msk.bf16.vlgmr.msra.gmra.mrb[0].mxu0 %vm142_vm3, %v5959_v35  ;;  %5452 = vmatmul.mubr.msk.bf16.vlgmr.msra.gmra.mrb[0].mxu1 %vm142_vm3, %v5959_v35 }
  0xe3   :  { %1367 = vmatpush1.bf16.msra.mxu0 %v1355_v36  ;;  %1418 = vmatpush1.bf16.msra.mxu1 %v1361_v37 }
  0xe4   :  { %1220 = vmatprep.mubr.bf16.mxu0 %v8356_v2  ;;  %1271 = vmatprep.mubr.bf16.mxu1 %v8356_v2 }
  0xe5   :  { %5472 = vmatprep.subr.msk.bf16.mxu0 %vm149_vm2, %v1525_v44  ;;  %5475 = vmatprep.subr.msk.bf16.mxu1 %vm149_vm2, %v1527_v42 }
  0xea   :  { %5450 = vmatmul.mubr.msk.bf16.gmra.mrb[28].mxu0 %vm142_vm3, %v5960_v10  ;;  %5453 = vmatmul.mubr.msk.bf16.gmra.mrb[28].mxu1 %vm142_vm3, %v5960_v10 }
  0xeb   :  { %1398 = vmatprep.mubr.bf16.mxu0 %v8356_v2  ;;  %1449 = vmatprep.mubr.bf16.mxu1 %v8356_v2 }
  0xf2   :  { %5461 = vmatmul.mubr.msk.bf16.vlgmr.msra.gmra.mrb[0].mxu0 %vm142_vm3, %v5961_v56  ;;  %5464 = vmatmul.mubr.msk.bf16.vlgmr.msra.gmra.mrb[0].mxu1 %vm142_vm3, %v5961_v56 }
  0xf3   :  { %1555 = vmatpush1.bf16.msra.mxu0 %v1543_v57  ;;  %1606 = vmatpush1.bf16.msra.mxu1 %v1549_v60 }
  0xf4   :  { %1408 = vmatprep.mubr.bf16.mxu0 %v8356_v2  ;;  %1459 = vmatprep.mubr.bf16.mxu1 %v8356_v2 }
  0xfa   :  { %5462 = vmatmul.mubr.msk.bf16.gmra.mrb[32].mxu0 %vm142_vm3, %v5962_v61  ;;  %5465 = vmatmul.mubr.msk.bf16.gmra.mrb[32].mxu1 %vm142_vm3, %v5962_v61 }
  0xfb   :  { %1586 = vmatprep.mubr.bf16.mxu0 %v8356_v2  ;;  %1637 = vmatprep.mubr.bf16.mxu1 %v8356_v2 }
 0x102   :  { %5473 = vmatmul.mubr.msk.bf16.vlgmr.msra.gmra.mrb[0].mxu0 %vm142_vm3, %v5963_v12  ;;  %5476 = vmatmul.mubr.msk.bf16.vlgmr.msra.gmra.mrb[0].mxu1 %vm142_vm3, %v5963_v12 }
 0x103   :  { %1596 = vmatprep.mubr.bf16.mxu0 %v8356_v2  ;;  %1647 = vmatprep.mubr.bf16.mxu1 %v8356_v2 }
 0x10a   :  { %5474 = vmatmul.mubr.msk.bf16.gmra.mrb[36].mxu0 %vm142_vm3, %v5964_v13  ;;  %5477 = vmatmul.mubr.msk.bf16.gmra.mrb[36].mxu1 %vm142_vm3, %v5964_v13 }
 0x10b   :  { %1889 = vmatprep.mubr.bf16.mxu0 %v8356_v2  ;;  %1940 = vmatprep.mubr.bf16.mxu1 %v8356_v2 }
 0x15d   :  { %v206_v15 = vpop.f32.mrb[4].mxu0  ;;  %v257_v20 = vpop.f32.mrb[4].mxu1 }
 0x15e   :  { %v208_v21 = vpop.f32.mrb[5].mxu0  ;;  %v259_v23 = vpop.f32.mrb[5].mxu1 }
 0x15f   :  { %v210_v24 = vpop.f32.mrb[6].mxu0  ;;  %v261_v4 = vpop.f32.mrb[6].mxu1 }
 0x160   :  { %v211_v31 = vpop.f32.mrb[7].mxu0  ;;  %v262_v32 = vpop.f32.mrb[7].mxu1 }
 0x16d   :  { %v334_v33 = vpop.f32.mrb[8].mxu0  ;;  %v385_v9 = vpop.f32.mrb[8].mxu1 }
 0x16e   :  { %v335_v34 = vadd.f32 %v334_v33, %v206_v15  ;;  %v386_v8 = vadd.f32 %v385_v9, %v257_v20  ;;  %v336_v35 = vpop.f32.mrb[9].mxu0  ;;  %v387_v36 = vpop.f32.mrb[9].mxu1 }
 0x16f   :  { %v337_v37 = vadd.f32 %v336_v35, %v208_v21  ;;  %v388_v42 = vadd.f32 %v387_v36, %v259_v23  ;;  %v338_v44 = vpop.f32.mrb[10].mxu0  ;;  %v389_v48 = vpop.f32.mrb[10].mxu1 }
 0x170   :  { %v339_v49 = vpop.f32.mrb[11].mxu0  ;;  %v390_v10 = vpop.f32.mrb[11].mxu1 }
 0x17d   :  { %v510_v50 = vpop.f32.mrb[12].mxu0  ;;  %v561_v51 = vpop.f32.mrb[12].mxu1 }
 0x17e   :  { %v576_v11 = vadd.f32 %v510_v50, %v335_v34  ;;  %v578_v53 = vadd.f32 %v561_v51, %v386_v8  ;;  %v512_v56 = vpop.f32.mrb[13].mxu0  ;;  %v563_v57 = vpop.f32.mrb[13].mxu1 }
 0x17f   :  { %v577_v60 = vadd.f32 %v512_v56, %v337_v37  ;;  %v579_v61 = vadd.f32 %v563_v57, %v388_v42  ;;  %v514_v12 = vpop.f32.mrb[14].mxu0  ;;  %v565_v13 = vpop.f32.mrb[14].mxu1 }
 0x180   :  { %v515_v15 = vpop.f32.mrb[15].mxu0  ;;  %v566_v20 = vpop.f32.mrb[15].mxu1 }
 0x18d   :  { %v698_v24 = vpop.f32.mrb[16].mxu0  ;;  %v749_v4 = vpop.f32.mrb[16].mxu1 }
 0x18e   :  { %v764_v21 = vadd.f32 %v698_v24, %v576_v11  ;;  %v766_v23 = vadd.f32 %v749_v4, %v578_v53  ;;  %v700_v31 = vpop.f32.mrb[17].mxu0  ;;  %v751_v32 = vpop.f32.mrb[17].mxu1 }
 0x18f   :  { %v765_v33 = vadd.f32 %v700_v31, %v577_v60  ;;  %v767_v9 = vadd.f32 %v751_v32, %v579_v61  ;;  %v702_v35 = vpop.f32.mrb[18].mxu0  ;;  %v753_v36 = vpop.f32.mrb[18].mxu1 }
 0x190   :  { %v703_v34 = vpop.f32.mrb[19].mxu0  ;;  %v754_v8 = vpop.f32.mrb[19].mxu1 }
 0x19d   :  { %v846_v44 = vpop.f32.mrb[20].mxu0  ;;  %v897_v48 = vpop.f32.mrb[20].mxu1 }
 0x19e   :  { %v912_v37 = vadd.f32 %v846_v44, %v764_v21  ;;  %v914_v42 = vadd.f32 %v897_v48, %v766_v23  ;;  %v848_v49 = vpop.f32.mrb[21].mxu0  ;;  %v899_v10 = vpop.f32.mrb[21].mxu1 }
 0x19f   :  { %v913_v50 = vadd.f32 %v848_v49, %v765_v33  ;;  %v915_v51 = vadd.f32 %v899_v10, %v767_v9  ;;  %v850_v56 = vpop.f32.mrb[22].mxu0  ;;  %v901_v57 = vpop.f32.mrb[22].mxu1 }
 0x1a0   :  { %v851_v11 = vpop.f32.mrb[23].mxu0  ;;  %v902_v53 = vpop.f32.mrb[23].mxu1 }
 0x1ad   :  { %v1034_v12 = vpop.f32.mrb[24].mxu0  ;;  %v1085_v13 = vpop.f32.mrb[24].mxu1 }
 0x1ae   :  { %v1100_v60 = vadd.f32 %v1034_v12, %v912_v37  ;;  %v1102_v61 = vadd.f32 %v1085_v13, %v914_v42  ;;  %v1036_v15 = vpop.f32.mrb[25].mxu0  ;;  %v1087_v20 = vpop.f32.mrb[25].mxu1 }
 0x1af   :  { %v1101_v24 = vadd.f32 %v1036_v15, %v913_v50  ;;  %v1103_v4 = vadd.f32 %v1087_v20, %v915_v51  ;;  %v1038_v31 = vpop.f32.mrb[26].mxu0  ;;  %v1089_v32 = vpop.f32.mrb[26].mxu1 }
 0x1b0   :  { %v1039_v21 = vpop.f32.mrb[27].mxu0  ;;  %v1090_v23 = vpop.f32.mrb[27].mxu1 }
 0x1b1   :  { %v1674_v31 = vpop.permute.xlu0 %1673  ;;  %v1679_v32 = vpop.permute.xlu1 %1678 }
 0x1bd   :  { %v1222_v35 = vpop.f32.mrb[28].mxu0  ;;  %v1273_v36 = vpop.f32.mrb[28].mxu1 }
 0x1be   :  { %v1288_v33 = vadd.f32 %v1222_v35, %v1100_v60  ;;  %v1290_v9 = vadd.f32 %v1273_v36, %v1102_v61  ;;  %v1224_v34 = vpop.f32.mrb[29].mxu0  ;;  %v1275_v8 = vpop.f32.mrb[29].mxu1 }
 0x1bf   :  { %v1289_v44 = vadd.f32 %v1224_v34, %v1101_v24  ;;  %v1291_v48 = vadd.f32 %v1275_v8, %v1103_v4  ;;  %v1226_v49 = vpop.f32.mrb[30].mxu0  ;;  %v1277_v10 = vpop.f32.mrb[30].mxu1 }
 0x1c0   :  { %v1227_v37 = vpop.f32.mrb[31].mxu0  ;;  %v1278_v42 = vpop.f32.mrb[31].mxu1 }
 0x1cd   :  { %v1410_v56 = vpop.f32.mrb[32].mxu0  ;;  %v1461_v57 = vpop.f32.mrb[32].mxu1 }
 0x1ce   :  { %v1476_v50 = vadd.f32 %v1410_v56, %v1288_v33  ;;  %v1478_v51 = vadd.f32 %v1461_v57, %v1290_v9  ;;  %v1412_v11 = vpop.f32.mrb[33].mxu0  ;;  %v1463_v53 = vpop.f32.mrb[33].mxu1 }
 0x1cf   :  { %v1477_v12 = vadd.f32 %v1412_v11, %v1289_v44  ;;  %v1479_v13 = vadd.f32 %v1463_v53, %v1291_v48  ;;  %v1414_v15 = vpop.f32.mrb[34].mxu0  ;;  %v1465_v20 = vpop.f32.mrb[34].mxu1 }
 0x1d0   :  { %v1415_v60 = vpop.f32.mrb[35].mxu0  ;;  %v1466_v61 = vpop.f32.mrb[35].mxu1 }
 0x1d5   :  { %v1639_v24 = vpop.f32.mrb[0].mxu1  ;;  %v1588_v4 = vpop.f32.mrb[0].mxu0 }
 0x1d6   :  { %v1686_v21 = vadd.f32 %v1674_v31, %v1588_v4  ;;  %v1590_v23 = vpop.f32.mrb[1].mxu0  ;;  %v1641_v35 = vpop.f32.mrb[1].mxu1  ;;  %v1688_v8 = vadd.f32 %v1674_v31, %v1639_v24 }
 0x1d7   :  { %v1592_v36 = vpop.f32.mrb[2].mxu0  ;;  %v1643_v34 = vpop.f32.mrb[2].mxu1 }
 0x1d8   :  { %v6554_v33 = vmax.f32 %v1686_v21, 0.0  ;;  %v1690_v9 = vadd.f32 %v1679_v32, %v1592_v36  ;;  %v1594_v49 = vpop.f32.mrb[3].mxu0  ;;  %v1645_v44 = vpop.f32.mrb[3].mxu1  ;;  %v1692_v10 = vadd.f32 %v1679_v32, %v1643_v34  ;;  %v6560_v37 = vmax.f32 %v1688_v8, 0.0 }
 0x1d9   :  { %v1693_v8 = vadd.f32 %v1679_v32, %v1645_v44 }
 0x1da   :  { %v6556_v48 = vmax.f32 %v1690_v9, 0.0  ;;  %1769 = vrot.lane.b32.xlu0 %v6554_v33, %s6002_s9  ;;  %v6564_v57 = vmax.f32 %v1692_v10, 0.0 }
 0x1db   :  { %v6600_v9 = vmax.f32 %v1693_v8, 0.0 }
 0x1dc   :  { %1771 = vrot.lane.b32.xlu1 %v6556_v48, %s6002_s9 }
 0x1dd   :  { %v1598_v42 = vpop.f32.mrb[36].mxu0  ;;  %v1649_v56 = vpop.f32.mrb[36].mxu1 }
 0x1de   :  { %v1664_v11 = vadd.f32 %v1598_v42, %v1476_v50  ;;  %v1666_v53 = vadd.f32 %v1649_v56, %v1478_v51  ;;  %v1651_v15 = vpop.f32.mrb[37].mxu1  ;;  %1781 = vrot.lane.b32.xlu0 %v6560_v37, %s6002_s9  ;;  %v1600_v20 = vpop.f32.mrb[37].mxu0  ;;  %v1687_v50 = vadd.f32 %v1674_v31, %v1590_v23  ;;  %v1691_v51 = vadd.f32 %v1679_v32, %v1594_v49 }
 0x1df   :  { %v1667_v60 = vadd.f32 %v1651_v15, %v1479_v13  ;;  %v1665_v61 = vadd.f32 %v1600_v20, %v1477_v12  ;;  %v1602_v24 = vpop.f32.mrb[38].mxu0  ;;  %v1653_v4 = vpop.f32.mrb[38].mxu1  ;;  %v1689_v13 = vadd.f32 %v1674_v31, %v1641_v35 }
 0x1e0   :  { %1783 = vrot.lane.b32.xlu1 %v6564_v57, %s6002_s9  ;;  %v1603_v21 = vpop.f32.mrb[39].mxu0  ;;  %v1654_v36 = vpop.f32.mrb[39].mxu1  ;;  %v6588_v12 = vmax.f32 %v1687_v50, 0.0  ;;  %v6592_v34 = vmax.f32 %v1691_v51, 0.0 }
 0x1e1   :  { %v6596_v23 = vmax.f32 %v1689_v13, 0.0  ;;  %v1684_v31 = vpop.permute.xlu1 %1683 }
 0x1e2   :  { %1710 = vrot.lane.b32.xlu0 %v6554_v33, %s6003_s0  ;;  %v1694_v32 = vadd.f32 %v1684_v31, %v1664_v11  ;;  %v1695_v35 = vadd.f32 %v1684_v31, %v1665_v61  ;;  %v1696_v44 = vadd.f32 %v1684_v31, %v1666_v53  ;;  %v1697_v10 = vadd.f32 %v1684_v31, %v1667_v60 }
 0x1e4   :  { %1712 = vrot.lane.b32.xlu1 %v6556_v48, %s6003_s0  ;;  %v6624_v49 = vmax.f32 %v1694_v32, 0.0  ;;  %v6628_v42 = vmax.f32 %v1695_v35, 0.0  ;;  %v6632_v56 = vmax.f32 %v1696_v44, 0.0  ;;  %v6634_v11 = vmax.f32 %v1697_v10, 0.0 }
 0x1e6   :  { %1722 = vrot.lane.b32.xlu0 %v6560_v37, %s6003_s0 }
 0x1e8   :  { %1724 = vrot.lane.b32.xlu1 %v6564_v57, %s6003_s0 }
 0x1ea   :  { %2087 = vrot.lane.b32.xlu0 %v6554_v33, %s6004_s10 }
 0x1ec   :  { %2089 = vrot.lane.b32.xlu1 %v6556_v48, %s6004_s10 }
 0x1ee   :  { %2099 = vrot.lane.b32.xlu0 %v6560_v37, %s6004_s10 }
 0x1f0   :  { %2101 = vrot.lane.b32.xlu1 %v6564_v57, %s6004_s10 }
 0x1f2   :  { %2287 = vrot.lane.b32.xlu0 %v6554_v33, %s6005_s11 }
 0x1f4   :  { %2289 = vrot.lane.b32.xlu1 %v6556_v48, %s6005_s11 }
 0x1f6   :  { %1775 = vrot.lane.b32.xlu0 %v6588_v12, %s6002_s9 }
 0x1f8   :  { %1777 = vrot.lane.b32.xlu1 %v6592_v34, %s6002_s9 }
 0x1fa   :  { %1787 = vrot.lane.b32.xlu0 %v6596_v23, %s6002_s9 }
 0x1fc   :  { %1789 = vrot.lane.b32.xlu1 %v6600_v9, %s6002_s9 }
 0x1fe   :  { %1716 = vrot.lane.b32.xlu0 %v6588_v12, %s6003_s0 }
 0x200   :  { %1718 = vrot.lane.b32.xlu1 %v6592_v34, %s6003_s0 }
 0x202   :  { %1728 = vrot.lane.b32.xlu0 %v6596_v23, %s6003_s0 }
 0x204   :  { %1730 = vrot.lane.b32.xlu1 %v6600_v9, %s6003_s0 }
 0x206   :  { %2093 = vrot.lane.b32.xlu0 %v6588_v12, %s6004_s10 }
 0x208   :  { %2095 = vrot.lane.b32.xlu1 %v6592_v34, %s6004_s10 }
 0x20a   :  { %2105 = vrot.lane.b32.xlu0 %v6596_v23, %s6004_s10 }
 0x20c   :  { %2107 = vrot.lane.b32.xlu1 %v6600_v9, %s6004_s10 }
 0x20e   :  { %2293 = vrot.lane.b32.xlu0 %v6588_v12, %s6005_s11 }
 0x210   :  { %2295 = vrot.lane.b32.xlu1 %v6592_v34, %s6005_s11 }
 0x212   :  { %1773 = vrot.lane.b32.xlu0 %v6624_v49, %s6002_s9 }
 0x214   :  { %1779 = vrot.lane.b32.xlu1 %v6628_v42, %s6002_s9 }
 0x216   :  { %1785 = vrot.lane.b32.xlu0 %v6632_v56, %s6002_s9 }
 0x218   :  { %1791 = vrot.lane.b32.xlu1 %v6634_v11, %s6002_s9 }
 0x21a   :  { %2299 = vrot.lane.b32.xlu0 %v6560_v37, %s6005_s11 }
 0x21c   :  { %2301 = vrot.lane.b32.xlu1 %v6564_v57, %s6005_s11 }
 0x21e   :  { %1714 = vrot.lane.b32.xlu0 %v6624_v49, %s6003_s0 }
 0x220   :  { %2307 = vrot.lane.b32.xlu1 %v6600_v9, %s6005_s11 }
 0x222   :  { %1726 = vrot.lane.b32.xlu0 %v6632_v56, %s6003_s0 }
 0x224   :  { %1720 = vrot.lane.b32.xlu1 %v6628_v42, %s6003_s0 }
 0x226   :  { %2091 = vrot.lane.b32.xlu0 %v6624_v49, %s6004_s10 }
 0x228   :  { %1732 = vrot.lane.b32.xlu1 %v6634_v11, %s6003_s0 }
 0x22a   :  { %2103 = vrot.lane.b32.xlu0 %v6632_v56, %s6004_s10 }
 0x22c   :  { %2641 = vrot.lane.b32.xlu1 %v6556_v48, %s6006_s12 }
 0x22e   :  { %2305 = vrot.lane.b32.xlu0 %v6596_v23, %s6005_s11 }
 0x230   :  { %2647 = vrot.lane.b32.xlu1 %v6592_v34, %s6006_s12 }
 0x232   :  { %2291 = vrot.lane.b32.xlu0 %v6624_v49, %s6005_s11 }
 0x234   :  { %2097 = vrot.lane.b32.xlu1 %v6628_v42, %s6004_s10 }
 0x236   :  { %2303 = vrot.lane.b32.xlu0 %v6632_v56, %s6005_s11 }
 0x238   :  { %2109 = vrot.lane.b32.xlu1 %v6634_v11, %s6004_s10 }
 0x23a   :  { %2639 = vrot.lane.b32.xlu0 %v6554_v33, %s6006_s12 }
 0x23c   :  { %2653 = vrot.lane.b32.xlu1 %v6564_v57, %s6006_s12 }
 0x23e   :  { %2645 = vrot.lane.b32.xlu0 %v6588_v12, %s6006_s12 }
 0x240   :  { %2659 = vrot.lane.b32.xlu1 %v6600_v9, %s6006_s12 }
 0x242   :  { %2651 = vrot.lane.b32.xlu0 %v6560_v37, %s6006_s12 }
 0x244   :  { %2297 = vrot.lane.b32.xlu1 %v6628_v42, %s6005_s11 }
 0x246   :  { %2657 = vrot.lane.b32.xlu0 %v6596_v23, %s6006_s12 }
 0x248   :  { %2309 = vrot.lane.b32.xlu1 %v6634_v11, %s6005_s11 }
 0x24a   :  { %2643 = vrot.lane.b32.xlu0 %v6624_v49, %s6006_s12 }
 0x24c   :  { %v1770_v53 = vpop.permute.xlu0 %1769  ;;  %2841 = vrot.lane.b32.xlu1 %v6556_v48, %s6007_s13 }
 0x24e   :  { %v1772_v15 = vpop.permute.xlu1 %1771  ;;  %2655 = vrot.lane.b32.xlu0 %v6632_v56, %s6006_s12 }
 0x250   :  { %v1782_v20 = vpop.permute.xlu0 %1781  ;;  %2847 = vrot.lane.b32.xlu1 %v6592_v34, %s6007_s13 }
 0x252   :  { %v1784_v60 = vpop.permute.xlu1 %1783  ;;  %2839 = vrot.lane.b32.xlu0 %v6554_v33, %s6007_s13 }
 0x254   :  { %v6700_v61 = vpop.permute.xlu0 %1710  ;;  %2853 = vrot.lane.b32.xlu1 %v6564_v57, %s6007_s13 }
 0x256   :  { %v6704_v24 = vpop.permute.xlu1 %1712  ;;  %2845 = vrot.lane.b32.xlu0 %v6588_v12, %s6007_s13 }
 0x258   :  { %v6708_v4 = vpop.permute.xlu0 %1722  ;;  %2859 = vrot.lane.b32.xlu1 %v6600_v9, %s6007_s13 }
 0x25a   :  { %v6712_v21 = vpop.permute.xlu1 %1724  ;;  %2851 = vrot.lane.b32.xlu0 %v6560_v37, %s6007_s13 }
 0x25c   :  { %v6716_v36 = vpop.permute.xlu0 %2087  ;;  %3041 = vrot.lane.b32.xlu1 %v6556_v48, %s6008_s14 }
 0x25e   :  { %v6720_v50 = vpop.permute.xlu1 %2089  ;;  %2857 = vrot.lane.b32.xlu0 %v6596_v23, %s6007_s13 }
 0x260   :  { %v6724_v51 = vpop.permute.xlu0 %2099  ;;  %3047 = vrot.lane.b32.xlu1 %v6592_v34, %s6008_s14 }
 0x262   :  { %v6728_v13 = vpop.permute.xlu1 %2101  ;;  %2843 = vrot.lane.b32.xlu0 %v6624_v49, %s6007_s13 }
 0x264   :  { %v6732_v8 = vpop.permute.xlu0 %2287  ;;  %2649 = vrot.lane.b32.xlu1 %v6628_v42, %s6006_s12 }
 0x266   :  { %v6736_v31 = vpop.permute.xlu1 %2289  ;;  %2855 = vrot.lane.b32.xlu0 %v6632_v56, %s6007_s13 }
 0x268   :  { %v1776_v32 = vpop.permute.xlu0 %1775  ;;  %2661 = vrot.lane.b32.xlu1 %v6634_v11, %s6006_s12 }
 0x269   :  { %v1799_v35 = vsel %vm94_vm0, %v1770_v53, %v1776_v32  ;;  %v1796_v62 = vsel %vm94_vm0, %v1776_v32, %v1782_v20 }
 0x26a   :  { %v1778_v44 = vpop.permute.xlu1 %1777  ;;  %3039 = vrot.lane.b32.xlu0 %v6554_v33, %s6008_s14  ;;  %v1806_v2 = vmul.f32 %v1799_v35, %v6159_v16 }
 0x26b   :  { %v1800_v10 = vsel %vm94_vm0, %v1772_v15, %v1778_v44  ;;  %v1797_v3 = vsel %vm94_vm0, %v1778_v44, %v1784_v60 }
 0x26c   :  { %v1810_v47 = vmul.f32 %v1800_v10, %v6159_v16  ;;  %v1788_v30 = vpop.permute.xlu0 %1787  ;;  %3053 = vrot.lane.b32.xlu1 %v6564_v57, %s6008_s14  ;;  %v1811_v44 = vmul.f32 %v1797_v3, %v6168_v19 }
 0x26d   :  { %v1793_v46 = vsel %vm94_vm0, %v1782_v20, %v1788_v30  ;;  %v1802_v6 = vsel %vm94_vm0, %v1788_v30, %v1770_v53 }
 0x26e   :  { %v1790_v40 = vpop.permute.xlu1 %1789  ;;  %3045 = vrot.lane.b32.xlu0 %v6588_v12, %s6008_s14  ;;  %v1822_v35 = vpack.c.bf16 %v1810_v47, %v1806_v2  ;;  %v1805_v10 = vmul.f32 %v1802_v6, %v6165_v18  ;;  %v1808_v30 = vmul.f32 %v1793_v46, %v6162_v17  ;;  %v1807_v2 = vmul.f32 %v1796_v62, %v6168_v19 }
 0x26f   :  { %v1794_v41 = vsel %vm94_vm0, %v1784_v60, %v1790_v40  ;;  %v1803_v26 = vsel %vm94_vm0, %v1790_v40, %v1772_v15 }
 0x270   :  { %v1809_v53 = vmul.f32 %v1803_v26, %v6165_v18  ;;  %v1812_v20 = vmul.f32 %v1794_v41, %v6162_v17  ;;  %v6771_v32 = vpop.permute.xlu0 %1716  ;;  %1857 = vmatprep.subr.bf16.mxu0 %v1822_v35  ;;  %3059 = vrot.lane.b32.xlu1 %v6600_v9, %s6008_s14  ;;  %v1823_v47 = vpack.c.bf16 %v1811_v44, %v1807_v2 }
 0x272   :  { %v1821_v6 = vpack.c.bf16 %v1809_v53, %v1805_v10  ;;  %v1719_v3 = vpop.permute.xlu1 %1718  ;;  %3051 = vrot.lane.b32.xlu0 %v6560_v37, %s6008_s14  ;;  %v1824_v40 = vpack.c.bf16 %v1812_v20, %v1808_v30 }
 0x274   :  { %v1729_v46 = vpop.permute.xlu0 %1728  ;;  %1858 = vmatpush1.bf16.msra.mxu0 %v1821_v6  ;;  %1908 = vmatprep.subr.bf16.mxu1 %v1824_v40  ;;  %v1741_v40 = vsel %vm48_vm1, %v6704_v24, %v1719_v3 }
 0x275   :  { %2849 = vrot.lane.b32.xlu1 %v6628_v42, %s6007_s13  ;;  %1909 = vmatpush1.bf16.msra.mxu1 %v1823_v47 }
 0x276   :  { %v1731_v26 = vpop.permute.xlu1 %1730  ;;  %3057 = vrot.lane.b32.xlu0 %v6596_v23, %s6008_s14 }
 0x277   :  { %v1735_v47 = vsel %vm48_vm1, %v6712_v21, %v1731_v26 }
 0x278   :  { %v6782_v41 = vpop.permute.xlu0 %2093 }
 0x279   :  { %2861 = vrot.lane.b32.xlu1 %v6634_v11, %s6007_s13 }
 0x27a   :  { %v6786_v62 = vpop.permute.xlu1 %2095  ;;  %3043 = vrot.lane.b32.xlu0 %v6624_v49, %s6008_s14 }
 0x27c   :  { %v6790_v15 = vpop.permute.xlu0 %2105 }
 0x27d   :  { %3241 = vrot.lane.b32.xlu1 %v6556_v48, %s6009_s15 }
 0x27e   :  { %v6794_v60 = vpop.permute.xlu1 %2107  ;;  %3055 = vrot.lane.b32.xlu0 %v6632_v56, %s6008_s14 }
 0x280   :  { %v6798_v35 = vpop.permute.xlu0 %2293 }
 0x281   :  { %3247 = vrot.lane.b32.xlu1 %v6592_v34, %s6009_s15 }
 0x282   :  { %v6802_v44 = vpop.permute.xlu1 %2295  ;;  %3239 = vrot.lane.b32.xlu0 %v6554_v33, %s6009_s15 }
 0x284   :  { %v1774_v10 = vpop.permute.xlu0 %1773 }
 0x285   :  { %3049 = vrot.lane.b32.xlu1 %v6628_v42, %s6008_s14 }
 0x286   :  { %3245 = vrot.lane.b32.xlu0 %v6588_v12, %s6009_s15  ;;  %v1780_v30 = vpop.permute.xlu1 %1779 }
 0x287   :  { %v1801_v53 = vsel %vm94_vm0, %v1774_v10, %v1780_v30 }
 0x288   :  { %v1814_v20 = vmul.f32 %v1801_v53, %v6159_v16  ;;  %v1786_v2 = vpop.permute.xlu0 %1785 }
 0x289   :  { %v1798_v6 = vsel %vm94_vm0, %v1780_v30, %v1786_v2  ;;  %3061 = vrot.lane.b32.xlu1 %v6634_v11, %s6008_s14  ;;  %v1740_v30 = vsel %vm48_vm1, %v6700_v61, %v6771_v32 }
 0x28a   :  { %v1826_v25 = vpack.c.bf16 %v1814_v20, %v1814_v20  ;;  %v1815_v58 = vmul.f32 %v1798_v6, %v6168_v19  ;;  %3251 = vrot.lane.b32.xlu0 %v6560_v37, %s6009_s15  ;;  %v1792_v53 = vpop.permute.xlu1 %1791  ;;  %v1738_v20 = vsel %vm48_vm1, %v1719_v3, %v6712_v21  ;;  %v1734_v6 = vsel %vm48_vm1, %v6708_v4, %v1729_v46 }
 0x28b   :  { %v1795_v16 = vsel %vm94_vm0, %v1786_v2, %v1792_v53  ;;  %v1804_v59 = vsel %vm94_vm0, %v1792_v53, %v1774_v10  ;;  %v1751_v2 = vmul.f32 %v1741_v40, %v6172_v22  ;;  %v1744_v10 = vsel %vm48_vm1, %v1731_v26, %v6704_v24 }
 0x28c   :  { %v1813_v19 = vmul.f32 %v1804_v59, %v6165_v18  ;;  %v1816_v1 = vmul.f32 %v1795_v16, %v6162_v17  ;;  %v6842_v0 = vpop.permute.xlu0 %2299  ;;  %5483 = vmatprep.subr.msk.bf16.mxu0 %vm1844_vm10, %v1826_v25  ;;  %v1753_v21 = vmul.f32 %v1735_v47, %v6200_v43  ;;  %v1827_v3 = vpack.c.bf16 %v1815_v58, %v1815_v58 }
 0x28d   :  { %3253 = vrot.lane.b32.xlu1 %v6564_v57, %s6009_s15  ;;  %v1737_v25 = vsel %vm48_vm1, %v6771_v32, %v6708_v4  ;;  %v1747_v24 = vmul.f32 %v1740_v30, %v6172_v22  ;;  %v1743_v58 = vsel %vm48_vm1, %v1729_v46, %v6700_v61  ;;  %v1749_v26 = vmul.f32 %v1734_v6, %v6200_v43  ;;  %v5965_v4 = vld [vmem:[%s8351_s4 + $0xc] sm:$0xff]  }
 0x28e   :  { %v1825_v53 = vpack.c.bf16 %v1813_v19, %v1813_v19  ;;  %v1828_v59 = vpack.c.bf16 %v1816_v1, %v1816_v1  ;;  %3257 = vrot.lane.b32.xlu0 %v6596_v23, %s6009_s15  ;;  %v6854_v16 = vpop.permute.xlu1 %2301  ;;  %v1752_v19 = vmul.f32 %v1738_v20, %v6192_v39  ;;  %v1750_v1 = vmul.f32 %v1744_v10, %v6189_v38 }
 0x28f   :  { %v1852_v61 = vsel %vm1844_vm10, %v1827_v3, 0  ;;  %v1762_v32 = vpack.c.bf16 %v1751_v2, %v1747_v24  ;;  %v1764_v46 = vpack.c.bf16 %v1753_v21, %v1749_v26  ;;  %v1748_v30 = vmul.f32 %v1737_v25, %v6192_v39 }
 0x290   :  { %v1715_v40 = vpop.permute.xlu0 %1714  ;;  %5486 = vmatprep.subr.msk.bf16.mxu1 %vm1844_vm10, %v1828_v59  ;;  %v1846_v47 = vsel %vm1844_vm10, %v1825_v53, 0  ;;  %v1746_v20 = vmul.f32 %v1743_v58, %v6189_v38  ;;  %v2118_v21 = vsel %vm400_vm4, %v6720_v50, %v6786_v62  ;;  %v8431_v24 = vmov 0  }
 0x291   :  { %3259 = vrot.lane.b32.xlu1 %v6600_v9, %s6009_s15  ;;  %1860 = vmatpush1.bf16.msra.mxu0 %v1846_v47  ;;  %v1763_v10 = vpack.c.bf16 %v1752_v19, %v1748_v30  ;;  %v2112_v58 = vsel %vm400_vm4, %v6728_v13, %v6794_v60  ;;  %v3439_v47 = vld [vmem:[%s8352_s5] sm:$0xff]  ;;  %v2111_v30 = vsel %vm400_vm4, %v6724_v51, %v6790_v15 }
 0x292   :  { %1911 = vmatpush1.bf16.msra.mxu1 %v1852_v61  ;;  %3243 = vrot.lane.b32.xlu0 %v6624_v49, %s6009_s15  ;;  %v6879_v6 = vpop.permute.xlu1 %2307  ;;  %v1761_v53 = vpack.c.bf16 %v1750_v1, %v1746_v20  ;;  %v2117_v61 = vsel %vm400_vm4, %v6716_v36, %v6782_v41 }
 0x293   :  { %1985 = vmatprep.subr.bf16.mxu0 %v1762_v32  ;;  %2036 = vmatprep.subr.bf16.mxu1 %v1764_v46  ;;  %v2115_v32 = vsel %vm400_vm4, %v6786_v62, %v6728_v13  ;;  %v2128_v46 = vmul.f32 %v2118_v21, %v6215_v52  ;;  %v2130_v13 = vmul.f32 %v2112_v58, %v6242_v14 }
 0x294   :  { %v1727_v59 = vpop.permute.xlu0 %1726  ;;  %5484 = vmatmul.mubr.msk.bf16.vlgmr.msra.gmra.mrb[40].mxu0 %vm1837_vm11, %v5965_v4 }
 0x295   :  { %3249 = vrot.lane.b32.xlu1 %v6628_v42, %s6009_s15  ;;  %5487 = vmatmul.mubr.msk.bf16.vlgmr.msra.gmra.mrb[40].mxu1 %vm1837_vm11, %v5965_v4  ;;  %v5966_v4 = vld [vmem:[%s8351_s4 + $0x14] ss:$0 sps:$4 sm:$0xff]  }
 0x296   :  { %1986 = vmatpush1.bf16.msra.mxu0 %v1761_v53  ;;  %2037 = vmatpush1.bf16.msra.mxu1 %v1763_v10  ;;  %v1721_v2 = vpop.permute.xlu1 %1720  ;;  %v3440_v53 = vld [vmem:[%s8352_s5 + $0x8] sm:$0xff] }
 0x297   :  { %3255 = vrot.lane.b32.xlu0 %v6632_v56, %s6009_s15  ;;  %v1739_v3 = vsel %vm48_vm1, %v1721_v2, %v1727_v59  ;;  %v1742_v25 = vsel %vm48_vm1, %v1715_v40, %v1721_v2  ;;  %1899 = vmatprep.mubr.bf16.mxu0 %v8431_v24  ;;  %v2121_v2 = vsel %vm400_vm4, %v6794_v60, %v6720_v50  ;;  %v3441_v50 = vld [vmem:[%s8352_s5 + $0x10] sm:$0xff] }
 0x298   :  { %v1755_v26 = vmul.f32 %v1742_v25, %v6172_v22  ;;  %v1756_v19 = vmul.f32 %v1739_v3, %v6192_v39  ;;  %v6902_v1 = vpop.permute.xlu0 %2091  ;;  %1950 = vmatprep.mubr.bf16.mxu1 %v8431_v24  ;;  %v2124_v60 = vmul.f32 %v2117_v61, %v6215_v52  ;;  %v2114_v61 = vsel %vm400_vm4, %v6782_v41, %v6724_v51 }
 0x299   :  { %3261 = vrot.lane.b32.xlu1 %v6634_v11, %s6009_s15  ;;  %v2125_v41 = vmul.f32 %v2114_v61, %v6235_v5 }
 0x29a   :  { %v1766_v20 = vpack.c.bf16 %v1755_v26, %v1755_v26  ;;  %v1733_v10 = vpop.permute.xlu1 %1732  ;;  %v1767_v3 = vpack.c.bf16 %v1756_v19, %v1756_v19 }
 0x29b   :  { %3444 = vperm.xlu0 %5943, %v3439_v47   ;;  %v1736_v62 = vsel %vm48_vm1, %v1727_v59, %v1733_v10  ;;  %v1745_v21 = vsel %vm48_vm1, %v1733_v10, %v1715_v40  ;;  %v2120_v40 = vsel %vm400_vm4, %v6790_v15, %v6716_v36  ;;  %v2126_v59 = vmul.f32 %v2111_v30, %v6242_v14 }
 0x29c   :  { %v1754_v25 = vmul.f32 %v1745_v21, %v6189_v38  ;;  %v1757_v26 = vmul.f32 %v1736_v62, %v6200_v43  ;;  %v2104_v39 = vpop.permute.xlu0 %2103  ;;  %5485 = vmatmul.mubr.msk.bf16.gmra.mrb[44].mxu0 %vm1837_vm11, %v5966_v4  ;;  %5491 = vmatprep.subr.msk.bf16.mxu0 %vm1844_vm10, %v1766_v20  ;;  %v2129_v36 = vmul.f32 %v2115_v32, %v6235_v5  ;;  %v1980_v20 = vsel %vm1844_vm10, %v1767_v3, 0  ;;  %v5967_v62 = vld [vmem:[%s8351_s4] sm:$0xff]  }
 0x29d   :  { %3449 = vperm.xlu1 %5944, %v3440_v53   ;;  %5488 = vmatmul.mubr.msk.bf16.gmra.mrb[44].mxu1 %vm1837_vm11, %v5966_v4  ;;  %v2127_v15 = vmul.f32 %v2121_v2, %v6232_v63  ;;  %v2140_v10 = vpack.c.bf16 %v2128_v46, %v2124_v60  ;;  %v2142_v53 = vpack.c.bf16 %v2130_v13, %v2126_v59 }
 0x29e   :  { %v1765_v58 = vpack.c.bf16 %v1754_v25, %v1754_v25  ;;  %v1768_v19 = vpack.c.bf16 %v1757_v26, %v1757_v26  ;;  %v6952_v47 = vpop.permute.xlu1 %2641  ;;  %2017 = vmatprep.mubr.bf16.mxu0 %v8431_v24  ;;  %2068 = vmatprep.mubr.bf16.mxu1 %v8431_v24  ;;  %v2123_v51 = vmul.f32 %v2120_v40, %v6232_v63 }
 0x29f   :  { %3454 = vperm.xlu0 %5943, %v3441_v50   ;;  %v2141_v21 = vpack.c.bf16 %v2129_v36, %v2125_v41  ;;  %v2318_v13 = vsel %vm588_vm5, %v6736_v31, %v6802_v44  ;;  %v2312_v36 = vsel %vm588_vm5, %v6854_v16, %v6879_v6 }
 0x2a0   :  { %v2306_v4 = vpop.permute.xlu0 %2305  ;;  %5494 = vmatprep.subr.msk.bf16.mxu1 %vm1844_vm10, %v1768_v19  ;;  %v1974_v30 = vsel %vm1844_vm10, %v1765_v58, 0  ;;  %v2139_v2 = vpack.c.bf16 %v2127_v15, %v2123_v51  ;;  %v5968_v58 = vld [vmem:[%s8351_s4 + $0x8] ss:$0 sps:$4 sm:$0xff]   ;;  %v2317_v19 = vsel %vm588_vm5, %v6732_v8, %v6798_v35  ;;  %v2328_v61 = vmul.f32 %v2318_v13, %v6254_v27 }
 0x2a1   :  { %1988 = vmatpush1.bf16.msra.mxu0 %v1974_v30  ;;  %2039 = vmatpush1.bf16.msra.mxu1 %v1980_v20  ;;  %v2311_v50 = vsel %vm588_vm5, %v6842_v0, %v2306_v4  ;;  %v2320_v20 = vsel %vm588_vm5, %v2306_v4, %v6732_v8  ;;  %v2324_v8 = vmul.f32 %v2317_v19, %v6254_v27 }
 0x2a2   :  { %2173 = vmatprep.subr.bf16.mxu0 %v2140_v10  ;;  %2224 = vmatprep.subr.bf16.mxu1 %v2142_v53  ;;  %v6970_v32 = vpop.permute.xlu1 %2647  ;;  %v2326_v10 = vmul.f32 %v2311_v50, %v6282_v45  ;;  %v2330_v4 = vmul.f32 %v2312_v36, %v6282_v45 }
 0x2a4   :  { %v6972_v25 = vpop.permute.xlu0 %2291  ;;  %5492 = vmatmul.mubr.msk.bf16.vlgmr.msra.gmra.mrb[40].mxu0 %vm1837_vm11, %v5967_v62 }
 0x2a5   :  { %5495 = vmatmul.mubr.msk.bf16.vlgmr.msra.gmra.mrb[40].mxu1 %vm1837_vm11, %v5967_v62  ;;  %2174 = vmatpush1.bf16.msra.mxu0 %v2139_v2 }
 0x2a6   :  { %2225 = vmatpush1.bf16.msra.mxu1 %v2141_v21  ;;  %v2098_v46 = vpop.permute.xlu1 %2097  ;;  %2027 = vmatprep.mubr.bf16.mxu0 %v8431_v24 }
 0x2a7   :  { %v2116_v3 = vsel %vm400_vm4, %v2098_v46, %v2104_v39  ;;  %v2119_v26 = vsel %vm400_vm4, %v6902_v1, %v2098_v46  ;;  %2078 = vmatprep.mubr.bf16.mxu1 %v8431_v24 }
 0x2a8   :  { %v2132_v60 = vmul.f32 %v2119_v26, %v6215_v52  ;;  %v2133_v40 = vmul.f32 %v2116_v3, %v6235_v5  ;;  %v6992_v59 = vpop.permute.xlu0 %2303  ;;  %v2340_v26 = vpack.c.bf16 %v2328_v61, %v2324_v8 }
 0x2aa   :  { %v2144_v15 = vpack.c.bf16 %v2132_v60, %v2132_v60  ;;  %v2110_v30 = vpop.permute.xlu1 %2109  ;;  %v2145_v51 = vpack.c.bf16 %v2133_v40, %v2133_v40  ;;  %v2342_v40 = vpack.c.bf16 %v2330_v4, %v2326_v10 }
 0x2ab   :  { %v2113_v53 = vsel %vm400_vm4, %v2104_v39, %v2110_v30  ;;  %v2122_v62 = vsel %vm400_vm4, %v2110_v30, %v6902_v1  ;;  %v2315_v39 = vsel %vm588_vm5, %v6802_v44, %v6854_v16  ;;  %v2321_v1 = vsel %vm588_vm5, %v6879_v6, %v6736_v31 }
 0x2ac   :  { %v2131_v41 = vmul.f32 %v2122_v62, %v6232_v63  ;;  %v2134_v2 = vmul.f32 %v2113_v53, %v6242_v14  ;;  %v7017_v21 = vpop.permute.xlu0 %2639  ;;  %5493 = vmatmul.mubr.msk.bf16.gmra.mrb[48].mxu0 %vm1837_vm11, %v5968_v58  ;;  %5502 = vmatprep.subr.msk.bf16.mxu0 %vm1844_vm10, %v2144_v15  ;;  %v2314_v44 = vsel %vm588_vm5, %v6798_v35, %v6842_v0  ;;  %v2168_v6 = vsel %vm1844_vm10, %v2145_v51, 0 }
 0x2ad   :  { %5496 = vmatmul.mubr.msk.bf16.gmra.mrb[48].mxu1 %vm1837_vm11, %v5968_v58  ;;  %2205 = vmatprep.mubr.bf16.mxu0 %v8431_v24  ;;  %v2323_v16 = vmul.f32 %v2320_v20, %v6294_v54  ;;  %v2329_v50 = vmul.f32 %v2315_v39, %v6297_v55  ;;  %v5969_v58 = vld [vmem:[%s8351_s4 + $0x18] sm:$0xff]   ;;  %v2327_v0 = vmul.f32 %v2321_v1, %v6294_v54 }
 0x2ae   :  { %v2143_v46 = vpack.c.bf16 %v2131_v41, %v2131_v41  ;;  %v2146_v13 = vpack.c.bf16 %v2134_v2, %v2134_v2  ;;  %v7033_v3 = vpop.permute.xlu1 %2653  ;;  %2256 = vmatprep.mubr.bf16.mxu1 %v8431_v24  ;;  %v2325_v35 = vmul.f32 %v2314_v44, %v6297_v55  ;;  %v5970_v41 = vld [vmem:[%s8351_s4 + $0x20] ss:$0 sps:$4 sm:$0xff]  }
 0x2af   :  { %v2339_v61 = vpack.c.bf16 %v2327_v0, %v2323_v16 }
 0x2b0   :  { %v7042_v60 = vpop.permute.xlu0 %2645  ;;  %5505 = vmatprep.subr.msk.bf16.mxu1 %vm1844_vm10, %v2146_v13  ;;  %v2162_v31 = vsel %vm1844_vm10, %v2143_v46, 0  ;;  %v2341_v36 = vpack.c.bf16 %v2329_v50, %v2325_v35 }
 0x2b1   :  { %2176 = vmatpush1.bf16.msra.mxu0 %v2162_v31  ;;  %2227 = vmatpush1.bf16.msra.mxu1 %v2168_v6  ;;  %v2492_v6 = vpack.c.bf16 %v6592_v34, %v6588_v12  ;;  %v2667_v34 = vsel %vm924_vm6, %v6970_v32, %v7033_v3 }
 0x2b2   :  { %2373 = vmatprep.subr.bf16.mxu0 %v2340_v26  ;;  %2424 = vmatprep.subr.bf16.mxu1 %v2342_v40  ;;  %v7052_v19 = vpop.permute.xlu1 %2659  ;;  %v2494_v40 = vpack.c.bf16 %v6600_v9, %v6596_v23  ;;  %v2491_v23 = vpack.c.bf16 %v6556_v48, %v6554_v33  ;;  %v2493_v9 = vpack.c.bf16 %v6564_v57, %v6560_v37 }
 0x2b3   :  { %v2495_v33 = vpack.c.bf16 %v6624_v49, %v6624_v49  ;;  %v2498_v37 = vpack.c.bf16 %v6634_v11, %v6634_v11  ;;  %v2497_v57 = vpack.c.bf16 %v6632_v56, %v6632_v56  ;;  %v5972_v56 = vld [vmem:[%s8351_s4 + $0x2c] ss:$0 sps:$4 sm:$0xff]  }
 0x2b4   :  { %v7054_v15 = vpop.permute.xlu0 %2651  ;;  %5503 = vmatmul.mubr.msk.bf16.vlgmr.msra.gmra.mrb[40].mxu0 %vm1837_vm11, %v5969_v58 }
 0x2b5   :  { %5506 = vmatmul.mubr.msk.bf16.vlgmr.msra.gmra.mrb[40].mxu1 %vm1837_vm11, %v5969_v58  ;;  %2374 = vmatpush1.bf16.msra.mxu0 %v2339_v61  ;;  %v5971_v58 = vld [vmem:[%s8351_s4 + $0x24] sm:$0xff]   ;;  %v2666_v0 = vsel %vm924_vm6, %v7042_v60, %v7054_v15  ;;  %v2673_v61 = vsel %vm924_vm6, %v7052_v19, %v6952_v47 }
 0x2b6   :  { %2425 = vmatpush1.bf16.msra.mxu1 %v2341_v36  ;;  %v2298_v30 = vpop.permute.xlu1 %2297  ;;  %2215 = vmatprep.mubr.bf16.mxu0 %v8431_v24  ;;  %v2676_v36 = vmul.f32 %v2666_v0, %v6340_v29  ;;  %v2682_v49 = vmul.f32 %v2673_v61, %v6337_v28 }
 0x2b7   :  { %v2316_v20 = vsel %vm588_vm5, %v2298_v30, %v6992_v59  ;;  %v2319_v10 = vsel %vm588_vm5, %v6972_v25, %v2298_v30  ;;  %2266 = vmatprep.mubr.bf16.mxu1 %v8431_v24 }
 0x2b8   :  { %v2332_v53 = vmul.f32 %v2319_v10, %v6254_v27  ;;  %v2333_v62 = vmul.f32 %v2316_v20, %v6297_v55  ;;  %v7068_v51 = vpop.permute.xlu0 %2657  ;;  %v2496_v20 = vpack.c.bf16 %v6628_v42, %v6628_v42  ;;  %v2680_v10 = vmul.f32 %v2667_v34, %v6340_v29 }
 0x2b9   :  { %v2672_v35 = vsel %vm924_vm6, %v7068_v51, %v7017_v21 }
 0x2ba   :  { %v2344_v2 = vpack.c.bf16 %v2332_v53, %v2332_v53  ;;  %v2310_v8 = vpop.permute.xlu1 %2309  ;;  %v2345_v4 = vpack.c.bf16 %v2333_v62, %v2333_v62  ;;  %v2678_v48 = vmul.f32 %v2672_v35, %v6337_v28  ;;  %v2514_v62 = vsel %vm1844_vm10, %v2495_v33, 0  ;;  %v8434_v35 = vld [vmem:[#allocation10_spill] sm:$0xff]  ;;  %v5974_v33 = vld [vmem:[%s8351_s4 + $0x38] ss:$0 sps:$4 sm:$0xff]  }
 0x2bb   :  { %v2313_v39 = vsel %vm588_vm5, %v6992_v59, %v2310_v8  ;;  %v2322_v1 = vsel %vm588_vm5, %v2310_v8, %v6972_v25  ;;  %v2692_v11 = vpack.c.bf16 %v2680_v10, %v2676_v36 }
 0x2bc   :  { %v2331_v46 = vmul.f32 %v2322_v1, %v6294_v54  ;;  %v2334_v13 = vmul.f32 %v2313_v39, %v6282_v45  ;;  %v7081_v44 = vpop.permute.xlu0 %2643  ;;  %5504 = vmatmul.mubr.msk.bf16.gmra.mrb[52].mxu0 %vm1837_vm11, %v5970_v41  ;;  %5513 = vmatprep.subr.msk.bf16.mxu0 %vm1844_vm10, %v2344_v2  ;;  %v2368_v31 = vsel %vm1844_vm10, %v2345_v4, 0  ;;  %v2694_v2 = vpack.c.bf16 %v2682_v49, %v2678_v48 }
 0x2bd   :  { %5507 = vmatmul.mubr.msk.bf16.gmra.mrb[52].mxu1 %vm1837_vm11, %v5970_v41  ;;  %2405 = vmatprep.mubr.bf16.mxu0 %v8431_v24  ;;  %v2520_v41 = vsel %vm1844_vm10, %v2497_v57, 0  ;;  %v2669_v39 = vsel %vm924_vm6, %v7017_v21, %v7042_v60  ;;  %v2663_v4 = vsel %vm924_vm6, %v7054_v15, %v7068_v51  ;;  %v8432_v21 = vld [vmem:[#allocation7_spill] sm:$0xff]  ;;  %v2664_v15 = vsel %vm924_vm6, %v7033_v3, %v7052_v19  ;;  %v8433_v51 = vld [vmem:[#allocation8_spill] sm:$0xff] }
 0x2be   :  { %v2343_v59 = vpack.c.bf16 %v2331_v46, %v2331_v46  ;;  %v2346_v16 = vpack.c.bf16 %v2334_v13, %v2334_v13  ;;  %v7087_v26 = vpop.permute.xlu1 %2841  ;;  %2456 = vmatprep.mubr.bf16.mxu1 %v8431_v24  ;;  %v2670_v46 = vsel %vm924_vm6, %v6952_v47, %v6970_v32  ;;  %v2675_v60 = vmul.f32 %v2669_v39, %v8432_v21  ;;  %v8435_v39 = vld [vmem:[#allocation9_spill] sm:$0xff] }
 0x2bf   :  { %v2679_v47 = vmul.f32 %v2670_v46, %v8432_v21  ;;  %v2681_v32 = vmul.f32 %v2664_v15, %v8433_v51 }
 0x2c0   :  { %v7090_v25 = vpop.permute.xlu0 %2655  ;;  %5516 = vmatprep.subr.msk.bf16.mxu1 %vm1844_vm10, %v2346_v16  ;;  %v2362_v50 = vsel %vm1844_vm10, %v2343_v59, 0  ;;  %v2677_v59 = vmul.f32 %v2663_v4, %v8433_v51 }
 0x2c1   :  { %2376 = vmatpush1.bf16.msra.mxu0 %v2362_v50  ;;  %2427 = vmatpush1.bf16.msra.mxu1 %v2368_v31  ;;  %v5973_v50 = vld [vmem:[%s8351_s4 + $0x30] sm:$0xff]  }
 0x2c2   :  { %2525 = vmatprep.subr.bf16.mxu0 %v2492_v6  ;;  %2576 = vmatprep.subr.bf16.mxu1 %v2494_v40  ;;  %v7110_v12 = vpop.permute.xlu1 %2847  ;;  %v2691_v6 = vpack.c.bf16 %v2679_v47, %v2675_v60  ;;  %v2693_v40 = vpack.c.bf16 %v2681_v32, %v2677_v59  ;;  %v8436_v32 = vld [vmem:[#allocation11_spill] sm:$0xff] }
 0x2c4   :  { %v7125_v30 = vpop.permute.xlu0 %2839  ;;  %5514 = vmatmul.mubr.msk.bf16.vlgmr.msra.gmra.mrb[40].mxu0 %vm1837_vm11, %v5971_v58 }
 0x2c5   :  { %5517 = vmatmul.mubr.msk.bf16.vlgmr.msra.gmra.mrb[40].mxu1 %vm1837_vm11, %v5971_v58  ;;  %2526 = vmatpush1.bf16.msra.mxu0 %v2491_v23 }
 0x2c6   :  { %2577 = vmatpush1.bf16.msra.mxu1 %v2493_v9  ;;  %v7139_v53 = vpop.permute.xlu1 %2853  ;;  %5524 = vmatprep.subr.msk.bf16.mxu0 %vm1844_vm10, %v2496_v20 }
 0x2c7   :  { %5527 = vmatprep.subr.msk.bf16.mxu1 %vm1844_vm10, %v2498_v37  ;;  %2415 = vmatprep.mubr.bf16.mxu0 %v8431_v24  ;;  %v2867_v3 = vsel %vm1112_vm7, %v7110_v12, %v7139_v53 }
 0x2c8   :  { %v2846_v42 = vpop.permute.xlu0 %2845  ;;  %2466 = vmatprep.mubr.bf16.mxu1 %v8431_v24  ;;  %v2880_v48 = vmul.f32 %v2867_v3, %v8434_v35  ;;  %v5975_v3 = vld [vmem:[%s8351_s4 + $0x3c] sm:$0xff]  }
 0x2c9   :  { %2528 = vmatpush1.bf16.msra.mxu0 %v2514_v62  ;;  %v2869_v57 = vsel %vm1112_vm7, %v7125_v30, %v2846_v42 }
 0x2ca   :  { %2579 = vmatpush1.bf16.msra.mxu1 %v2520_v41  ;;  %v7151_v8 = vpop.permute.xlu1 %2859  ;;  %2725 = vmatprep.subr.bf16.mxu0 %v2692_v11 }
 0x2cb   :  { %2776 = vmatprep.subr.bf16.mxu1 %v2694_v2  ;;  %v2873_v11 = vsel %vm1112_vm7, %v7151_v8, %v7087_v26 }
 0x2cc   :  { %v2852_v1 = vpop.permute.xlu0 %2851  ;;  %5515 = vmatmul.mubr.msk.bf16.gmra.mrb[56].mxu0 %vm1837_vm11, %v5972_v56  ;;  %v2882_v15 = vmul.f32 %v2873_v11, %v8435_v39 }
 0x2cd   :  { %5518 = vmatmul.mubr.msk.bf16.gmra.mrb[56].mxu1 %vm1837_vm11, %v5972_v56  ;;  %2557 = vmatprep.mubr.bf16.mxu0 %v8431_v24  ;;  %v2866_v58 = vsel %vm1112_vm7, %v2846_v42, %v2852_v1 }
 0x2ce   :  { %v7168_v13 = vpop.permute.xlu1 %3041  ;;  %2608 = vmatprep.mubr.bf16.mxu1 %v8431_v24  ;;  %v2876_v34 = vmul.f32 %v2866_v58, %v8434_v35 }
 0x2d0   :  { %v2858_v16 = vpop.permute.xlu0 %2857  ;;  %v2892_v2 = vpack.c.bf16 %v2880_v48, %v2876_v34  ;;  %v8438_v48 = vld [vmem:[#allocation14_spill] sm:$0xff] }
 0x2d1   :  { %v2872_v37 = vsel %vm1112_vm7, %v2858_v16, %v7125_v30 }
 0x2d2   :  { %v7182_v31 = vpop.permute.xlu1 %3047  ;;  %v2878_v4 = vmul.f32 %v2872_v37, %v8435_v39 }
 0x2d4   :  { %v7186_v0 = vpop.permute.xlu0 %2843  ;;  %5525 = vmatmul.mubr.msk.bf16.vlgmr.msra.gmra.mrb[40].mxu0 %vm1837_vm11, %v5973_v50  ;;  %v2894_v58 = vpack.c.bf16 %v2882_v15, %v2878_v4 }
 0x2d5   :  { %5528 = vmatmul.mubr.msk.bf16.vlgmr.msra.gmra.mrb[40].mxu1 %vm1837_vm11, %v5973_v50  ;;  %2726 = vmatpush1.bf16.msra.mxu0 %v2691_v6  ;;  %v2875_v6 = vmul.f32 %v2869_v57, %v8436_v32 }
 0x2d6   :  { %2777 = vmatpush1.bf16.msra.mxu1 %v2693_v40  ;;  %v2650_v19 = vpop.permute.xlu1 %2649  ;;  %2567 = vmatprep.mubr.bf16.mxu0 %v8431_v24 }
 0x2d7   :  { %v2668_v23 = vsel %vm924_vm6, %v2650_v19, %v7090_v25  ;;  %v2671_v9 = vsel %vm924_vm6, %v7081_v44, %v2650_v19  ;;  %2618 = vmatprep.mubr.bf16.mxu1 %v8431_v24 }
 0x2d8   :  { %v2683_v61 = vmul.f32 %v2671_v9, %v8432_v21  ;;  %v2684_v36 = vmul.f32 %v2668_v23, %v6340_v29  ;;  %v7205_v20 = vpop.permute.xlu0 %2855 }
 0x2da   :  { %v2695_v10 = vpack.c.bf16 %v2683_v61, %v2683_v61  ;;  %v2696_v49 = vpack.c.bf16 %v2684_v36, %v2684_v36  ;;  %v2662_v62 = vpop.permute.xlu1 %2661 }
 0x2db   :  { %v2665_v56 = vsel %vm924_vm6, %v7090_v25, %v2662_v62  ;;  %v2674_v41 = vsel %vm924_vm6, %v2662_v62, %v7081_v44  ;;  %v2870_v25 = vsel %vm1112_vm7, %v7087_v26, %v7110_v12  ;;  %v2863_v44 = vsel %vm1112_vm7, %v2852_v1, %v2858_v16  ;;  %v8437_v12 = vld [vmem:[#allocation12_spill] sm:$0xff]  ;;  %v5976_v62 = vld [vmem:[%s8351_s4 + $0x44] ss:$0 sps:$4 sm:$0xff]  }
 0x2dc   :  { %v2685_v30 = vmul.f32 %v2665_v56, %v8433_v51  ;;  %v2686_v42 = vmul.f32 %v2674_v41, %v6337_v28  ;;  %v3040_v46 = vpop.permute.xlu0 %3039  ;;  %5526 = vmatmul.mubr.msk.bf16.gmra.mrb[60].mxu0 %vm1837_vm11, %v5974_v33  ;;  %5535 = vmatprep.subr.msk.bf16.mxu0 %vm1844_vm10, %v2696_v49  ;;  %v2714_v60 = vsel %vm1844_vm10, %v2695_v10, 0  ;;  %v2864_v26 = vsel %vm1112_vm7, %v7139_v53, %v7151_v8 }
 0x2dd   :  { %5529 = vmatmul.mubr.msk.bf16.gmra.mrb[60].mxu1 %vm1837_vm11, %v5974_v33  ;;  %2728 = vmatpush1.bf16.msra.mxu0 %v2714_v60  ;;  %v2877_v1 = vmul.f32 %v2863_v44, %v8437_v12  ;;  %v2879_v19 = vmul.f32 %v2870_v25, %v8436_v32  ;;  %v2881_v34 = vmul.f32 %v2864_v26, %v8437_v12 }
 0x2de   :  { %v2697_v59 = vpack.c.bf16 %v2685_v30, %v2685_v30  ;;  %v2698_v50 = vpack.c.bf16 %v2686_v42, %v2686_v42  ;;  %v3054_v47 = vpop.permute.xlu1 %3053  ;;  %2925 = vmatprep.subr.bf16.mxu0 %v2892_v2  ;;  %2757 = vmatprep.mubr.bf16.mxu0 %v8431_v24 }
 0x2df   :  { %2808 = vmatprep.mubr.bf16.mxu1 %v8431_v24  ;;  %v2891_v8 = vpack.c.bf16 %v2879_v19, %v2875_v6  ;;  %v2893_v23 = vpack.c.bf16 %v2881_v34, %v2877_v1  ;;  %v3067_v36 = vsel %vm1300_vm8, %v7182_v31, %v3054_v47  ;;  %v8439_v6 = vld [vmem:[#allocation13_spill] sm:$0xff] }
 0x2e0   :  { %v3046_v16 = vpop.permute.xlu0 %3045  ;;  %5538 = vmatprep.subr.msk.bf16.mxu1 %vm1844_vm10, %v2698_v50  ;;  %v2720_v40 = vsel %vm1844_vm10, %v2697_v59, 0  ;;  %v3080_v41 = vmul.f32 %v3067_v36, %v8438_v48 }
 0x2e1   :  { %2779 = vmatpush1.bf16.msra.mxu1 %v2720_v40  ;;  %v3069_v4 = vsel %vm1300_vm8, %v3040_v46, %v3046_v16  ;;  %v8440_v40 = vld [vmem:[#allocation15_spill] sm:$0xff] }
 0x2e2   :  { %2976 = vmatprep.subr.bf16.mxu1 %v2894_v58  ;;  %v3060_v53 = vpop.permute.xlu1 %3059  ;;  %v3075_v58 = vmul.f32 %v3069_v4, %v8440_v40 }
 0x2e3   :  { %v3073_v30 = vsel %vm1300_vm8, %v3060_v53, %v7168_v13 }
 0x2e4   :  { %v3052_v9 = vpop.permute.xlu0 %3051  ;;  %5536 = vmatmul.mubr.msk.bf16.vlgmr.msra.gmra.mrb[40].mxu0 %vm1837_vm11, %v5975_v3  ;;  %v3082_v19 = vmul.f32 %v3073_v30, %v8439_v6 }
 0x2e5   :  { %v3066_v61 = vsel %vm1300_vm8, %v3046_v16, %v3052_v9  ;;  %5539 = vmatmul.mubr.msk.bf16.vlgmr.msra.gmra.mrb[40].mxu1 %vm1837_vm11, %v5975_v3  ;;  %2926 = vmatpush1.bf16.msra.mxu0 %v2891_v8  ;;  %v3064_v3 = vsel %vm1300_vm8, %v3054_v47, %v3060_v53 }
 0x2e6   :  { %2977 = vmatpush1.bf16.msra.mxu1 %v2893_v23  ;;  %2767 = vmatprep.mubr.bf16.mxu0 %v8431_v24  ;;  %v3076_v37 = vmul.f32 %v3066_v61, %v8438_v48 }
 0x2e7   :  { %v2850_v33 = vpop.permute.xlu1 %2849  ;;  %2818 = vmatprep.mubr.bf16.mxu1 %v8431_v24 }
 0x2e8   :  { %v2868_v57 = vsel %vm1112_vm7, %v2850_v33, %v7205_v20  ;;  %v2871_v10 = vsel %vm1112_vm7, %v7186_v0, %v2850_v33  ;;  %v3058_v49 = vpop.permute.xlu0 %3057 }
 0x2e9   :  { %v2883_v11 = vmul.f32 %v2871_v10, %v8436_v32  ;;  %v2884_v56 = vmul.f32 %v2868_v57, %v8434_v35  ;;  %v3072_v2 = vsel %vm1300_vm8, %v3058_v49, %v3040_v46  ;;  %v3063_v44 = vsel %vm1300_vm8, %v3052_v9, %v3058_v49  ;;  %v8441_v9 = vld [vmem:[#allocation16_spill] sm:$0xff] }
 0x2ea   :  { %v3092_v46 = vpack.c.bf16 %v3080_v41, %v3076_v37  ;;  %v3078_v26 = vmul.f32 %v3072_v2, %v8439_v6  ;;  %v3077_v61 = vmul.f32 %v3063_v44, %v8441_v9  ;;  %v3081_v33 = vmul.f32 %v3064_v3, %v8441_v9  ;;  %v5978_v2 = vld [vmem:[%s8351_s4 + $0x50] ss:$0 sps:$4 sm:$0xff]  }
 0x2eb   :  { %v2895_v42 = vpack.c.bf16 %v2883_v11, %v2883_v11  ;;  %v2896_v60 = vpack.c.bf16 %v2884_v56, %v2884_v56  ;;  %v2862_v25 = vpop.permute.xlu1 %2861 }
 0x2ec   :  { %v2865_v15 = vsel %vm1112_vm7, %v7205_v20, %v2862_v25  ;;  %v2874_v59 = vsel %vm1112_vm7, %v2862_v25, %v7186_v0  ;;  %v3044_v50 = vpop.permute.xlu0 %3043  ;;  %5537 = vmatmul.mubr.msk.bf16.gmra.mrb[64].mxu0 %vm1837_vm11, %v5976_v62  ;;  %v3070_v0 = vsel %vm1300_vm8, %v7168_v13, %v7182_v31  ;;  %v5977_v31 = vld [vmem:[%s8351_s4 + $0x48] sm:$0xff]   ;;  %v3094_v36 = vpack.c.bf16 %v3082_v19, %v3078_v26 }
 0x2ed   :  { %v2885_v1 = vmul.f32 %v2865_v15, %v8437_v12  ;;  %v2886_v16 = vmul.f32 %v2874_v59, %v8435_v39  ;;  %5540 = vmatmul.mubr.msk.bf16.gmra.mrb[64].mxu1 %vm1837_vm11, %v5976_v62  ;;  %5546 = vmatprep.subr.msk.bf16.mxu0 %vm1844_vm10, %v2896_v60  ;;  %v2914_v20 = vsel %vm1844_vm10, %v2895_v42, 0  ;;  %v3079_v47 = vmul.f32 %v3070_v0, %v8440_v40  ;;  %v8442_v19 = vld [vmem:[#allocation19_spill] sm:$0xff] }
 0x2ee   :  { %2928 = vmatpush1.bf16.msra.mxu0 %v2914_v20  ;;  %2957 = vmatprep.mubr.bf16.mxu0 %v8431_v24  ;;  %v3093_v10 = vpack.c.bf16 %v3081_v33, %v3077_v61 }
 0x2ef   :  { %v2897_v34 = vpack.c.bf16 %v2885_v1, %v2885_v1  ;;  %v2898_v8 = vpack.c.bf16 %v2886_v16, %v2886_v16  ;;  %v7309_v23 = vpop.permute.xlu1 %3241  ;;  %3125 = vmatprep.subr.bf16.mxu0 %v3092_v46  ;;  %3008 = vmatprep.mubr.bf16.mxu1 %v8431_v24  ;;  %v3091_v37 = vpack.c.bf16 %v3079_v47, %v3075_v58 }
 0x2f0   :  { %v3056_v13 = vpop.permute.xlu0 %3055 }
 0x2f1   :  { %5549 = vmatprep.subr.msk.bf16.mxu1 %vm1844_vm10, %v2898_v8  ;;  %v2920_v53 = vsel %vm1844_vm10, %v2897_v34, 0 }
 0x2f2   :  { %2979 = vmatpush1.bf16.msra.mxu1 %v2920_v53 }
 0x2f3   :  { %3176 = vmatprep.subr.bf16.mxu1 %v3094_v36  ;;  %v3248_v57 = vpop.permute.xlu1 %3247 }
 0x2f4   :  { %v3240_v49 = vpop.permute.xlu0 %3239  ;;  %5547 = vmatmul.mubr.msk.bf16.vlgmr.msra.gmra.mrb[40].mxu0 %vm1837_vm11, %v5977_v31 }
 0x2f5   :  { %5550 = vmatmul.mubr.msk.bf16.vlgmr.msra.gmra.mrb[40].mxu1 %vm1837_vm11, %v5977_v31  ;;  %3126 = vmatpush1.bf16.msra.mxu0 %v3091_v37  ;;  %v8443_v31 = vld [vmem:[#allocation18_spill] sm:$0xff] }
 0x2f6   :  { %3177 = vmatpush1.bf16.msra.mxu1 %v3093_v10  ;;  %2967 = vmatprep.mubr.bf16.mxu0 %v8431_v24 }
 0x2f7   :  { %v3050_v62 = vpop.permute.xlu1 %3049  ;;  %3018 = vmatprep.mubr.bf16.mxu1 %v8431_v24 }
 0x2f8   :  { %v3068_v11 = vsel %vm1300_vm8, %v3050_v62, %v3056_v13  ;;  %v3071_v56 = vsel %vm1300_vm8, %v3044_v50, %v3050_v62  ;;  %v3246_v41 = vpop.permute.xlu0 %3245 }
 0x2f9   :  { %v3083_v4 = vmul.f32 %v3071_v56, %v8440_v40  ;;  %v3084_v30 = vmul.f32 %v3068_v11, %v8438_v48  ;;  %v3269_v46 = vsel %vm1488_vm9, %v3240_v49, %v3246_v41  ;;  %v8444_v56 = vld [vmem:[#allocation20_spill] sm:$0xff] }
 0x2fa   :  { %v3275_v34 = vmul.f32 %v3269_v46, %v8442_v19  ;;  %v5980_v46 = vld [vmem:[%s8351_s4 + $0x5c] ss:$0 sps:$4 sm:$0xff]  }
 0x2fb   :  { %v3095_v42 = vpack.c.bf16 %v3083_v4, %v3083_v4  ;;  %v3096_v60 = vpack.c.bf16 %v3084_v30, %v3084_v30  ;;  %v3062_v25 = vpop.permute.xlu1 %3061 }
 0x2fc   :  { %v3065_v44 = vsel %vm1300_vm8, %v3056_v13, %v3062_v25  ;;  %v3074_v15 = vsel %vm1300_vm8, %v3062_v25, %v3044_v50  ;;  %v3252_v59 = vpop.permute.xlu0 %3251  ;;  %5548 = vmatmul.mubr.msk.bf16.gmra.mrb[68].mxu0 %vm1837_vm11, %v5978_v2  ;;  %v3270_v50 = vsel %vm1488_vm9, %v7309_v23, %v3248_v57  ;;  %v5979_v13 = vld [vmem:[%s8351_s4 + $0x54] sm:$0xff]  }
 0x2fd   :  { %v3085_v26 = vmul.f32 %v3065_v44, %v8441_v9  ;;  %v3086_v1 = vmul.f32 %v3074_v15, %v8439_v6  ;;  %5551 = vmatmul.mubr.msk.bf16.gmra.mrb[68].mxu1 %vm1837_vm11, %v5978_v2  ;;  %5557 = vmatprep.subr.msk.bf16.mxu0 %vm1844_vm10, %v3096_v60  ;;  %v3114_v16 = vsel %vm1844_vm10, %v3095_v42, 0  ;;  %v3266_v20 = vsel %vm1488_vm9, %v3246_v41, %v3252_v59  ;;  %v8445_v42 = vld [vmem:[#allocation17_spill] sm:$0xff] }
 0x2fe   :  { %3128 = vmatpush1.bf16.msra.mxu0 %v3114_v16  ;;  %3157 = vmatprep.mubr.bf16.mxu0 %v8431_v24  ;;  %v3276_v47 = vmul.f32 %v3266_v20, %v8443_v31  ;;  %v3279_v37 = vmul.f32 %v3270_v50, %v8442_v19 }
 0x2ff   :  { %v3097_v0 = vpack.c.bf16 %v3085_v26, %v3085_v26  ;;  %v3098_v58 = vpack.c.bf16 %v3086_v1, %v3086_v1  ;;  %v3254_v3 = vpop.permute.xlu1 %3253  ;;  %3208 = vmatprep.mubr.bf16.mxu1 %v8431_v24 }
 0x300   :  { %v3267_v8 = vsel %vm1488_vm9, %v3248_v57, %v3254_v3  ;;  %v3258_v61 = vpop.permute.xlu0 %3257  ;;  %v3291_v11 = vpack.c.bf16 %v3279_v37, %v3275_v34  ;;  %v5982_v37 = vld [vmem:[%s8351_s4 + $0x68] ss:$0 sps:$4 sm:$0xff]  }
 0x301   :  { %v3280_v53 = vmul.f32 %v3267_v8, %v8443_v31  ;;  %v3263_v36 = vsel %vm1488_vm9, %v3252_v59, %v3258_v61  ;;  %5560 = vmatprep.subr.msk.bf16.mxu1 %vm1844_vm10, %v3098_v58  ;;  %v3120_v33 = vsel %vm1844_vm10, %v3097_v0, 0  ;;  %v3272_v57 = vsel %vm1488_vm9, %v3258_v61, %v3240_v49 }
 0x302   :  { %3179 = vmatpush1.bf16.msra.mxu1 %v3120_v33  ;;  %v3277_v41 = vmul.f32 %v3263_v36, %v8444_v56  ;;  %v3278_v60 = vmul.f32 %v3272_v57, %v8445_v42  ;;  %v5981_v36 = vld [vmem:[%s8351_s4 + $0x60] sm:$0xff]  }
 0x303   :  { %v3260_v10 = vpop.permute.xlu1 %3259  ;;  %v3292_v62 = vpack.c.bf16 %v3280_v53, %v3276_v47 }
 0x304   :  { %v3264_v2 = vsel %vm1488_vm9, %v3254_v3, %v3260_v10  ;;  %v3273_v4 = vsel %vm1488_vm9, %v3260_v10, %v7309_v23  ;;  %v3244_v30 = vpop.permute.xlu0 %3243  ;;  %5558 = vmatmul.mubr.msk.bf16.vlgmr.msra.gmra.mrb[40].mxu0 %vm1837_vm11, %v5979_v13 }
 0x305   :  { %v3281_v49 = vmul.f32 %v3264_v2, %v8444_v56  ;;  %v3282_v25 = vmul.f32 %v3273_v4, %v8445_v42  ;;  %5561 = vmatmul.mubr.msk.bf16.vlgmr.msra.gmra.mrb[40].mxu1 %vm1837_vm11, %v5979_v13  ;;  %3325 = vmatprep.subr.bf16.mxu0 %v3292_v62 }
 0x306   :  { %3326 = vmatpush1.bf16.msra.mxu0 %v3291_v11  ;;  %3167 = vmatprep.mubr.bf16.mxu0 %v8431_v24 }
 0x307   :  { %v3293_v44 = vpack.c.bf16 %v3281_v49, %v3277_v41  ;;  %v3250_v15 = vpop.permute.xlu1 %3249  ;;  %v3294_v59 = vpack.c.bf16 %v3282_v25, %v3278_v60  ;;  %3218 = vmatprep.mubr.bf16.mxu1 %v8431_v24 }
 0x308   :  { %v3271_v23 = vsel %vm1488_vm9, %v3244_v30, %v3250_v15 }
 0x309   :  { %v3283_v26 = vmul.f32 %v3271_v23, %v8442_v19  ;;  %v3256_v1 = vpop.permute.xlu0 %3255  ;;  %3376 = vmatprep.subr.bf16.mxu1 %v3294_v59 }
 0x30a   :  { %v3268_v16 = vsel %vm1488_vm9, %v3250_v15, %v3256_v1  ;;  %3377 = vmatpush1.bf16.msra.mxu1 %v3293_v44 }
 0x30b   :  { %v3295_v20 = vpack.c.bf16 %v3283_v26, %v3283_v26  ;;  %v3284_v50 = vmul.f32 %v3268_v16, %v8443_v31  ;;  %v3262_v0 = vpop.permute.xlu1 %3261 }
 0x30c   :  { %v3265_v58 = vsel %vm1488_vm9, %v3256_v1, %v3262_v0  ;;  %v3274_v3 = vsel %vm1488_vm9, %v3262_v0, %v3244_v30  ;;  %5559 = vmatmul.mubr.msk.bf16.gmra.mrb[72].mxu0 %vm1837_vm11, %v5980_v46 }
 0x30d   :  { %v3296_v34 = vpack.c.bf16 %v3284_v50, %v3284_v50  ;;  %v3285_v8 = vmul.f32 %v3265_v58, %v8444_v56  ;;  %v3286_v61 = vmul.f32 %v3274_v3, %v8445_v42  ;;  %5562 = vmatmul.mubr.msk.bf16.gmra.mrb[72].mxu1 %vm1837_vm11, %v5980_v46  ;;  %3357 = vmatprep.mubr.bf16.mxu0 %v8431_v24  ;;  %v3314_v53 = vsel %vm1844_vm10, %v3295_v20, 0 }
 0x30e   :  { %3408 = vmatprep.mubr.bf16.mxu1 %v8431_v24 }
 0x30f   :  { %v3297_v13 = vpack.c.bf16 %v3285_v8, %v3285_v8  ;;  %v3298_v47 = vpack.c.bf16 %v3286_v61, %v3286_v61  ;;  %5568 = vmatprep.subr.msk.bf16.mxu0 %vm1844_vm10, %v3296_v34 }
 0x310   :  { %3328 = vmatpush1.bf16.msra.mxu0 %v3314_v53 }
 0x311   :  { %5571 = vmatprep.subr.msk.bf16.mxu1 %vm1844_vm10, %v3298_v47  ;;  %v3320_v33 = vsel %vm1844_vm10, %v3297_v13, 0 }
 0x312   :  { %3379 = vmatpush1.bf16.msra.mxu1 %v3320_v33 }
 0x314   :  { %5569 = vmatmul.mubr.msk.bf16.vlgmr.msra.gmra.mrb[40].mxu0 %vm1837_vm11, %v5981_v36 }
 0x315   :  { %5572 = vmatmul.mubr.msk.bf16.vlgmr.msra.gmra.mrb[40].mxu1 %vm1837_vm11, %v5981_v36  ;;  %3367 = vmatprep.mubr.bf16.mxu0 %v8431_v24 }
 0x316   :  { %3418 = vmatprep.mubr.bf16.mxu1 %v8431_v24 }
 0x31c   :  { %5570 = vmatmul.mubr.msk.bf16.gmra.mrb[76].mxu0 %vm1837_vm11, %v5982_v37 }
 0x31d   :  { %5573 = vmatmul.mubr.msk.bf16.gmra.mrb[76].mxu1 %vm1837_vm11, %v5982_v37  ;;  %3662 = vmatprep.mubr.bf16.mxu0 %v8431_v24 }
 0x31e   :  { %3715 = vmatprep.mubr.bf16.mxu1 %v8431_v24 }
 0x36f   :  { %v1901_v57 = vpop.f32.mrb[44].mxu0 }
 0x370   :  { %v1903_v10 = vpop.f32.mrb[45].mxu0  ;;  %v1952_v62 = vpop.f32.mrb[44].mxu1 }
 0x371   :  { %v1905_v11 = vpop.f32.mrb[46].mxu0  ;;  %v1954_v41 = vpop.f32.mrb[45].mxu1 }
 0x372   :  { %v1906_v2 = vpop.f32.mrb[47].mxu0  ;;  %v1956_v4 = vpop.f32.mrb[46].mxu1 }
 0x373   :  { %v1957_v30 = vpop.f32.mrb[47].mxu1 }
 0x37f   :  { %v2029_v60 = vpop.f32.mrb[48].mxu0 }
 0x380   :  { %v2030_v49 = vadd.f32 %v2029_v60, %v1901_v57  ;;  %v2080_v25 = vpop.f32.mrb[48].mxu1  ;;  %v2031_v44 = vpop.f32.mrb[49].mxu0 }
 0x381   :  { %v2081_v15 = vadd.f32 %v2080_v25, %v1952_v62  ;;  %v2032_v59 = vadd.f32 %v2031_v44, %v1903_v10  ;;  %v2082_v23 = vpop.f32.mrb[49].mxu1  ;;  %v2033_v46 = vpop.f32.mrb[50].mxu0 }
 0x382   :  { %v2083_v26 = vadd.f32 %v2082_v23, %v1954_v41  ;;  %v2034_v1 = vpop.f32.mrb[51].mxu0  ;;  %v2084_v16 = vpop.f32.mrb[50].mxu1 }
 0x383   :  { %v2085_v20 = vpop.f32.mrb[51].mxu1 }
 0x38f   :  { %v2217_v50 = vpop.f32.mrb[52].mxu0 }
 0x390   :  { %v2283_v0 = vadd.f32 %v2217_v50, %v2030_v49  ;;  %v2268_v58 = vpop.f32.mrb[52].mxu1  ;;  %v2219_v3 = vpop.f32.mrb[53].mxu0 }
 0x391   :  { %v2285_v34 = vadd.f32 %v2268_v58, %v2081_v15  ;;  %v2284_v8 = vadd.f32 %v2219_v3, %v2032_v59  ;;  %v2270_v61 = vpop.f32.mrb[53].mxu1  ;;  %v2221_v13 = vpop.f32.mrb[54].mxu0 }
 0x392   :  { %v2286_v47 = vadd.f32 %v2270_v61, %v2083_v26  ;;  %v2222_v53 = vpop.f32.mrb[55].mxu0  ;;  %v2272_v36 = vpop.f32.mrb[54].mxu1 }
 0x393   :  { %v2273_v33 = vpop.f32.mrb[55].mxu1 }
 0x39f   :  { %v2417_v37 = vpop.f32.mrb[56].mxu0 }
 0x3a0   :  { %v2483_v57 = vadd.f32 %v2417_v37, %v2283_v0  ;;  %v2468_v10 = vpop.f32.mrb[56].mxu1  ;;  %v2419_v62 = vpop.f32.mrb[57].mxu0 }
 0x3a1   :  { %v2485_v11 = vadd.f32 %v2468_v10, %v2285_v34  ;;  %v2484_v41 = vadd.f32 %v2419_v62, %v2284_v8  ;;  %v2470_v2 = vpop.f32.mrb[57].mxu1  ;;  %v2421_v4 = vpop.f32.mrb[58].mxu0 }
 0x3a2   :  { %v2486_v30 = vadd.f32 %v2470_v2, %v2286_v47  ;;  %v2422_v60 = vpop.f32.mrb[59].mxu0  ;;  %v2472_v49 = vpop.f32.mrb[58].mxu1 }
 0x3a3   :  { %v2473_v25 = vpop.f32.mrb[59].mxu1 }
 0x3af   :  { %v2569_v44 = vpop.f32.mrb[60].mxu0 }
 0x3b0   :  { %v2635_v15 = vadd.f32 %v2569_v44, %v2483_v57  ;;  %v2620_v59 = vpop.f32.mrb[60].mxu1  ;;  %v2571_v23 = vpop.f32.mrb[61].mxu0 }
 0x3b1   :  { %v2637_v46 = vadd.f32 %v2620_v59, %v2485_v11  ;;  %v2636_v26 = vadd.f32 %v2571_v23, %v2484_v41  ;;  %v2622_v1 = vpop.f32.mrb[61].mxu1  ;;  %v2573_v16 = vpop.f32.mrb[62].mxu0 }
 0x3b2   :  { %v2638_v20 = vadd.f32 %v2622_v1, %v2486_v30  ;;  %v2574_v50 = vpop.f32.mrb[63].mxu0  ;;  %v2624_v0 = vpop.f32.mrb[62].mxu1 }
 0x3b3   :  { %v2625_v58 = vpop.f32.mrb[63].mxu1 }
 0x3bf   :  { %v2769_v3 = vpop.f32.mrb[64].mxu0 }
 0x3c0   :  { %v2835_v34 = vadd.f32 %v2769_v3, %v2635_v15  ;;  %v2820_v8 = vpop.f32.mrb[64].mxu1  ;;  %v2771_v61 = vpop.f32.mrb[65].mxu0 }
 0x3c1   :  { %v2837_v13 = vadd.f32 %v2820_v8, %v2637_v46  ;;  %v2836_v47 = vadd.f32 %v2771_v61, %v2636_v26  ;;  %v2822_v53 = vpop.f32.mrb[65].mxu1  ;;  %v2773_v36 = vpop.f32.mrb[66].mxu0 }
 0x3c2   :  { %v2838_v33 = vadd.f32 %v2822_v53, %v2638_v20  ;;  %v2774_v37 = vpop.f32.mrb[67].mxu0  ;;  %v2824_v57 = vpop.f32.mrb[66].mxu1 }
 0x3c3   :  { %v2825_v10 = vpop.f32.mrb[67].mxu1  ;;  %v3445_v61 = vpop.permute.xlu0 %3444 }
 0x3cf   :  { %v2969_v62 = vpop.f32.mrb[68].mxu0 }
 0x3d0   :  { %v3035_v11 = vadd.f32 %v2969_v62, %v2835_v34  ;;  %v3020_v41 = vpop.f32.mrb[68].mxu1  ;;  %v2971_v2 = vpop.f32.mrb[69].mxu0 }
 0x3d1   :  { %v3037_v4 = vadd.f32 %v3020_v41, %v2837_v13  ;;  %v3036_v30 = vadd.f32 %v2971_v2, %v2836_v47  ;;  %v3022_v60 = vpop.f32.mrb[69].mxu1  ;;  %v2973_v49 = vpop.f32.mrb[70].mxu0 }
 0x3d2   :  { %v3038_v25 = vadd.f32 %v3022_v60, %v2838_v33  ;;  %v2974_v44 = vpop.f32.mrb[71].mxu0  ;;  %v3024_v15 = vpop.f32.mrb[70].mxu1 }
 0x3d3   :  { %v3025_v59 = vpop.f32.mrb[71].mxu1  ;;  %v3450_v13 = vpop.permute.xlu1 %3449 }
 0x3df   :  { %v3169_v23 = vpop.f32.mrb[72].mxu0 }
 0x3e0   :  { %v3235_v46 = vadd.f32 %v3169_v23, %v3035_v11  ;;  %v3220_v26 = vpop.f32.mrb[72].mxu1  ;;  %v3171_v1 = vpop.f32.mrb[73].mxu0 }
 0x3e1   :  { %v3237_v16 = vadd.f32 %v3220_v26, %v3037_v4  ;;  %v3236_v20 = vadd.f32 %v3171_v1, %v3036_v30  ;;  %v3222_v50 = vpop.f32.mrb[73].mxu1  ;;  %v3173_v0 = vpop.f32.mrb[74].mxu0 }
 0x3e2   :  { %v3238_v58 = vadd.f32 %v3222_v50, %v3038_v25  ;;  %v3174_v3 = vpop.f32.mrb[75].mxu0  ;;  %v3224_v34 = vpop.f32.mrb[74].mxu1 }
 0x3e3   :  { %v3225_v8 = vpop.f32.mrb[75].mxu1 }
 0x3e7   :  { %v3359_v47 = vpop.f32.mrb[40].mxu0 }
 0x3e8   :  { %v3457_v53 = vadd.f32 %v3445_v61, %v3359_v47  ;;  %v3410_v36 = vpop.f32.mrb[40].mxu1  ;;  %v3361_v33 = vpop.f32.mrb[41].mxu0 }
 0x3e9   :  { %v3412_v37 = vpop.f32.mrb[41].mxu1  ;;  %v3363_v57 = vpop.f32.mrb[42].mxu0  ;;  %v3459_v62 = vadd.f32 %v3445_v61, %v3410_v36 }
 0x3ea   :  { %v7417_v10 = vmax.f32 %v3457_v53, 0.0  ;;  %v3461_v11 = vadd.f32 %v3450_v13, %v3363_v57  ;;  %v3414_v41 = vpop.f32.mrb[42].mxu1  ;;  %v3365_v2 = vpop.f32.mrb[43].mxu0 }
 0x3eb   :  { %v3416_v4 = vpop.f32.mrb[43].mxu1  ;;  %v3463_v60 = vadd.f32 %v3450_v13, %v3414_v41  ;;  %v7423_v49 = vmax.f32 %v3459_v62, 0.0 }
 0x3ec   :  { %v7419_v30 = vmax.f32 %v3461_v11, 0.0  ;;  %3541 = vrot.lane.b32.xlu1 %v7417_v10, %s6002_s9  ;;  %v3464_v36 = vadd.f32 %v3450_v13, %v3416_v4 }
 0x3ed   :  { %8447 = vst [vmem:[#allocation22_spill] sm:$0xff] %v7423_v49  ;;  %v7427_v44 = vmax.f32 %v3463_v60, 0.0 }
 0x3ee   :  { %8446 = vst [vmem:[#allocation21_spill] sm:$0xff] %v7419_v30  ;;  %3543 = vrot.lane.b32.xlu0 %v7419_v30, %s6002_s9  ;;  %v7463_v57 = vmax.f32 %v3464_v36, 0.0 }
 0x3ef   :  { %v3369_v25 = vpop.f32.mrb[76].mxu0 }
 0x3f0   :  { %v3435_v15 = vadd.f32 %v3369_v25, %v3235_v46  ;;  %v3420_v59 = vpop.f32.mrb[76].mxu1  ;;  %3553 = vrot.lane.b32.xlu1 %v7423_v49, %s6002_s9  ;;  %v3371_v23 = vpop.f32.mrb[77].mxu0  ;;  %v3458_v46 = vadd.f32 %v3445_v61, %v3361_v33 }
 0x3f1   :  { %v3437_v26 = vadd.f32 %v3420_v59, %v3237_v16  ;;  %v3422_v1 = vpop.f32.mrb[77].mxu1  ;;  %v3436_v50 = vadd.f32 %v3371_v23, %v3236_v20  ;;  %v3373_v0 = vpop.f32.mrb[78].mxu0  ;;  %v3462_v16 = vadd.f32 %v3450_v13, %v3365_v2 }
 0x3f2   :  { %v3438_v3 = vadd.f32 %v3422_v1, %v3238_v58  ;;  %3555 = vrot.lane.b32.xlu0 %v7427_v44, %s6002_s9  ;;  %v3374_v34 = vpop.f32.mrb[79].mxu0  ;;  %v3424_v8 = vpop.f32.mrb[78].mxu1  ;;  %v7451_v20 = vmax.f32 %v3458_v46, 0.0  ;;  %v3460_v58 = vadd.f32 %v3445_v61, %v3412_v37 }
 0x3f3   :  { %v3425_v47 = vpop.f32.mrb[79].mxu1  ;;  %v7455_v53 = vmax.f32 %v3462_v16, 0.0  ;;  %v3455_v61 = vpop.permute.xlu0 %3454 }
 0x3f4   :  { %3481 = vrot.lane.b32.xlu1 %v7417_v10, %s6003_s0  ;;  %v7459_v33 = vmax.f32 %v3460_v58, 0.0  ;;  %v3465_v13 = vadd.f32 %v3455_v61, %v3435_v15  ;;  %v3466_v37 = vadd.f32 %v3455_v61, %v3436_v50  ;;  %v3467_v11 = vadd.f32 %v3455_v61, %v3437_v26 }
 0x3f5   :  { %v3468_v41 = vadd.f32 %v3455_v61, %v3438_v3 }
 0x3f6   :  { %3483 = vrot.lane.b32.xlu0 %v7419_v30, %s6003_s0  ;;  %v7487_v62 = vmax.f32 %v3465_v13, 0.0  ;;  %v7491_v2 = vmax.f32 %v3466_v37, 0.0  ;;  %v7495_v4 = vmax.f32 %v3467_v11, 0.0  ;;  %v8448_v37 = vld [vmem:[#allocation2_spill] sm:$0xff] }
 0x3f7   :  { %v7497_v60 = vmax.f32 %v3468_v41, 0.0 }
 0x3f8   :  { %3493 = vrot.lane.b32.xlu1 %v7423_v49, %s6003_s0 }
 0x3fa   :  { %3495 = vrot.lane.b32.xlu0 %v7427_v44, %s6003_s0 }
 0x3fc   :  { %3870 = vrot.lane.b32.xlu1 %v7417_v10, %s6004_s10 }
 0x3fe   :  { %3872 = vrot.lane.b32.xlu0 %v7419_v30, %s6004_s10 }
 0x400   :  { %3882 = vrot.lane.b32.xlu1 %v7423_v49, %s6004_s10 }
 0x402   :  { %3884 = vrot.lane.b32.xlu0 %v7427_v44, %s6004_s10 }
 0x404   :  { %4081 = vrot.lane.b32.xlu1 %v7417_v10, %s6005_s11 }
 0x406   :  { %4083 = vrot.lane.b32.xlu0 %v7419_v30, %s6005_s11 }
 0x408   :  { %3547 = vrot.lane.b32.xlu1 %v7451_v20, %s6002_s9 }
 0x40a   :  { %3549 = vrot.lane.b32.xlu0 %v7455_v53, %s6002_s9 }
 0x40c   :  { %3559 = vrot.lane.b32.xlu1 %v7459_v33, %s6002_s9 }
 0x40e   :  { %3561 = vrot.lane.b32.xlu0 %v7463_v57, %s6002_s9 }
 0x410   :  { %3487 = vrot.lane.b32.xlu1 %v7451_v20, %s6003_s0 }
 0x412   :  { %3489 = vrot.lane.b32.xlu0 %v7455_v53, %s6003_s0 }
 0x414   :  { %3499 = vrot.lane.b32.xlu1 %v7459_v33, %s6003_s0 }
 0x416   :  { %3501 = vrot.lane.b32.xlu0 %v7463_v57, %s6003_s0 }
 0x418   :  { %3876 = vrot.lane.b32.xlu1 %v7451_v20, %s6004_s10 }
 0x41a   :  { %3878 = vrot.lane.b32.xlu0 %v7455_v53, %s6004_s10 }
 0x41c   :  { %3888 = vrot.lane.b32.xlu1 %v7459_v33, %s6004_s10 }
 0x41e   :  { %3890 = vrot.lane.b32.xlu0 %v7463_v57, %s6004_s10 }
 0x420   :  { %4087 = vrot.lane.b32.xlu1 %v7451_v20, %s6005_s11 }
 0x422   :  { %4089 = vrot.lane.b32.xlu0 %v7455_v53, %s6005_s11 }
 0x424   :  { %3545 = vrot.lane.b32.xlu1 %v7487_v62, %s6002_s9 }
 0x426   :  { %3551 = vrot.lane.b32.xlu0 %v7491_v2, %s6002_s9 }
 0x428   :  { %3557 = vrot.lane.b32.xlu1 %v7495_v4, %s6002_s9 }
 0x42a   :  { %3563 = vrot.lane.b32.xlu0 %v7497_v60, %s6002_s9 }
 0x42c   :  { %4093 = vrot.lane.b32.xlu1 %v7423_v49, %s6005_s11 }
 0x42e   :  { %4095 = vrot.lane.b32.xlu0 %v7427_v44, %s6005_s11 }
 0x430   :  { %3485 = vrot.lane.b32.xlu1 %v7487_v62, %s6003_s0 }
 0x432   :  { %4101 = vrot.lane.b32.xlu0 %v7463_v57, %s6005_s11 }
 0x434   :  { %3497 = vrot.lane.b32.xlu1 %v7495_v4, %s6003_s0 }
 0x436   :  { %3491 = vrot.lane.b32.xlu0 %v7491_v2, %s6003_s0 }
 0x438   :  { %3874 = vrot.lane.b32.xlu1 %v7487_v62, %s6004_s10 }
 0x43a   :  { %3503 = vrot.lane.b32.xlu0 %v7497_v60, %s6003_s0 }
 0x43c   :  { %3886 = vrot.lane.b32.xlu1 %v7495_v4, %s6004_s10 }
 0x43e   :  { %4457 = vrot.lane.b32.xlu0 %v7419_v30, %s6006_s12 }
 0x440   :  { %4099 = vrot.lane.b32.xlu1 %v7459_v33, %s6005_s11 }
 0x442   :  { %4463 = vrot.lane.b32.xlu0 %v7455_v53, %s6006_s12 }
 0x444   :  { %4085 = vrot.lane.b32.xlu1 %v7487_v62, %s6005_s11 }
 0x446   :  { %3880 = vrot.lane.b32.xlu0 %v7491_v2, %s6004_s10 }
 0x448   :  { %4097 = vrot.lane.b32.xlu1 %v7495_v4, %s6005_s11 }
 0x44a   :  { %3892 = vrot.lane.b32.xlu0 %v7497_v60, %s6004_s10 }
 0x44c   :  { %4455 = vrot.lane.b32.xlu1 %v7417_v10, %s6006_s12 }
 0x44e   :  { %4469 = vrot.lane.b32.xlu0 %v7427_v44, %s6006_s12 }
 0x450   :  { %4461 = vrot.lane.b32.xlu1 %v7451_v20, %s6006_s12 }
 0x452   :  { %4475 = vrot.lane.b32.xlu0 %v7463_v57, %s6006_s12 }
 0x454   :  { %4467 = vrot.lane.b32.xlu1 %v7423_v49, %s6006_s12 }
 0x456   :  { %4091 = vrot.lane.b32.xlu0 %v7491_v2, %s6005_s11 }
 0x458   :  { %4473 = vrot.lane.b32.xlu1 %v7459_v33, %s6006_s12 }
 0x45a   :  { %4103 = vrot.lane.b32.xlu0 %v7497_v60, %s6005_s11 }
 0x45c   :  { %4459 = vrot.lane.b32.xlu1 %v7487_v62, %s6006_s12 }
 0x45e   :  { %v3542_v25 = vpop.permute.xlu1 %3541  ;;  %4668 = vrot.lane.b32.xlu0 %v7419_v30, %s6007_s13 }
 0x460   :  { %v3544_v15 = vpop.permute.xlu0 %3543  ;;  %4471 = vrot.lane.b32.xlu1 %v7495_v4, %s6006_s12 }
 0x462   :  { %v3554_v59 = vpop.permute.xlu1 %3553  ;;  %4674 = vrot.lane.b32.xlu0 %v7455_v53, %s6007_s13 }
 0x464   :  { %v3556_v23 = vpop.permute.xlu0 %3555  ;;  %4666 = vrot.lane.b32.xlu1 %v7417_v10, %s6007_s13 }
 0x466   :  { %v7563_v26 = vpop.permute.xlu1 %3481  ;;  %4680 = vrot.lane.b32.xlu0 %v7427_v44, %s6007_s13 }
 0x468   :  { %v7567_v1 = vpop.permute.xlu0 %3483  ;;  %4672 = vrot.lane.b32.xlu1 %v7451_v20, %s6007_s13 }
 0x46a   :  { %v7571_v50 = vpop.permute.xlu1 %3493  ;;  %4686 = vrot.lane.b32.xlu0 %v7463_v57, %s6007_s13 }
 0x46c   :  { %v7575_v0 = vpop.permute.xlu0 %3495  ;;  %4678 = vrot.lane.b32.xlu1 %v7423_v49, %s6007_s13 }
 0x46e   :  { %v7579_v3 = vpop.permute.xlu1 %3870  ;;  %4879 = vrot.lane.b32.xlu0 %v7419_v30, %s6008_s14 }
 0x470   :  { %v7583_v34 = vpop.permute.xlu0 %3872  ;;  %4684 = vrot.lane.b32.xlu1 %v7459_v33, %s6007_s13 }
 0x472   :  { %v7587_v8 = vpop.permute.xlu1 %3882  ;;  %4885 = vrot.lane.b32.xlu0 %v7455_v53, %s6008_s14 }
 0x474   :  { %v7591_v47 = vpop.permute.xlu0 %3884  ;;  %4670 = vrot.lane.b32.xlu1 %v7487_v62, %s6007_s13 }
 0x476   :  { %v7595_v46 = vpop.permute.xlu1 %4081  ;;  %4465 = vrot.lane.b32.xlu0 %v7491_v2, %s6006_s12 }
 0x478   :  { %v7599_v16 = vpop.permute.xlu0 %4083  ;;  %4682 = vrot.lane.b32.xlu1 %v7495_v4, %s6007_s13 }
 0x47a   :  { %v3548_v58 = vpop.permute.xlu1 %3547  ;;  %4477 = vrot.lane.b32.xlu0 %v7497_v60, %s6006_s12 }
 0x47b   :  { %v3571_v36 = vsel %vm94_vm0, %v3542_v25, %v3548_v58  ;;  %v3568_v9 = vsel %vm94_vm0, %v3548_v58, %v3554_v59 }
 0x47c   :  { %v3550_v61 = vpop.permute.xlu0 %3549  ;;  %4877 = vrot.lane.b32.xlu1 %v7417_v10, %s6008_s14  ;;  %v3578_v11 = vmul.f32 %v3571_v36, %v8448_v37 }
 0x47d   :  { %v3572_v13 = vsel %vm94_vm0, %v3544_v15, %v3550_v61  ;;  %v3569_v41 = vsel %vm94_vm0, %v3550_v61, %v3556_v23  ;;  %v8449_v61 = vld [vmem:[#allocation3_spill] sm:$0xff] }
 0x47e   :  { %v3582_v42 = vmul.f32 %v3572_v13, %v8448_v37  ;;  %v3560_v56 = vpop.permute.xlu1 %3559  ;;  %4891 = vrot.lane.b32.xlu0 %v7427_v44, %s6008_s14  ;;  %v3583_v13 = vmul.f32 %v3569_v41, %v8449_v61 }
 0x47f   :  { %v3565_v31 = vsel %vm94_vm0, %v3554_v59, %v3560_v56  ;;  %v3574_v19 = vsel %vm94_vm0, %v3560_v56, %v3542_v25 }
 0x480   :  { %v3562_v40 = vpop.permute.xlu0 %3561  ;;  %4883 = vrot.lane.b32.xlu1 %v7451_v20, %s6008_s14  ;;  %v3595_v36 = vpack.c.bf16 %v3582_v42, %v3578_v11  ;;  %v3577_v6 = vmul.f32 %v3574_v19, %v6165_v18  ;;  %v3580_v56 = vmul.f32 %v3565_v31, %v6162_v17  ;;  %v3579_v19 = vmul.f32 %v3568_v9, %v8449_v61 }
 0x481   :  { %v3566_v48 = vsel %vm94_vm0, %v3556_v23, %v3562_v40  ;;  %v3575_v12 = vsel %vm94_vm0, %v3562_v40, %v3544_v15 }
 0x482   :  { %v3581_v25 = vmul.f32 %v3575_v12, %v6165_v18  ;;  %v3584_v59 = vmul.f32 %v3566_v48, %v6162_v17  ;;  %v7634_v58 = vpop.permute.xlu1 %3487  ;;  %3630 = vmatprep.subr.bf16.mxu0 %v3595_v36  ;;  %4897 = vrot.lane.b32.xlu0 %v7463_v57, %s6008_s14  ;;  %v3596_v15 = vpack.c.bf16 %v3583_v13, %v3579_v19 }
 0x484   :  { %v3594_v42 = vpack.c.bf16 %v3581_v25, %v3577_v6  ;;  %v3490_v11 = vpop.permute.xlu0 %3489  ;;  %4889 = vrot.lane.b32.xlu1 %v7423_v49, %s6008_s14  ;;  %v3597_v40 = vpack.c.bf16 %v3584_v59, %v3580_v56 }
 0x485   :  { %v3512_v51 = vsel %vm48_vm1, %v7567_v1, %v3490_v11 }
 0x486   :  { %v7641_v31 = vpop.permute.xlu1 %3499  ;;  %3631 = vmatpush1.bf16.msra.mxu0 %v3594_v42  ;;  %3683 = vmatprep.subr.bf16.mxu1 %v3597_v40 }
 0x487   :  { %4676 = vrot.lane.b32.xlu0 %v7491_v2, %s6007_s13  ;;  %3684 = vmatpush1.bf16.msra.mxu1 %v3596_v15 }
 0x488   :  { %v3502_v12 = vpop.permute.xlu0 %3501  ;;  %4895 = vrot.lane.b32.xlu1 %v7459_v33, %s6008_s14 }
 0x489   :  { %v3506_v32 = vsel %vm48_vm1, %v7575_v0, %v3502_v12 }
 0x48a   :  { %v7647_v48 = vpop.permute.xlu1 %3876 }
 0x48b   :  { %4688 = vrot.lane.b32.xlu0 %v7497_v60, %s6007_s13 }
 0x48c   :  { %v7651_v6 = vpop.permute.xlu0 %3878  ;;  %4881 = vrot.lane.b32.xlu1 %v7487_v62, %s6008_s14 }
 0x48e   :  { %v7655_v9 = vpop.permute.xlu1 %3888 }
 0x48f   :  { %v3903_v23 = vsel %vm400_vm4, %v7655_v9, %v7579_v3  ;;  %5090 = vrot.lane.b32.xlu0 %v7419_v30, %s6009_s15 }
 0x490   :  { %v7663_v41 = vpop.permute.xlu0 %3890  ;;  %4893 = vrot.lane.b32.xlu1 %v7495_v4, %s6008_s14  ;;  %v7672_v13 = vmul.f32 %v3903_v23, %v6232_v63 }
 0x491   :  { %v3904_v36 = vsel %vm400_vm4, %v7663_v41, %v7583_v34 }
 0x492   :  { %v7675_v56 = vmul.f32 %v3904_v36, %v6232_v63  ;;  %v7677_v25 = vpop.permute.xlu1 %4087 }
 0x493   :  { %v4111_v59 = vsel %vm588_vm5, %v7595_v46, %v7677_v25  ;;  %5096 = vrot.lane.b32.xlu0 %v7455_v53, %s6009_s15 }
 0x494   :  { %v7687_v42 = vpop.permute.xlu0 %4089  ;;  %5088 = vrot.lane.b32.xlu1 %v7417_v10, %s6009_s15  ;;  %v7696_v15 = vmul.f32 %v4111_v59, %v6254_v27 }
 0x495   :  { %v4112_v40 = vsel %vm588_vm5, %v7599_v16, %v7687_v42 }
 0x496   :  { %v7699_v23 = vmul.f32 %v4112_v40, %v6254_v27  ;;  %v3546_v36 = vpop.permute.xlu1 %3545 }
 0x497   :  { %4887 = vrot.lane.b32.xlu0 %v7491_v2, %s6008_s14 }
 0x498   :  { %v3552_v19 = vpop.permute.xlu0 %3551  ;;  %5094 = vrot.lane.b32.xlu1 %v7451_v20, %s6009_s15 }
 0x499   :  { %v3573_v39 = vsel %vm94_vm0, %v3546_v36, %v3552_v19 }
 0x49a   :  { %v3586_v59 = vmul.f32 %v3573_v39, %v8448_v37  ;;  %v3558_v35 = vpop.permute.xlu1 %3557  ;;  %v3511_v39 = vsel %vm48_vm1, %v7563_v26, %v7634_v58 }
 0x49b   :  { %4899 = vrot.lane.b32.xlu0 %v7497_v60, %s6008_s14  ;;  %v3570_v40 = vsel %vm94_vm0, %v3552_v19, %v3558_v35 }
 0x49c   :  { %v3599_v21 = vpack.c.bf16 %v3586_v59, %v3586_v59  ;;  %v3587_v28 = vmul.f32 %v3570_v40, %v8449_v61  ;;  %v3564_v29 = vpop.permute.xlu0 %3563  ;;  %5100 = vrot.lane.b32.xlu1 %v7423_v49, %s6009_s15  ;;  %v3509_v59 = vsel %vm48_vm1, %v3490_v11, %v7575_v0  ;;  %v3505_v61 = vsel %vm48_vm1, %v7571_v50, %v7641_v31 }
 0x49d   :  { %v3567_v37 = vsel %vm94_vm0, %v3558_v35, %v3564_v29  ;;  %v3576_v19 = vsel %vm94_vm0, %v3564_v29, %v3546_v36  ;;  %v3522_v35 = vmul.f32 %v3512_v51, %v6172_v22  ;;  %v3515_v29 = vsel %vm48_vm1, %v3502_v12, %v7567_v1 }
 0x49e   :  { %v3585_v40 = vmul.f32 %v3576_v19, %v6165_v18  ;;  %v3588_v49 = vmul.f32 %v3567_v37, %v6162_v17  ;;  %5580 = vmatprep.subr.msk.bf16.mxu0 %vm1844_vm10, %v3599_v21  ;;  %v7741_v30 = vpop.permute.xlu1 %4093  ;;  %v3524_v0 = vmul.f32 %v3506_v32, %v6200_v43  ;;  %v3600_v11 = vpack.c.bf16 %v3587_v28, %v3587_v28  ;;  %v8450_v32 = vld [vmem:[#allocation4_spill] sm:$0xff] }
 0x49f   :  { %5102 = vrot.lane.b32.xlu0 %v7427_v44, %s6009_s15  ;;  %v3508_v17 = vsel %vm48_vm1, %v7634_v58, %v7571_v50  ;;  %v3518_v21 = vmul.f32 %v3511_v39, %v6172_v22  ;;  %v3514_v28 = vsel %vm48_vm1, %v7641_v31, %v7563_v26  ;;  %v3520_v51 = vmul.f32 %v3505_v61, %v6200_v43  ;;  %v5983_v50 = vld [vmem:[%s8353_s6 + $0x10] sm:$0xff]  }
 0x4a0   :  { %v3598_v36 = vpack.c.bf16 %v3585_v40, %v3585_v40  ;;  %v3601_v18 = vpack.c.bf16 %v3588_v49, %v3588_v49  ;;  %v7750_v19 = vpop.permute.xlu0 %4095  ;;  %5106 = vrot.lane.b32.xlu1 %v7459_v33, %s6009_s15  ;;  %v3523_v49 = vmul.f32 %v3509_v59, %v8450_v32  ;;  %v3521_v1 = vmul.f32 %v3515_v29, %v6189_v38 }
 0x4a1   :  { %v3625_v26 = vsel %vm1844_vm10, %v3600_v11, 0  ;;  %v3534_v58 = vpack.c.bf16 %v3522_v35, %v3518_v21  ;;  %v3536_v31 = vpack.c.bf16 %v3524_v0, %v3520_v51  ;;  %v3519_v39 = vmul.f32 %v3508_v17, %v8450_v32  ;;  %v5984_v51 = vld [vmem:[%s8353_s6 + $0x18] sm:$0xff]  }
 0x4a2   :  { %5583 = vmatprep.subr.msk.bf16.mxu1 %vm1844_vm10, %v3601_v18  ;;  %v3486_v12 = vpop.permute.xlu1 %3485  ;;  %v3619_v37 = vsel %vm1844_vm10, %v3598_v36, 0  ;;  %v3517_v59 = vmul.f32 %v3514_v28, %v6189_v38  ;;  %v3901_v18 = vsel %vm400_vm4, %v7583_v34, %v7651_v6  ;;  %v5299_v28 = vld [vmem:[%s8354_s7] sm:$0xff] }
 0x4a3   :  { %5108 = vrot.lane.b32.xlu0 %v7463_v57, %s6009_s15  ;;  %3633 = vmatpush1.bf16.msra.mxu0 %v3619_v37  ;;  %v3535_v40 = vpack.c.bf16 %v3523_v49, %v3519_v39  ;;  %v5300_v37 = vld [vmem:[%s8354_s7 + $0x8] sm:$0xff] }
 0x4a4   :  { %3686 = vmatpush1.bf16.msra.mxu1 %v3625_v26  ;;  %v7776_v61 = vpop.permute.xlu0 %4101  ;;  %5092 = vrot.lane.b32.xlu1 %v7487_v62, %s6009_s15  ;;  %v3533_v29 = vpack.c.bf16 %v3521_v1, %v3517_v59  ;;  %v5301_v59 = vld [vmem:[%s8354_s7 + $0x10] sm:$0xff] }
 0x4a5   :  { %3764 = vmatprep.subr.bf16.mxu0 %v3534_v58  ;;  %3817 = vmatprep.subr.bf16.mxu1 %v3536_v31 }
 0x4a6   :  { %5581 = vmatmul.mubr.msk.bf16.vlgmr.msra.gmra.mrb[80].mxu0 %vm1837_vm11, %v5983_v50  ;;  %v3498_v36 = vpop.permute.xlu1 %3497 }
 0x4a7   :  { %5098 = vrot.lane.b32.xlu0 %v7491_v2, %s6009_s15  ;;  %5584 = vmatmul.mubr.msk.bf16.vlgmr.msra.gmra.mrb[80].mxu1 %vm1837_vm11, %v5983_v50  ;;  %v3900_v50 = vsel %vm400_vm4, %v7579_v3, %v7647_v48 }
 0x4a8   :  { %3765 = vmatpush1.bf16.msra.mxu0 %v3533_v29  ;;  %3818 = vmatpush1.bf16.msra.mxu1 %v3535_v40  ;;  %v3492_v35 = vpop.permute.xlu0 %3491 }
 0x4a9   :  { %v3510_v0 = vsel %vm48_vm1, %v3492_v35, %v3498_v36  ;;  %v3513_v11 = vsel %vm48_vm1, %v3486_v12, %v3492_v35  ;;  %5104 = vrot.lane.b32.xlu1 %v7495_v4, %s6009_s15  ;;  %3672 = vmatprep.mubr.bf16.mxu0 %v8431_v24  ;;  %v5302_v35 = vld [vmem:[%s8354_s7 + $0x18] sm:$0xff] }
 0x4aa   :  { %v3526_v17 = vmul.f32 %v3513_v11, %v6172_v22  ;;  %v7796_v21 = vpop.permute.xlu1 %3874  ;;  %3725 = vmatprep.mubr.bf16.mxu1 %v8431_v24  ;;  %v3527_v49 = vmul.f32 %v3510_v0, %v8450_v32  ;;  %v3895_v22 = vsel %vm400_vm4, %v7591_v47, %v7663_v41  ;;  %v3911_v32 = vmul.f32 %v3901_v18, %v6215_v52 }
 0x4ab   :  { %5110 = vrot.lane.b32.xlu0 %v7497_v60, %s6009_s15  ;;  %v3894_v41 = vsel %vm400_vm4, %v7587_v8, %v7655_v9  ;;  %v3913_v9 = vmul.f32 %v3895_v22, %v6242_v14  ;;  %v4115_v0 = vsel %vm588_vm5, %v7776_v61, %v7599_v16 }
 0x4ac   :  { %v3538_v34 = vpack.c.bf16 %v3526_v17, %v3526_v17  ;;  %v3504_v1 = vpop.permute.xlu0 %3503  ;;  %v3539_v40 = vpack.c.bf16 %v3527_v49, %v3527_v49  ;;  %v4121_v22 = vmul.f32 %v4115_v0, %v6294_v54 }
 0x4ad   :  { %v3507_v26 = vsel %vm48_vm1, %v3498_v36, %v3504_v1  ;;  %v3516_v58 = vsel %vm48_vm1, %v3504_v1, %v3486_v12  ;;  %5305 = vperm.xlu1 %5944, %v5299_v28   ;;  %v3898_v12 = vsel %vm400_vm4, %v7651_v6, %v7591_v47  ;;  %v3897_v47 = vsel %vm400_vm4, %v7647_v48, %v7587_v8  ;;  %v5985_v8 = vld [vmem:[%s8353_s6] sm:$0xff]  }
 0x4ae   :  { %v3525_v31 = vmul.f32 %v3516_v58, %v6189_v38  ;;  %v3528_v39 = vmul.f32 %v3507_v26, %v6200_v43  ;;  %5582 = vmatmul.mubr.msk.bf16.gmra.mrb[84].mxu0 %vm1837_vm11, %v5984_v51  ;;  %5588 = vmatprep.subr.msk.bf16.mxu0 %vm1844_vm10, %v3538_v34  ;;  %v3887_v3 = vpop.permute.xlu1 %3886  ;;  %v3907_v38 = vmul.f32 %v3900_v50, %v6215_v52  ;;  %v3759_v16 = vsel %vm1844_vm10, %v3539_v40, 0 }
 0x4af   :  { %5310 = vperm.xlu0 %5943, %v5300_v37   ;;  %5585 = vmatmul.mubr.msk.bf16.gmra.mrb[84].mxu1 %vm1837_vm11, %v5984_v51  ;;  %v3909_v6 = vmul.f32 %v3894_v41, %v6242_v14  ;;  %v3912_v11 = vmul.f32 %v3898_v12, %v6235_v5  ;;  %v3908_v49 = vmul.f32 %v3897_v47, %v6235_v5 }
 0x4b0   :  { %v3537_v43 = vpack.c.bf16 %v3525_v31, %v3525_v31  ;;  %v3540_v29 = vpack.c.bf16 %v3528_v39, %v3528_v39  ;;  %v7842_v36 = vpop.permute.xlu0 %4457  ;;  %3796 = vmatprep.mubr.bf16.mxu0 %v8431_v24  ;;  %3849 = vmatprep.mubr.bf16.mxu1 %v8431_v24  ;;  %v3924_v28 = vpack.c.bf16 %v3911_v32, %v3907_v38 }
 0x4b1   :  { %5315 = vperm.xlu1 %5944, %v5301_v59   ;;  %v3926_v51 = vpack.c.bf16 %v3913_v9, %v3909_v6  ;;  %v3925_v37 = vpack.c.bf16 %v3912_v11, %v3908_v49  ;;  %v8451_v32 = vpack.c.bf16 %v7675_v56, %v7672_v13  ;;  %v5986_v59 = vld [vmem:[%s8353_s6 + $0x8] sm:$0xff]   ;;  %v4106_v40 = vsel %vm588_vm5, %v7750_v19, %v7776_v61 }
 0x4b2   :  { %5591 = vmatprep.subr.msk.bf16.mxu1 %vm1844_vm10, %v3540_v29  ;;  %v4100_v18 = vpop.permute.xlu1 %4099  ;;  %v3753_v17 = vsel %vm1844_vm10, %v3537_v43, 0  ;;  %v4109_v61 = vsel %vm588_vm5, %v7687_v42, %v7750_v19  ;;  %v4108_v6 = vsel %vm588_vm5, %v7677_v25, %v7741_v30  ;;  %v8452_v25 = vpack.c.bf16 %v7699_v23, %v7696_v15 }
 0x4b3   :  { %5320 = vperm.xlu0 %5943, %v5302_v35   ;;  %v4114_v48 = vsel %vm588_vm5, %v4100_v18, %v7595_v46  ;;  %3767 = vmatpush1.bf16.msra.mxu0 %v3753_v17  ;;  %v4105_v31 = vsel %vm588_vm5, %v7741_v30, %v4100_v18  ;;  %v4123_v0 = vmul.f32 %v4109_v61, %v6297_v55  ;;  %v5987_v17 = vld [vmem:[%s8353_s6 + $0x20] sm:$0xff]  }
 0x4b4   :  { %v4117_v34 = vmul.f32 %v4114_v48, %v6294_v54  ;;  %3820 = vmatpush1.bf16.msra.mxu1 %v3759_v16  ;;  %v7871_v1 = vpop.permute.xlu0 %4463  ;;  %3959 = vmatprep.subr.bf16.mxu0 %v3924_v28  ;;  %v4120_v38 = vmul.f32 %v4105_v31, %v6282_v45  ;;  %v4119_v28 = vmul.f32 %v4108_v6, %v6297_v55 }
 0x4b5   :  { %4012 = vmatprep.subr.bf16.mxu1 %v3926_v51  ;;  %v4302_v61 = vpack.c.bf16 %v7491_v2, %v7491_v2 }
 0x4b6   :  { %v4134_v50 = vpack.c.bf16 %v4121_v22, %v4117_v34  ;;  %5589 = vmatmul.mubr.msk.bf16.vlgmr.msra.gmra.mrb[80].mxu0 %vm1837_vm11, %v5985_v8  ;;  %v7874_v46 = vpop.permute.xlu1 %4085  ;;  %v5988_v34 = vld [vmem:[%s8353_s6 + $0x28] sm:$0xff]  }
 0x4b7   :  { %5592 = vmatmul.mubr.msk.bf16.vlgmr.msra.gmra.mrb[80].mxu1 %vm1837_vm11, %v5985_v8  ;;  %3960 = vmatpush1.bf16.msra.mxu0 %v8451_v32  ;;  %v4136_v8 = vpack.c.bf16 %v4123_v0, %v4119_v28 }
 0x4b8   :  { %4013 = vmatpush1.bf16.msra.mxu1 %v3925_v37  ;;  %v3881_v26 = vpop.permute.xlu0 %3880  ;;  %3806 = vmatprep.mubr.bf16.mxu0 %v8431_v24 }
 0x4b9   :  { %v3899_v58 = vsel %vm400_vm4, %v3881_v26, %v3887_v3  ;;  %v3902_v41 = vsel %vm400_vm4, %v7796_v21, %v3881_v26  ;;  %3859 = vmatprep.mubr.bf16.mxu1 %v8431_v24 }
 0x4ba   :  { %v3915_v13 = vmul.f32 %v3902_v41, %v6215_v52  ;;  %v3916_v56 = vmul.f32 %v3899_v58, %v6235_v5  ;;  %v4098_v39 = vpop.permute.xlu1 %4097 }
 0x4bc   :  { %v3928_v12 = vpack.c.bf16 %v3915_v13, %v3915_v13  ;;  %v3893_v9 = vpop.permute.xlu0 %3892  ;;  %v3929_v5 = vpack.c.bf16 %v3916_v56, %v3916_v56 }
 0x4bd   :  { %v3896_v43 = vsel %vm400_vm4, %v3887_v3, %v3893_v9  ;;  %v3905_v52 = vsel %vm400_vm4, %v3893_v9, %v7796_v21  ;;  %v4124_v21 = vmul.f32 %v4106_v40, %v6282_v45 }
 0x4be   :  { %v3914_v29 = vmul.f32 %v3905_v52, %v6232_v63  ;;  %v3917_v35 = vmul.f32 %v3896_v43, %v6242_v14  ;;  %5590 = vmatmul.mubr.msk.bf16.gmra.mrb[84].mxu0 %vm1837_vm11, %v5986_v59  ;;  %5600 = vmatprep.subr.msk.bf16.mxu0 %vm1844_vm10, %v3928_v12  ;;  %v7909_v47 = vpop.permute.xlu1 %4455  ;;  %v3954_v11 = vsel %vm1844_vm10, %v3929_v5, 0  ;;  %v5989_v12 = vld [vmem:[%s8353_s6 + $0x30] sm:$0xff]   ;;  %v8455_v5 = vld [vmem:[#allocation6_spill] sm:$0xff] }
 0x4bf   :  { %5593 = vmatmul.mubr.msk.bf16.gmra.mrb[84].mxu1 %vm1837_vm11, %v5986_v59  ;;  %3991 = vmatprep.mubr.bf16.mxu0 %v8431_v24  ;;  %v4137_v18 = vpack.c.bf16 %v4124_v21, %v4120_v38  ;;  %v4300_v59 = vpack.c.bf16 %v7463_v57, %v7459_v33  ;;  %v8453_v33 = vld [vmem:[#allocation21_spill] sm:$0xff]  ;;  %v8454_v38 = vld [vmem:[#allocation22_spill] sm:$0xff] }
 0x4c0   :  { %v3927_v63 = vpack.c.bf16 %v3914_v29, %v3914_v29  ;;  %v3930_v3 = vpack.c.bf16 %v3917_v35, %v3917_v35  ;;  %v7918_v14 = vpop.permute.xlu0 %4469  ;;  %4044 = vmatprep.mubr.bf16.mxu1 %v8431_v24  ;;  %v4297_v57 = vpack.c.bf16 %v8453_v33, %v7417_v10  ;;  %v4299_v43 = vpack.c.bf16 %v7427_v44, %v8454_v38  ;;  %v8456_v21 = vld [vmem:[#allocation5_spill] sm:$0xff] }
 0x4c1   :  { %v4301_v10 = vpack.c.bf16 %v7487_v62, %v7487_v62  ;;  %v4304_v44 = vpack.c.bf16 %v7497_v60, %v7497_v60 }
 0x4c2   :  { %5603 = vmatprep.subr.msk.bf16.mxu1 %vm1844_vm10, %v3930_v3  ;;  %v7927_v42 = vpop.permute.xlu1 %4461  ;;  %v3948_v19 = vsel %vm1844_vm10, %v3927_v63, 0  ;;  %v4303_v3 = vpack.c.bf16 %v7495_v4, %v7495_v4  ;;  %v5990_v4 = vld [vmem:[%s8353_s6 + $0x38] sm:$0xff]  }
 0x4c3   :  { %3962 = vmatpush1.bf16.msra.mxu0 %v3948_v19  ;;  %4015 = vmatpush1.bf16.msra.mxu1 %v3954_v11  ;;  %v4322_v19 = vsel %vm1844_vm10, %v4301_v10, 0  ;;  %v4485_v28 = vsel %vm924_vm6, %v7909_v47, %v7927_v42 }
 0x4c4   :  { %v7935_v30 = vpop.permute.xlu0 %4475  ;;  %4170 = vmatprep.subr.bf16.mxu0 %v8452_v25  ;;  %4223 = vmatprep.subr.bf16.mxu1 %v4137_v18  ;;  %v4328_v11 = vsel %vm1844_vm10, %v4303_v3, 0 }
 0x4c5   :  { %v4489_v52 = vsel %vm924_vm6, %v7935_v30, %v7842_v36 }
 0x4c6   :  { %5601 = vmatmul.mubr.msk.bf16.vlgmr.msra.gmra.mrb[80].mxu0 %vm1837_vm11, %v5987_v17  ;;  %v7941_v48 = vpop.permute.xlu1 %4467  ;;  %v4498_v62 = vmul.f32 %v4489_v52, %v8456_v21 }
 0x4c7   :  { %5604 = vmatmul.mubr.msk.bf16.vlgmr.msra.gmra.mrb[80].mxu1 %vm1837_vm11, %v5987_v17  ;;  %4171 = vmatpush1.bf16.msra.mxu0 %v4134_v50  ;;  %v4482_v9 = vsel %vm924_vm6, %v7927_v42, %v7941_v48 }
 0x4c8   :  { %4224 = vmatpush1.bf16.msra.mxu1 %v4136_v8  ;;  %v4092_v16 = vpop.permute.xlu0 %4091  ;;  %4001 = vmatprep.mubr.bf16.mxu0 %v8431_v24  ;;  %v4492_v29 = vmul.f32 %v4482_v9, %v8455_v5 }
 0x4c9   :  { %v4110_v51 = vsel %vm588_vm5, %v4092_v16, %v4098_v39  ;;  %v4113_v15 = vsel %vm588_vm5, %v7874_v46, %v4092_v16  ;;  %4054 = vmatprep.mubr.bf16.mxu1 %v8431_v24  ;;  %v4486_v16 = vsel %vm924_vm6, %v7842_v36, %v7871_v1 }
 0x4ca   :  { %v4126_v23 = vmul.f32 %v4113_v15, %v6254_v27  ;;  %v4127_v49 = vmul.f32 %v4110_v51, %v6297_v55  ;;  %v7953_v22 = vpop.permute.xlu1 %4473  ;;  %v8458_v15 = vld [vmem:[#allocation8_spill] sm:$0xff] }
 0x4cb   :  { %v4488_v40 = vsel %vm924_vm6, %v7953_v22, %v7909_v47  ;;  %v4479_v8 = vsel %vm924_vm6, %v7941_v48, %v7953_v22  ;;  %v8457_v47 = vld [vmem:[#allocation7_spill] sm:$0xff]  ;;  %v4480_v48 = vsel %vm924_vm6, %v7918_v14, %v7935_v30  ;;  %v5991_v22 = vld [vmem:[%s8353_s6 + $0x40] sm:$0xff]  }
 0x4cc   :  { %v4139_v37 = vpack.c.bf16 %v4126_v23, %v4126_v23  ;;  %v4104_v50 = vpop.permute.xlu0 %4103  ;;  %v4140_v58 = vpack.c.bf16 %v4127_v49, %v4127_v49  ;;  %v4494_v63 = vmul.f32 %v4488_v40, %v8456_v21  ;;  %v4491_v42 = vmul.f32 %v4485_v28, %v8457_v47 }
 0x4cd   :  { %v4107_v32 = vsel %vm588_vm5, %v4098_v39, %v4104_v50  ;;  %v4116_v26 = vsel %vm588_vm5, %v4104_v50, %v7874_v46  ;;  %v4298_v39 = vpack.c.bf16 %v7455_v53, %v7451_v20  ;;  %v4483_v53 = vsel %vm924_vm6, %v7871_v1, %v7918_v14 }
 0x4ce   :  { %v4125_v27 = vmul.f32 %v4116_v26, %v6294_v54  ;;  %v4128_v55 = vmul.f32 %v4107_v32, %v6282_v45  ;;  %5602 = vmatmul.mubr.msk.bf16.gmra.mrb[84].mxu0 %vm1837_vm11, %v5988_v34  ;;  %5612 = vmatprep.subr.msk.bf16.mxu0 %vm1844_vm10, %v4139_v37  ;;  %v7967_v41 = vpop.permute.xlu1 %4459  ;;  %v4165_v46 = vsel %vm1844_vm10, %v4140_v58, 0  ;;  %v4496_v6 = vmul.f32 %v4483_v53, %v8455_v5  ;;  %v8459_v58 = vld [vmem:[#allocation10_spill] sm:$0xff] }
 0x4cf   :  { %5605 = vmatmul.mubr.msk.bf16.gmra.mrb[84].mxu1 %vm1837_vm11, %v5988_v34  ;;  %4202 = vmatprep.mubr.bf16.mxu0 %v8431_v24  ;;  %v4511_v18 = vpack.c.bf16 %v4498_v62, %v4494_v63  ;;  %v4493_v23 = vmul.f32 %v4479_v8, %v8458_v15  ;;  %v4495_v36 = vmul.f32 %v4486_v16, %v8457_v47  ;;  %v8461_v62 = vld [vmem:[#allocation11_spill] sm:$0xff] }
 0x4d0   :  { %v4138_v31 = vpack.c.bf16 %v4125_v27, %v4125_v27  ;;  %v4141_v13 = vpack.c.bf16 %v4128_v55, %v4128_v55  ;;  %v7971_v56 = vpop.permute.xlu0 %4668  ;;  %4255 = vmatprep.mubr.bf16.mxu1 %v8431_v24  ;;  %v4509_v60 = vpack.c.bf16 %v4496_v6, %v4492_v29  ;;  %v4497_v1 = vmul.f32 %v4480_v48, %v8458_v15 }
 0x4d1   :  { %v4508_v37 = vpack.c.bf16 %v4495_v36, %v4491_v42 }
 0x4d2   :  { %5615 = vmatprep.subr.msk.bf16.mxu1 %vm1844_vm10, %v4141_v13  ;;  %v7975_v54 = vpop.permute.xlu1 %4471  ;;  %v4159_v45 = vsel %vm1844_vm10, %v4138_v31, 0  ;;  %v4510_v50 = vpack.c.bf16 %v4497_v1, %v4493_v23  ;;  %v5994_v1 = vld [vmem:[%s8353_s6 + $0x58] sm:$0xff]  }
 0x4d3   :  { %4173 = vmatpush1.bf16.msra.mxu0 %v4159_v45  ;;  %4226 = vmatpush1.bf16.msra.mxu1 %v4165_v46 }
 0x4d4   :  { %v7994_v20 = vpop.permute.xlu0 %4674  ;;  %4333 = vmatprep.subr.bf16.mxu0 %v4298_v39  ;;  %4386 = vmatprep.subr.bf16.mxu1 %v4300_v59  ;;  %v5992_v39 = vld [vmem:[%s8353_s6 + $0x48] sm:$0xff]  }
 0x4d6   :  { %5613 = vmatmul.mubr.msk.bf16.vlgmr.msra.gmra.mrb[80].mxu0 %vm1837_vm11, %v5989_v12  ;;  %v8010_v35 = vpop.permute.xlu1 %4666 }
 0x4d7   :  { %5616 = vmatmul.mubr.msk.bf16.vlgmr.msra.gmra.mrb[80].mxu1 %vm1837_vm11, %v5989_v12  ;;  %4334 = vmatpush1.bf16.msra.mxu0 %v4297_v57 }
 0x4d8   :  { %4387 = vmatpush1.bf16.msra.mxu1 %v4299_v43  ;;  %v8023_v0 = vpop.permute.xlu0 %4680  ;;  %5624 = vmatprep.subr.msk.bf16.mxu0 %vm1844_vm10, %v4302_v61 }
 0x4d9   :  { %5627 = vmatprep.subr.msk.bf16.mxu1 %vm1844_vm10, %v4304_v44  ;;  %4212 = vmatprep.mubr.bf16.mxu0 %v8431_v24  ;;  %v4694_v14 = vsel %vm1112_vm7, %v7994_v20, %v8023_v0 }
 0x4da   :  { %v4673_v2 = vpop.permute.xlu1 %4672  ;;  %4265 = vmatprep.mubr.bf16.mxu1 %v8431_v24  ;;  %v4707_v59 = vmul.f32 %v4694_v14, %v8459_v58 }
 0x4db   :  { %4336 = vmatpush1.bf16.msra.mxu0 %v4322_v19  ;;  %v4696_v9 = vsel %vm1112_vm7, %v8010_v35, %v4673_v2 }
 0x4dc   :  { %4389 = vmatpush1.bf16.msra.mxu1 %v4328_v11  ;;  %v8035_v17 = vpop.permute.xlu0 %4686  ;;  %4544 = vmatprep.subr.bf16.mxu0 %v4509_v60 }
 0x4dd   :  { %4597 = vmatprep.subr.bf16.mxu1 %v4511_v18  ;;  %v4700_v57 = vsel %vm1112_vm7, %v8035_v17, %v7971_v56  ;;  %v5993_v18 = vld [vmem:[%s8353_s6 + $0x50] sm:$0xff]  }
 0x4de   :  { %5614 = vmatmul.mubr.msk.bf16.gmra.mrb[84].mxu0 %vm1837_vm11, %v5990_v4  ;;  %v4679_v25 = vpop.permute.xlu1 %4678 }
 0x4df   :  { %5617 = vmatmul.mubr.msk.bf16.gmra.mrb[84].mxu1 %vm1837_vm11, %v5990_v4  ;;  %4365 = vmatprep.mubr.bf16.mxu0 %v8431_v24  ;;  %v4693_v32 = vsel %vm1112_vm7, %v4673_v2, %v4679_v25  ;;  %v4702_v2 = vmul.f32 %v4696_v9, %v8461_v62  ;;  %v8464_v9 = vld [vmem:[#allocation13_spill] sm:$0xff] }
 0x4e0   :  { %v8052_v51 = vpop.permute.xlu0 %4879  ;;  %4418 = vmatprep.mubr.bf16.mxu1 %v8431_v24  ;;  %v4703_v27 = vmul.f32 %v4693_v32, %v8459_v58 }
 0x4e2   :  { %v4685_v49 = vpop.permute.xlu1 %4684  ;;  %v4720_v52 = vpack.c.bf16 %v4707_v59, %v4703_v27 }
 0x4e3   :  { %v4699_v12 = vsel %vm1112_vm7, %v4685_v49, %v8010_v35 }
 0x4e4   :  { %v8066_v34 = vpop.permute.xlu0 %4885 }
 0x4e6   :  { %v8070_v26 = vpop.permute.xlu1 %4670  ;;  %5625 = vmatmul.mubr.msk.bf16.vlgmr.msra.gmra.mrb[80].mxu0 %vm1837_vm11, %v5991_v22 }
 0x4e7   :  { %5628 = vmatmul.mubr.msk.bf16.vlgmr.msra.gmra.mrb[80].mxu1 %vm1837_vm11, %v5991_v22  ;;  %4545 = vmatpush1.bf16.msra.mxu0 %v4508_v37 }
 0x4e8   :  { %4598 = vmatpush1.bf16.msra.mxu1 %v4510_v50  ;;  %v4466_v30 = vpop.permute.xlu0 %4465  ;;  %4375 = vmatprep.mubr.bf16.mxu0 %v8431_v24 }
 0x4e9   :  { %v4484_v55 = vsel %vm924_vm6, %v4466_v30, %v7975_v54  ;;  %v4487_v31 = vsel %vm924_vm6, %v7967_v41, %v4466_v30  ;;  %4428 = vmatprep.mubr.bf16.mxu1 %v8431_v24 }
 0x4ea   :  { %v4499_v13 = vmul.f32 %v4487_v31, %v8457_v47  ;;  %v4500_v45 = vmul.f32 %v4484_v55, %v8455_v5  ;;  %v8089_v46 = vpop.permute.xlu1 %4682  ;;  %v8460_v5 = vld [vmem:[#allocation9_spill] sm:$0xff] }
 0x4eb   :  { %v4705_v29 = vmul.f32 %v4699_v12, %v8460_v5 }
 0x4ec   :  { %v4512_v40 = vpack.c.bf16 %v4499_v13, %v4499_v13  ;;  %v4513_v53 = vpack.c.bf16 %v4500_v45, %v4500_v45  ;;  %v4478_v33 = vpop.permute.xlu0 %4477 }
 0x4ed   :  { %v4481_v38 = vsel %vm924_vm6, %v7975_v54, %v4478_v33  ;;  %v4490_v43 = vsel %vm924_vm6, %v4478_v33, %v7967_v41  ;;  %v4697_v54 = vsel %vm1112_vm7, %v7971_v56, %v7994_v20  ;;  %v4690_v41 = vsel %vm1112_vm7, %v4679_v25, %v4685_v49  ;;  %v8462_v20 = vld [vmem:[#allocation12_spill] sm:$0xff] }
 0x4ee   :  { %v4501_v35 = vmul.f32 %v4481_v38, %v8458_v15  ;;  %v4502_v61 = vmul.f32 %v4490_v43, %v8456_v21  ;;  %v4878_v10 = vpop.permute.xlu1 %4877  ;;  %5626 = vmatmul.mubr.msk.bf16.gmra.mrb[84].mxu0 %vm1837_vm11, %v5992_v39  ;;  %5636 = vmatprep.subr.msk.bf16.mxu0 %vm1844_vm10, %v4513_v53  ;;  %v4533_v63 = vsel %vm1844_vm10, %v4512_v40, 0  ;;  %v4709_v21 = vmul.f32 %v4700_v57, %v8460_v5  ;;  %v8463_v15 = vld [vmem:[#allocation14_spill] sm:$0xff]  ;;  %v8465_v57 = vld [vmem:[#allocation15_spill] sm:$0xff] }
 0x4ef   :  { %5629 = vmatmul.mubr.msk.bf16.gmra.mrb[84].mxu1 %vm1837_vm11, %v5992_v39  ;;  %4547 = vmatpush1.bf16.msra.mxu0 %v4533_v63  ;;  %v4691_v56 = vsel %vm1112_vm7, %v8023_v0, %v8035_v17  ;;  %v4704_v19 = vmul.f32 %v4690_v41, %v8462_v20  ;;  %v4706_v28 = vmul.f32 %v4697_v54, %v8461_v62 }
 0x4f0   :  { %v4514_v44 = vpack.c.bf16 %v4501_v35, %v4501_v35  ;;  %v4515_v3 = vpack.c.bf16 %v4502_v61, %v4502_v61  ;;  %v4892_v6 = vpop.permute.xlu0 %4891  ;;  %4755 = vmatprep.subr.bf16.mxu0 %v4720_v52  ;;  %4576 = vmatprep.mubr.bf16.mxu0 %v8431_v24  ;;  %v4722_v11 = vpack.c.bf16 %v4709_v21, %v4705_v29  ;;  %v8466_v61 = vld [vmem:[#allocation16_spill] sm:$0xff] }
 0x4f1   :  { %4629 = vmatprep.mubr.bf16.mxu1 %v8431_v24  ;;  %v4708_v25 = vmul.f32 %v4691_v56, %v8462_v20  ;;  %v4719_v17 = vpack.c.bf16 %v4706_v28, %v4702_v2  ;;  %v4905_v42 = vsel %vm1300_vm8, %v8066_v34, %v4892_v6 }
 0x4f2   :  { %5639 = vmatprep.subr.msk.bf16.mxu1 %vm1844_vm10, %v4515_v3  ;;  %v4884_v60 = vpop.permute.xlu1 %4883  ;;  %v4539_v4 = vsel %vm1844_vm10, %v4514_v44, 0  ;;  %v4918_v32 = vmul.f32 %v4905_v42, %v8463_v15 }
 0x4f3   :  { %4600 = vmatpush1.bf16.msra.mxu1 %v4539_v4  ;;  %v4721_v8 = vpack.c.bf16 %v4708_v25, %v4704_v19  ;;  %v4907_v30 = vsel %vm1300_vm8, %v4878_v10, %v4884_v60 }
 0x4f4   :  { %v4898_v0 = vpop.permute.xlu0 %4897  ;;  %4808 = vmatprep.subr.bf16.mxu1 %v4722_v11  ;;  %v4913_v38 = vmul.f32 %v4907_v30, %v8465_v57  ;;  %v8468_v30 = vld [vmem:[#allocation18_spill] sm:$0xff] }
 0x4f5   :  { %v4911_v27 = vsel %vm1300_vm8, %v4898_v0, %v8052_v51  ;;  %v4902_v43 = vsel %vm1300_vm8, %v4892_v6, %v4898_v0 }
 0x4f6   :  { %v4890_v16 = vpop.permute.xlu1 %4889  ;;  %5637 = vmatmul.mubr.msk.bf16.vlgmr.msra.gmra.mrb[80].mxu0 %vm1837_vm11, %v5993_v18  ;;  %v4920_v52 = vmul.f32 %v4911_v27, %v8464_v9  ;;  %v4919_v21 = vmul.f32 %v4902_v43, %v8466_v61 }
 0x4f7   :  { %5640 = vmatmul.mubr.msk.bf16.vlgmr.msra.gmra.mrb[80].mxu1 %vm1837_vm11, %v5993_v18  ;;  %v4904_v47 = vsel %vm1300_vm8, %v4884_v60, %v4890_v16  ;;  %4756 = vmatpush1.bf16.msra.mxu0 %v4719_v17  ;;  %v5996_v60 = vld [vmem:[%s8353_s6 + $0x68] sm:$0xff]  }
 0x4f8   :  { %4809 = vmatpush1.bf16.msra.mxu1 %v4721_v8  ;;  %4586 = vmatprep.mubr.bf16.mxu0 %v8431_v24  ;;  %v4914_v23 = vmul.f32 %v4904_v47, %v8463_v15 }
 0x4f9   :  { %v4677_v48 = vpop.permute.xlu0 %4676  ;;  %4639 = vmatprep.mubr.bf16.mxu1 %v8431_v24 }
 0x4fa   :  { %v4695_v49 = vsel %vm1112_vm7, %v4677_v48, %v8089_v46  ;;  %v4698_v22 = vsel %vm1112_vm7, %v8070_v26, %v4677_v48  ;;  %v4896_v36 = vpop.permute.xlu1 %4895  ;;  %v4931_v12 = vpack.c.bf16 %v4918_v32, %v4914_v23 }
 0x4fb   :  { %v4710_v37 = vmul.f32 %v4698_v22, %v8461_v62  ;;  %v4711_v50 = vmul.f32 %v4695_v49, %v8459_v58  ;;  %v4910_v14 = vsel %vm1300_vm8, %v4896_v36, %v4878_v10  ;;  %v4901_v45 = vsel %vm1300_vm8, %v4890_v16, %v4896_v36 }
 0x4fc   :  { %v4916_v40 = vmul.f32 %v4910_v14, %v8464_v9  ;;  %v4915_v10 = vmul.f32 %v4901_v45, %v8466_v61  ;;  %v5997_v14 = vld [vmem:[%s8353_s6 + $0x70] sm:$0xff]  }
 0x4fd   :  { %v4723_v55 = vpack.c.bf16 %v4710_v37, %v4710_v37  ;;  %v4724_v31 = vpack.c.bf16 %v4711_v50, %v4711_v50  ;;  %v4689_v13 = vpop.permute.xlu0 %4688 }
 0x4fe   :  { %v4692_v58 = vsel %vm1112_vm7, %v8089_v46, %v4689_v13  ;;  %v4701_v39 = vsel %vm1112_vm7, %v4689_v13, %v8070_v26  ;;  %v4882_v59 = vpop.permute.xlu1 %4881  ;;  %5638 = vmatmul.mubr.msk.bf16.gmra.mrb[84].mxu0 %vm1837_vm11, %v5994_v1  ;;  %v4908_v26 = vsel %vm1300_vm8, %v8052_v51, %v8066_v34  ;;  %v5995_v34 = vld [vmem:[%s8353_s6 + $0x60] sm:$0xff]   ;;  %v4933_v41 = vpack.c.bf16 %v4920_v52, %v4916_v40 }
 0x4ff   :  { %v4712_v53 = vmul.f32 %v4692_v58, %v8462_v20  ;;  %v4713_v33 = vmul.f32 %v4701_v39, %v8460_v5  ;;  %5641 = vmatmul.mubr.msk.bf16.gmra.mrb[84].mxu1 %vm1837_vm11, %v5994_v1  ;;  %5648 = vmatprep.subr.msk.bf16.mxu0 %vm1844_vm10, %v4724_v31  ;;  %v4744_v46 = vsel %vm1844_vm10, %v4723_v55, 0  ;;  %v4917_v63 = vmul.f32 %v4908_v26, %v8465_v57  ;;  %v8467_v1 = vld [vmem:[#allocation19_spill] sm:$0xff]  ;;  %v8470_v26 = vld [vmem:[#allocation17_spill] sm:$0xff] }
 0x500   :  { %4758 = vmatpush1.bf16.msra.mxu0 %v4744_v46  ;;  %4787 = vmatprep.mubr.bf16.mxu0 %v8431_v24  ;;  %v4932_v6 = vpack.c.bf16 %v4919_v21, %v4915_v10 }
 0x501   :  { %v4725_v5 = vpack.c.bf16 %v4712_v53, %v4712_v53  ;;  %v4726_v29 = vpack.c.bf16 %v4713_v33, %v4713_v33  ;;  %v8193_v35 = vpop.permute.xlu0 %5090  ;;  %4966 = vmatprep.subr.bf16.mxu0 %v4931_v12  ;;  %4840 = vmatprep.mubr.bf16.mxu1 %v8431_v24  ;;  %v4930_v44 = vpack.c.bf16 %v4917_v63, %v4913_v38 }
 0x502   :  { %v4894_v51 = vpop.permute.xlu1 %4893 }
 0x503   :  { %5651 = vmatprep.subr.msk.bf16.mxu1 %vm1844_vm10, %v4726_v29  ;;  %v4750_v54 = vsel %vm1844_vm10, %v4725_v5, 0 }
 0x504   :  { %4811 = vmatpush1.bf16.msra.mxu1 %v4750_v54 }
 0x505   :  { %v5097_v3 = vpop.permute.xlu0 %5096  ;;  %5019 = vmatprep.subr.bf16.mxu1 %v4933_v41 }
 0x506   :  { %v5089_v62 = vpop.permute.xlu1 %5088  ;;  %5649 = vmatmul.mubr.msk.bf16.vlgmr.msra.gmra.mrb[80].mxu0 %vm1837_vm11, %v5995_v34  ;;  %v5119_v23 = vsel %vm1488_vm9, %v8193_v35, %v5097_v3 }
 0x507   :  { %5652 = vmatmul.mubr.msk.bf16.vlgmr.msra.gmra.mrb[80].mxu1 %vm1837_vm11, %v5995_v34  ;;  %4967 = vmatpush1.bf16.msra.mxu0 %v4930_v44  ;;  %v5128_v45 = vmul.f32 %v5119_v23, %v8467_v1 }
 0x508   :  { %5020 = vmatpush1.bf16.msra.mxu1 %v4932_v6  ;;  %4797 = vmatprep.mubr.bf16.mxu0 %v8431_v24 }
 0x509   :  { %v4888_v2 = vpop.permute.xlu0 %4887  ;;  %4850 = vmatprep.mubr.bf16.mxu1 %v8431_v24 }
 0x50a   :  { %v4906_v56 = vsel %vm1300_vm8, %v4888_v2, %v4894_v51  ;;  %v4909_v20 = vsel %vm1300_vm8, %v4882_v59, %v4888_v2  ;;  %v5095_v19 = vpop.permute.xlu1 %5094 }
 0x50b   :  { %v4921_v4 = vmul.f32 %v4909_v20, %v8465_v57  ;;  %v4922_v11 = vmul.f32 %v4906_v56, %v8463_v15  ;;  %v5118_v16 = vsel %vm1488_vm9, %v5089_v62, %v5095_v19  ;;  %v5999_v20 = vld [vmem:[%s8353_s6 + $0x80] sm:$0xff]  }
 0x50c   :  { %v5124_v37 = vmul.f32 %v5118_v16, %v8467_v1 }
 0x50d   :  { %v4934_v18 = vpack.c.bf16 %v4921_v4, %v4921_v4  ;;  %v4935_v28 = vpack.c.bf16 %v4922_v11, %v4922_v11  ;;  %v4900_v25 = vpop.permute.xlu0 %4899 }
 0x50e   :  { %v4903_v0 = vsel %vm1300_vm8, %v4894_v51, %v4900_v25  ;;  %v4912_v17 = vsel %vm1300_vm8, %v4900_v25, %v4882_v59  ;;  %v5101_v8 = vpop.permute.xlu1 %5100  ;;  %5650 = vmatmul.mubr.msk.bf16.gmra.mrb[84].mxu0 %vm1837_vm11, %v5996_v60  ;;  %v5141_v12 = vpack.c.bf16 %v5128_v45, %v5124_v37 }
 0x50f   :  { %v4923_v47 = vmul.f32 %v4903_v0, %v8466_v61  ;;  %v4924_v42 = vmul.f32 %v4912_v17, %v8464_v9  ;;  %5653 = vmatmul.mubr.msk.bf16.gmra.mrb[84].mxu1 %vm1837_vm11, %v5996_v60  ;;  %5660 = vmatprep.subr.msk.bf16.mxu0 %vm1844_vm10, %v4935_v28  ;;  %v4955_v48 = vsel %vm1844_vm10, %v4934_v18, 0  ;;  %v5115_v15 = vsel %vm1488_vm9, %v5095_v19, %v5101_v8  ;;  %v8469_v9 = vld [vmem:[#allocation20_spill] sm:$0xff]  ;;  %v5998_v61 = vld [vmem:[%s8353_s6 + $0x78] sm:$0xff]   ;;  %v6000_v60 = vld [vmem:[%s8353_s6 + $0x88] sm:$0xff]  }
 0x510   :  { %4969 = vmatpush1.bf16.msra.mxu0 %v4955_v48  ;;  %4998 = vmatprep.mubr.bf16.mxu0 %v8431_v24  ;;  %v5125_v27 = vmul.f32 %v5115_v15, %v8468_v30 }
 0x511   :  { %v4936_v49 = vpack.c.bf16 %v4923_v47, %v4923_v47  ;;  %v4937_v22 = vpack.c.bf16 %v4924_v42, %v4924_v42  ;;  %v5103_v36 = vpop.permute.xlu0 %5102  ;;  %5051 = vmatprep.mubr.bf16.mxu1 %v8431_v24 }
 0x512   :  { %v5116_v50 = vsel %vm1488_vm9, %v5097_v3, %v5103_v36  ;;  %v5107_v32 = vpop.permute.xlu1 %5106 }
 0x513   :  { %v5129_v55 = vmul.f32 %v5116_v50, %v8468_v30  ;;  %5663 = vmatprep.subr.msk.bf16.mxu1 %vm1844_vm10, %v4937_v22  ;;  %v5112_v31 = vsel %vm1488_vm9, %v5101_v8, %v5107_v32  ;;  %v4961_v13 = vsel %vm1844_vm10, %v4936_v49, 0  ;;  %v5121_v58 = vsel %vm1488_vm9, %v5107_v32, %v5089_v62 }
 0x514   :  { %5022 = vmatpush1.bf16.msra.mxu1 %v4961_v13  ;;  %v5126_v40 = vmul.f32 %v5112_v31, %v8469_v9  ;;  %v5127_v57 = vmul.f32 %v5121_v58, %v8470_v26 }
 0x515   :  { %v5109_v39 = vpop.permute.xlu0 %5108  ;;  %v5142_v59 = vpack.c.bf16 %v5129_v55, %v5125_v27 }
 0x516   :  { %v5113_v53 = vsel %vm1488_vm9, %v5103_v36, %v5109_v39  ;;  %v5122_v33 = vsel %vm1488_vm9, %v5109_v39, %v8193_v35  ;;  %v5093_v46 = vpop.permute.xlu1 %5092  ;;  %5661 = vmatmul.mubr.msk.bf16.vlgmr.msra.gmra.mrb[80].mxu0 %vm1837_vm11, %v5997_v14 }
 0x517   :  { %v5130_v38 = vmul.f32 %v5113_v53, %v8469_v9  ;;  %v5131_v43 = vmul.f32 %v5122_v33, %v8470_v26  ;;  %5664 = vmatmul.mubr.msk.bf16.vlgmr.msra.gmra.mrb[80].mxu1 %vm1837_vm11, %v5997_v14  ;;  %5177 = vmatprep.subr.bf16.mxu0 %v5142_v59 }
 0x518   :  { %5178 = vmatpush1.bf16.msra.mxu0 %v5141_v12  ;;  %5008 = vmatprep.mubr.bf16.mxu0 %v8431_v24 }
 0x519   :  { %v5143_v52 = vpack.c.bf16 %v5130_v38, %v5126_v40  ;;  %v5099_v5 = vpop.permute.xlu0 %5098  ;;  %v5144_v29 = vpack.c.bf16 %v5131_v43, %v5127_v57  ;;  %5061 = vmatprep.mubr.bf16.mxu1 %v8431_v24 }
 0x51a   :  { %v5120_v35 = vsel %vm1488_vm9, %v5093_v46, %v5099_v5 }
 0x51b   :  { %v5132_v10 = vmul.f32 %v5120_v35, %v8467_v1  ;;  %5230 = vmatprep.subr.bf16.mxu1 %v5144_v29  ;;  %v5105_v51 = vpop.permute.xlu1 %5104 }
 0x51c   :  { %v5117_v34 = vsel %vm1488_vm9, %v5099_v5, %v5105_v51  ;;  %5231 = vmatpush1.bf16.msra.mxu1 %v5143_v52 }
 0x51d   :  { %v5145_v63 = vpack.c.bf16 %v5132_v10, %v5132_v10  ;;  %v5133_v54 = vmul.f32 %v5117_v34, %v8468_v30  ;;  %v5111_v41 = vpop.permute.xlu0 %5110 }
 0x51e   :  { %v5114_v21 = vsel %vm1488_vm9, %v5105_v51, %v5111_v41  ;;  %v5123_v44 = vsel %vm1488_vm9, %v5111_v41, %v5093_v46  ;;  %5662 = vmatmul.mubr.msk.bf16.gmra.mrb[84].mxu0 %vm1837_vm11, %v5998_v61 }
 0x51f   :  { %v5146_v3 = vpack.c.bf16 %v5133_v54, %v5133_v54  ;;  %v5134_v6 = vmul.f32 %v5114_v21, %v8469_v9  ;;  %v5135_v62 = vmul.f32 %v5123_v44, %v8470_v26  ;;  %5665 = vmatmul.mubr.msk.bf16.gmra.mrb[84].mxu1 %vm1837_vm11, %v5998_v61  ;;  %5209 = vmatprep.mubr.bf16.mxu0 %v8431_v24  ;;  %v5166_v7 = vsel %vm1844_vm10, %v5145_v63, 0 }
 0x520   :  { %5262 = vmatprep.mubr.bf16.mxu1 %v8431_v24 }
 0x521   :  { %v5147_v2 = vpack.c.bf16 %v5134_v6, %v5134_v6  ;;  %v5148_v56 = vpack.c.bf16 %v5135_v62, %v5135_v62  ;;  %5672 = vmatprep.subr.msk.bf16.mxu0 %vm1844_vm10, %v5146_v3 }
 0x522   :  { %5180 = vmatpush1.bf16.msra.mxu0 %v5166_v7 }
 0x523   :  { %5675 = vmatprep.subr.msk.bf16.mxu1 %vm1844_vm10, %v5148_v56  ;;  %v5172_v19 = vsel %vm1844_vm10, %v5147_v2, 0 }
 0x524   :  { %5233 = vmatpush1.bf16.msra.mxu1 %v5172_v19 }
 0x526   :  { %5673 = vmatmul.mubr.msk.bf16.vlgmr.msra.gmra.mrb[80].mxu0 %vm1837_vm11, %v5999_v20 }
 0x527   :  { %5676 = vmatmul.mubr.msk.bf16.vlgmr.msra.gmra.mrb[80].mxu1 %vm1837_vm11, %v5999_v20  ;;  %5219 = vmatprep.mubr.bf16.mxu0 %v8431_v24 }
 0x528   :  { %5272 = vmatprep.mubr.bf16.mxu1 %v8431_v24 }
 0x52c   :  { %v5306_v4 = vpop.permute.xlu1 %5305 }
 0x52e   :  { %5674 = vmatmul.mubr.msk.bf16.gmra.mrb[84].mxu0 %vm1837_vm11, %v6000_v60  ;;  %v5311_v11 = vpop.permute.xlu0 %5310 }
 0x52f   :  { %5677 = vmatmul.mubr.msk.bf16.gmra.mrb[84].mxu1 %vm1837_vm11, %v6000_v60 }
 0x530   :  { %v5316_v55 = vpop.permute.xlu1 %5315 }
 0x532   :  { %v5321_v13 = vpop.permute.xlu0 %5320 }
 0x5f9   :  { %v5211_v18 = vpop.f32.mrb[80].mxu0 }
 0x5fa   :  { %v5323_v28 = vadd.f32 %v5306_v4, %v5211_v18  ;;  %v5264_v25 = vpop.f32.mrb[80].mxu1  ;;  %v5213_v0 = vpop.f32.mrb[81].mxu0 }
 0x5fb   :  { %v5325_v17 = vadd.f32 %v5306_v4, %v5264_v25  ;;  %v5324_v8 = vadd.f32 %v5306_v4, %v5213_v0  ;;  %v5266_v16 = vpop.f32.mrb[81].mxu1  ;;  %v5215_v47 = vpop.f32.mrb[82].mxu0 }
 0x5fc   :  { %v5339_v42 = vmax.f32 %v5323_v28, 0.0  ;;  %v5326_v24 = vadd.f32 %v5306_v4, %v5266_v16  ;;  %v5327_v48 = vadd.f32 %v5311_v11, %v5215_v47  ;;  %v5268_v15 = vpop.f32.mrb[82].mxu1  ;;  %v5217_v23 = vpop.f32.mrb[83].mxu0 }
 0x5fd   :  { %v5341_v49 = vmax.f32 %v5325_v17, 0.0  ;;  %v5340_v22 = vmax.f32 %v5324_v8, 0.0  ;;  %v5329_v36 = vadd.f32 %v5311_v11, %v5268_v15  ;;  %v5328_v1 = vadd.f32 %v5311_v11, %v5217_v23  ;;  %v5270_v37 = vpop.f32.mrb[83].mxu1 }
 0x5fe   :  { %5355 = vst [vmem:[%s8355_s8] sm:$0xff] %v5339_v42  ;;  %v5342_v50 = vmax.f32 %v5326_v24, 0.0  ;;  %v5343_v32 = vmax.f32 %v5327_v48, 0.0  ;;  %v5330_v14 = vadd.f32 %v5311_v11, %v5270_v37 }
 0x5ff   :  { %5357 = vst [vmem:[%s8355_s8 + $0x10] sm:$0xff] %v5341_v49  ;;  %5356 = vst [vmem:[%s8355_s8 + $0x8] sm:$0xff] %v5340_v22  ;;  %v5345_v30 = vmax.f32 %v5329_v36, 0.0  ;;  %v5344_v27 = vmax.f32 %v5328_v1, 0.0 }
 0x600   :  { %5358 = vst [vmem:[%s8355_s8 + $0x18] sm:$0xff] %v5342_v50  ;;  %5359 = vst [vmem:[%s8355_s8 + $0x20] sm:$0xff] %v5343_v32  ;;  %v5346_v31 = vmax.f32 %v5330_v14, 0.0 }
 0x601   :  { %5361 = vst [vmem:[%s8355_s8 + $0x30] sm:$0xff] %v5345_v30  ;;  %5360 = vst [vmem:[%s8355_s8 + $0x28] sm:$0xff] %v5344_v27  ;;  %v5221_v45 = vpop.f32.mrb[84].mxu0 }
 0x602   :  { %5362 = vst [vmem:[%s8355_s8 + $0x38] sm:$0xff] %v5346_v31  ;;  %v5331_v58 = vadd.f32 %v5316_v55, %v5221_v45  ;;  %v5274_v39 = vpop.f32.mrb[84].mxu1  ;;  %v5223_v59 = vpop.f32.mrb[85].mxu0 }
 0x603   :  { %v5333_v12 = vadd.f32 %v5316_v55, %v5274_v39  ;;  %v5332_v9 = vadd.f32 %v5316_v55, %v5223_v59  ;;  %v5276_v40 = vpop.f32.mrb[85].mxu1  ;;  %v5225_v53 = vpop.f32.mrb[86].mxu0 }
 0x604   :  { %v5347_v33 = vmax.f32 %v5331_v58, 0.0  ;;  %v5334_v46 = vadd.f32 %v5316_v55, %v5276_v40  ;;  %v5335_v26 = vadd.f32 %v5321_v13, %v5225_v53  ;;  %v5278_v57 = vpop.f32.mrb[86].mxu1  ;;  %v5227_v38 = vpop.f32.mrb[87].mxu0 }
 0x605   :  { %v5349_v43 = vmax.f32 %v5333_v12, 0.0  ;;  %v5348_v52 = vmax.f32 %v5332_v9, 0.0  ;;  %v5337_v5 = vadd.f32 %v5321_v13, %v5278_v57  ;;  %v5336_v29 = vadd.f32 %v5321_v13, %v5227_v38  ;;  %v5280_v35 = vpop.f32.mrb[87].mxu1 }
 0x606   :  { %5363 = vst [vmem:[%s8355_s8 + $0x40] sm:$0xff] %v5347_v33  ;;  %v5350_v61 = vmax.f32 %v5334_v46, 0.0  ;;  %v5351_v10 = vmax.f32 %v5335_v26, 0.0  ;;  %v5338_v51 = vadd.f32 %v5321_v13, %v5280_v35 }
 0x607   :  { %5365 = vst [vmem:[%s8355_s8 + $0x50] sm:$0xff] %v5349_v43  ;;  %5364 = vst [vmem:[%s8355_s8 + $0x48] sm:$0xff] %v5348_v52  ;;  %v5353_v34 = vmax.f32 %v5337_v5, 0.0  ;;  %v5352_v63 = vmax.f32 %v5336_v29, 0.0 }
 0x608   :  { %5366 = vst [vmem:[%s8355_s8 + $0x58] sm:$0xff] %v5350_v61  ;;  %5367 = vst [vmem:[%s8355_s8 + $0x60] sm:$0xff] %v5351_v10  ;;  %v5354_v54 = vmax.f32 %v5338_v51, 0.0 }
 0x609   :  { %5369 = vst [vmem:[%s8355_s8 + $0x70] sm:$0xff] %v5353_v34  ;;  %5368 = vst [vmem:[%s8355_s8 + $0x68] sm:$0xff] %v5352_v63 }
 0x60a   :  { %5370 = vst [vmem:[%s8355_s8 + $0x78] sm:$0xff] %v5354_v54 }

</bundles_post_ra>
